<compile_context>
chip_gen: v6e
topology: v6e:2x2x1
jax: 0.10.0
libtpu: 0.0.40
codegen_flags: <defaults>
</compile_context>

<pallas_src>
import functools

import jax
import jax.numpy as jnp
from jax import lax
from jax.experimental import pallas as pl
from jax.experimental.pallas import tpu as pltpu


# ----------------------------------------------------------------------------
# Fused MHSA kernel. One grid step = one batch element, all heads.
#   x_ref : (C,  HWp)   zero-padded input slab for this batch element
#   w_ref : (3C, C)     stacked [wq; wk; wv] 1x1-conv weights
#   b_ref : (3C, 1)     stacked biases
#   o_ref : (C,  HWp)   output slab (heads*d = C rows), lane-dense
# Static: heads, d (= C // heads, a full sublane group when d == 8), hw_valid.
# ----------------------------------------------------------------------------
def _mhsa_kernel(x_ref, w_ref, b_ref, o_ref, *, heads, d, hw_valid):
    f32 = jnp.float32
    C = heads * d
    HWp = x_ref.shape[-1]

    x = x_ref[...]                                                    # (C, HWp)

    # One fused QKV projection: (3C, C) @ (C, HWp) -> (3C, HWp), lane axis = HW.
    qkv = jnp.dot(w_ref[...], x, preferred_element_type=f32) + b_ref[...]

    # Additive mask for padded key columns (j >= hw_valid): exp(-1e30 - m) == 0,
    # so padded keys never contaminate the softmax numerator or denominator.
    col = lax.broadcasted_iota(jnp.int32, (1, HWp), 1)
    mask_add = jnp.where(col < hw_valid, 0.0, -1e30).astype(f32)      # (1, HWp)

    # Ones row used to produce softmax row-sums already in lane orientation.
    ones_row = jnp.ones((1, HWp), f32)

    for h in range(heads):                                            # unrolled, heads is static
        q_h = qkv[h * d:(h + 1) * d, :]                               # (d, HWp)
        k_h = qkv[C + h * d:C + (h + 1) * d, :]                       # (d, HWp)
        v_h = qkv[2 * C + h * d:2 * C + (h + 1) * d, :]               # (d, HWp)

        # energy[i, j] = sum_d q[d, i] * k[d, j]                      -> (HWp, HWp)
        s = lax.dot_general(q_h, k_h, (((0,), (0,)), ((), ())),
                            preferred_element_type=f32)
        s = s + mask_add                                              # kill padded keys

        # Numerically stable exp; normalization deferred past the V matmul.
        m = jnp.max(s, axis=-1, keepdims=True)                        # (HWp, 1)
        e = jnp.exp(s - m)                                            # (HWp, HWp)

        # Unnormalized output: o_un[d, i] = sum_j v[d, j] * e[i, j]   -> (d, HWp)
        o_un = lax.dot_general(v_h, e, (((1,), (1,)), ((), ())),
                               preferred_element_type=f32)
        # Row sums l[i] = sum_j e[i, j], produced directly as (1, HWp) on the lanes.
        l_row = lax.dot_general(ones_row, e, (((1,), (1,)), ((), ())),
                                preferred_element_type=f32)           # (1, HWp)

        # Deferred normalization: (d, HWp) scale with an EUP approximate reciprocal
        # instead of a (HWp, HWp) divide.
        o = o_un * pl.reciprocal(l_row, approx=True)
        o_ref[h * d:(h + 1) * d, :] = o.astype(o_ref.dtype)


# ----------------------------------------------------------------------------
# Wrapper: NCHW in, NCHW out. Only cheap XLA reshape/pad/slice outside the kernel.
# ----------------------------------------------------------------------------
def mhsa_forward(x_nchw, params, heads=4):
    B, C, W, H = x_nchw.shape
    assert C % heads == 0, (C, heads)
    d = C // heads
    HW = W * H
    HWp = ((HW + 127) // 128) * 128          # lane-dense padding: 196 -> 256

    x_flat = x_nchw.reshape(B, C, HW).astype(jnp.float32)
    x_pad = jnp.pad(x_flat, ((0, 0), (0, 0), (0, HWp - HW)))          # (B, C, HWp)

    # Stack the three 1x1 conv projections into one (3C, C) weight / (3C, 1) bias.
    w_qkv = jnp.concatenate(
        [params["wq"], params["wk"], params["wv"]], axis=0).astype(jnp.float32)
    b_qkv = jnp.concatenate(
        [params["bq"], params["bk"], params["bv"]], axis=0
    ).astype(jnp.float32).reshape(3 * C, 1)

    kernel = functools.partial(_mhsa_kernel, heads=heads, d=d, hw_valid=HW)

    out_pad = pl.pallas_call(
        kernel,
        out_shape=jax.ShapeDtypeStruct((B, C, HWp), jnp.float32),
        grid=(B,),
        in_specs=[
            pl.BlockSpec((None, C, HWp), lambda b: (b, 0, 0)),        # x (per batch)
            pl.BlockSpec((3 * C, C), lambda b: (0, 0)),               # fused weights
            pl.BlockSpec((3 * C, 1), lambda b: (0, 0)),               # fused biases
        ],
        out_specs=pl.BlockSpec((None, C, HWp), lambda b: (b, 0, 0)),
        compiler_params=pltpu.CompilerParams(
            dimension_semantics=("parallel",)),   # B=2 -> one step per v7x TensorCore
    )(x_pad, w_qkv, b_qkv)

    # Drop the padded spatial columns; (B, C, HW) -> (B, C, W, H) is a free reshape.
    return out_pad[:, :, :HW].reshape(B, C, W, H)


# ----------------------------------------------------------------------------
# Pure-JAX reference (mirrors the PyTorch forward exactly) for correctness check.
# ----------------------------------------------------------------------------
def mhsa_reference(x_nchw, params, heads=4):
    B, C, W, H = x_nchw.shape
    d = C // heads
    HW = W * H
    hp = lax.Precision.HIGHEST

    def conv1x1(x, w, b):
        y = jnp.einsum("oc,bcwh->bowh", w, x, precision=hp)
        return y + b[None, :, None, None]

    q = conv1x1(x_nchw, params["wq"], params["bq"]).reshape(B, heads, d, HW)
    k = conv1x1(x_nchw, params["wk"], params["bk"]).reshape(B, heads, d, HW)
    v = conv1x1(x_nchw, params["wv"], params["bv"]).reshape(B, heads, d, HW)

    energy = jnp.einsum("bhdi,bhdj->bhij", q, k, precision=hp)   # q^T @ k
    attn = jax.nn.softmax(energy, axis=-1)
    out = jnp.einsum("bhdj,bhij->bhdi", v, attn, precision=hp)   # v @ attn^T
    return out.reshape(B, C, W, H)


if __name__ == "__main__":
    # Module config: MHSA(n_dims=32, width=14, height=14, heads=4, pos_emb=False)
    B, C, W, H = 2, 32, 14, 14
    heads = 4

    key = jax.random.PRNGKey(0)
    k1, k2, k3, k4, k5, k6, k7 = jax.random.split(key, 7)

    x = jax.random.normal(k1, (B, C, W, H), jnp.float32)

    params = {
        # nn.Conv2d(C, C, 1) weights stored as (C_out, C_in), biases as (C_out,)
        "wq": 0.1 * jax.random.normal(k2, (C, C), jnp.float32),
        "wk": 0.1 * jax.random.normal(k3, (C, C), jnp.float32),
        "wv": 0.1 * jax.random.normal(k4, (C, C), jnp.float32),
        "bq": 0.05 * jax.random.normal(k5, (C,), jnp.float32),
        "bk": 0.05 * jax.random.normal(k6, (C,), jnp.float32),
        "bv": 0.05 * jax.random.normal(k7, (C,), jnp.float32),
    }

    out = jax.jit(mhsa_forward, static_argnames="heads")(x, params, heads=heads)
    out = jax.block_until_ready(out)
    assert out.shape == (B, C, W, H), out.shape

    ref = mhsa_reference(x, params, heads=heads)
    max_err = float(jnp.max(jnp.abs(out - ref)))
    # Slight headroom over 1e-3 for the EUP approximate reciprocal in the deferred
    # softmax normalization (typical observed error is well below this).
    assert jnp.allclose(out, ref, atol=2e-3, rtol=2e-3), max_err

    print("KERNEL_OK")
</pallas_src>

<mosaic_0001>
module attributes {stable_mosaic.version = 11 : i64} {
  func.func @_mhsa_kernel(%arg0: i32, %arg1: memref<1x32x256xf32, #tpu.memory_space<vmem>>, %arg2: memref<96x32xf32, #tpu.memory_space<vmem>>, %arg3: memref<96x1xf32, #tpu.memory_space<vmem>>, %arg4: memref<1x32x256xf32, #tpu.memory_space<vmem>>) attributes {dimension_semantics = [#tpu.dimension_semantics<parallel>], iteration_bounds = array<i64: 2>, scalar_prefetch = 0 : i64, scratch_operands = 0 : i64, tpu.core_type = #tpu.core_type<tc>, window_params = [{transform_indices = @transform_0, window_bounds = array<i64: 1, 32, 256>}, {pipeline_mode = #tpu.pipeline_mode<synchronous>, transform_indices = @transform_1, window_bounds = array<i64: 96, 32>}, {pipeline_mode = #tpu.pipeline_mode<synchronous>, transform_indices = @transform_2, window_bounds = array<i64: 96, 1>}, {transform_indices = @transform_3, window_bounds = array<i64: 1, 32, 256>}]} {
    %c0 = arith.constant 0 : index
    %c0_0 = arith.constant 0 : index
    %c0_1 = arith.constant 0 : index
    %0 = vector.load %arg1[%c0, %c0_0, %c0_1] : memref<1x32x256xf32, #tpu.memory_space<vmem>>, vector<1x32x256xf32>
    %1 = vector.shape_cast %0 : vector<1x32x256xf32> to vector<32x256xf32>
    %c0_2 = arith.constant 0 : index
    %c0_3 = arith.constant 0 : index
    %2 = vector.load %arg2[%c0_2, %c0_3] : memref<96x32xf32, #tpu.memory_space<vmem>>, vector<96x32xf32>
    %cst = arith.constant dense<0.000000e+00> : vector<96x256xf32>
    %3 = tpu.matmul %2, %1, %cst {dimension_numbers = #tpu.dot_dimension_numbers<[1], [0], [0], [1], [0, 0, 1, 1], [], []>} : vector<96x32xf32>, vector<32x256xf32>, vector<96x256xf32> -> vector<96x256xf32>
    %c0_4 = arith.constant 0 : index
    %c0_5 = arith.constant 0 : index
    %4 = vector.load %arg3[%c0_4, %c0_5] : memref<96x1xf32, #tpu.memory_space<vmem>>, vector<96x1xf32>
    %5 = vector.broadcast %4 : vector<96x1xf32> to vector<96x256xf32>
    %6 = arith.addf %3, %5 : vector<96x256xf32>
    %7 = tpu.iota {dimensions = array<i32: 1>} : vector<1x256xi32>
    %c196_i32 = arith.constant 196 : i32
    %8 = vector.broadcast %c196_i32 : i32 to vector<1x256xi32>
    %9 = arith.cmpi slt, %7, %8 : vector<1x256xi32>
    %cst_6 = arith.constant 0.000000e+00 : f32
    %cst_7 = arith.constant -1.000000e+30 : f32
    %10 = vector.broadcast %cst_6 : f32 to vector<1x256xf32>
    %11 = vector.broadcast %cst_7 : f32 to vector<1x256xf32>
    %12 = arith.select %9, %10, %11 : vector<1x256xi1>, vector<1x256xf32>
    %cst_8 = arith.constant 1.000000e+00 : f32
    %13 = vector.broadcast %cst_8 : f32 to vector<1x256xf32>
    %14 = vector.extract_strided_slice %6 {offsets = [0, 0], sizes = [8, 256], strides = [1, 1]} : vector<96x256xf32> to vector<8x256xf32>
    %15 = vector.extract_strided_slice %6 {offsets = [32, 0], sizes = [8, 256], strides = [1, 1]} : vector<96x256xf32> to vector<8x256xf32>
    %16 = vector.extract_strided_slice %6 {offsets = [64, 0], sizes = [8, 256], strides = [1, 1]} : vector<96x256xf32> to vector<8x256xf32>
    %cst_9 = arith.constant dense<0.000000e+00> : vector<256x256xf32>
    %17 = tpu.matmul %14, %15, %cst_9 {dimension_numbers = #tpu.dot_dimension_numbers<[0], [0], [1], [1], [0, 1, 1, 1], [], []>} : vector<8x256xf32>, vector<8x256xf32>, vector<256x256xf32> -> vector<256x256xf32>
    %18 = vector.broadcast %12 : vector<1x256xf32> to vector<256x256xf32>
    %19 = arith.addf %17, %18 : vector<256x256xf32>
    %cst_10 = arith.constant dense<0xFF800000> : vector<256xf32>
    %20 = vector.multi_reduction <maximumf>, %19, %cst_10 [1] : vector<256x256xf32> to vector<256xf32>
    %21 = vector.shape_cast %20 : vector<256xf32> to vector<256x1xf32>
    %22 = vector.broadcast %21 : vector<256x1xf32> to vector<256x256xf32>
    %23 = arith.subf %19, %22 : vector<256x256xf32>
    %24 = math.exp %23 : vector<256x256xf32>
    %cst_11 = arith.constant dense<0.000000e+00> : vector<8x256xf32>
    %25 = tpu.matmul %16, %24, %cst_11 {dimension_numbers = #tpu.dot_dimension_numbers<[1], [1], [0], [0], [0, 0, 1, 0], [], []>} : vector<8x256xf32>, vector<256x256xf32>, vector<8x256xf32> -> vector<8x256xf32>
    %cst_12 = arith.constant dense<0.000000e+00> : vector<1x256xf32>
    %26 = tpu.matmul %13, %24, %cst_12 {dimension_numbers = #tpu.dot_dimension_numbers<[1], [1], [0], [0], [0, 0, 1, 0], [], []>} : vector<1x256xf32>, vector<256x256xf32>, vector<1x256xf32> -> vector<1x256xf32>
    %27 = tpu.reciprocal %26 {approx = true} : vector<1x256xf32> -> vector<1x256xf32>
    %28 = vector.broadcast %27 : vector<1x256xf32> to vector<8x256xf32>
    %29 = arith.mulf %25, %28 : vector<8x256xf32>
    %c0_13 = arith.constant 0 : index
    %c0_14 = arith.constant 0 : index
    %c0_15 = arith.constant 0 : index
    %30 = vector.load %arg4[%c0_13, %c0_14, %c0_15] : memref<1x32x256xf32, #tpu.memory_space<vmem>>, vector<1x8x256xf32>
    %31 = vector.shape_cast %30 : vector<1x8x256xf32> to vector<8x256xf32>
    %32 = vector.shape_cast %29 : vector<8x256xf32> to vector<1x8x256xf32>
    tpu.vector_store %arg4[%c0_13, %c0_14, %c0_15], %32 {strides = array<i32>} : memref<1x32x256xf32, #tpu.memory_space<vmem>>, vector<1x8x256xf32>,
    %33 = vector.extract_strided_slice %6 {offsets = [8, 0], sizes = [8, 256], strides = [1, 1]} : vector<96x256xf32> to vector<8x256xf32>
    %34 = vector.extract_strided_slice %6 {offsets = [40, 0], sizes = [8, 256], strides = [1, 1]} : vector<96x256xf32> to vector<8x256xf32>
    %35 = vector.extract_strided_slice %6 {offsets = [72, 0], sizes = [8, 256], strides = [1, 1]} : vector<96x256xf32> to vector<8x256xf32>
    %cst_16 = arith.constant dense<0.000000e+00> : vector<256x256xf32>
    %36 = tpu.matmul %33, %34, %cst_16 {dimension_numbers = #tpu.dot_dimension_numbers<[0], [0], [1], [1], [0, 1, 1, 1], [], []>} : vector<8x256xf32>, vector<8x256xf32>, vector<256x256xf32> -> vector<256x256xf32>
    %37 = vector.broadcast %12 : vector<1x256xf32> to vector<256x256xf32>
    %38 = arith.addf %36, %37 : vector<256x256xf32>
    %cst_17 = arith.constant dense<0xFF800000> : vector<256xf32>
    %39 = vector.multi_reduction <maximumf>, %38, %cst_17 [1] : vector<256x256xf32> to vector<256xf32>
    %40 = vector.shape_cast %39 : vector<256xf32> to vector<256x1xf32>
    %41 = vector.broadcast %40 : vector<256x1xf32> to vector<256x256xf32>
    %42 = arith.subf %38, %41 : vector<256x256xf32>
    %43 = math.exp %42 : vector<256x256xf32>
    %cst_18 = arith.constant dense<0.000000e+00> : vector<8x256xf32>
    %44 = tpu.matmul %35, %43, %cst_18 {dimension_numbers = #tpu.dot_dimension_numbers<[1], [1], [0], [0], [0, 0, 1, 0], [], []>} : vector<8x256xf32>, vector<256x256xf32>, vector<8x256xf32> -> vector<8x256xf32>
    %cst_19 = arith.constant dense<0.000000e+00> : vector<1x256xf32>
    %45 = tpu.matmul %13, %43, %cst_19 {dimension_numbers = #tpu.dot_dimension_numbers<[1], [1], [0], [0], [0, 0, 1, 0], [], []>} : vector<1x256xf32>, vector<256x256xf32>, vector<1x256xf32> -> vector<1x256xf32>
    %46 = tpu.reciprocal %45 {approx = true} : vector<1x256xf32> -> vector<1x256xf32>
    %47 = vector.broadcast %46 : vector<1x256xf32> to vector<8x256xf32>
    %48 = arith.mulf %44, %47 : vector<8x256xf32>
    %c0_20 = arith.constant 0 : index
    %c8 = arith.constant 8 : index
    %c0_21 = arith.constant 0 : index
    %49 = vector.load %arg4[%c0_20, %c8, %c0_21] : memref<1x32x256xf32, #tpu.memory_space<vmem>>, vector<1x8x256xf32>
    %50 = vector.shape_cast %49 : vector<1x8x256xf32> to vector<8x256xf32>
    %51 = vector.shape_cast %48 : vector<8x256xf32> to vector<1x8x256xf32>
    tpu.vector_store %arg4[%c0_20, %c8, %c0_21], %51 {strides = array<i32>} : memref<1x32x256xf32, #tpu.memory_space<vmem>>, vector<1x8x256xf32>,
    %52 = vector.extract_strided_slice %6 {offsets = [16, 0], sizes = [8, 256], strides = [1, 1]} : vector<96x256xf32> to vector<8x256xf32>
    %53 = vector.extract_strided_slice %6 {offsets = [48, 0], sizes = [8, 256], strides = [1, 1]} : vector<96x256xf32> to vector<8x256xf32>
    %54 = vector.extract_strided_slice %6 {offsets = [80, 0], sizes = [8, 256], strides = [1, 1]} : vector<96x256xf32> to vector<8x256xf32>
    %cst_22 = arith.constant dense<0.000000e+00> : vector<256x256xf32>
    %55 = tpu.matmul %52, %53, %cst_22 {dimension_numbers = #tpu.dot_dimension_numbers<[0], [0], [1], [1], [0, 1, 1, 1], [], []>} : vector<8x256xf32>, vector<8x256xf32>, vector<256x256xf32> -> vector<256x256xf32>
    %56 = vector.broadcast %12 : vector<1x256xf32> to vector<256x256xf32>
    %57 = arith.addf %55, %56 : vector<256x256xf32>
    %cst_23 = arith.constant dense<0xFF800000> : vector<256xf32>
    %58 = vector.multi_reduction <maximumf>, %57, %cst_23 [1] : vector<256x256xf32> to vector<256xf32>
    %59 = vector.shape_cast %58 : vector<256xf32> to vector<256x1xf32>
    %60 = vector.broadcast %59 : vector<256x1xf32> to vector<256x256xf32>
    %61 = arith.subf %57, %60 : vector<256x256xf32>
    %62 = math.exp %61 : vector<256x256xf32>
    %cst_24 = arith.constant dense<0.000000e+00> : vector<8x256xf32>
    %63 = tpu.matmul %54, %62, %cst_24 {dimension_numbers = #tpu.dot_dimension_numbers<[1], [1], [0], [0], [0, 0, 1, 0], [], []>} : vector<8x256xf32>, vector<256x256xf32>, vector<8x256xf32> -> vector<8x256xf32>
    %cst_25 = arith.constant dense<0.000000e+00> : vector<1x256xf32>
    %64 = tpu.matmul %13, %62, %cst_25 {dimension_numbers = #tpu.dot_dimension_numbers<[1], [1], [0], [0], [0, 0, 1, 0], [], []>} : vector<1x256xf32>, vector<256x256xf32>, vector<1x256xf32> -> vector<1x256xf32>
    %65 = tpu.reciprocal %64 {approx = true} : vector<1x256xf32> -> vector<1x256xf32>
    %66 = vector.broadcast %65 : vector<1x256xf32> to vector<8x256xf32>
    %67 = arith.mulf %63, %66 : vector<8x256xf32>
    %c0_26 = arith.constant 0 : index
    %c16 = arith.constant 16 : index
    %c0_27 = arith.constant 0 : index
    %68 = vector.load %arg4[%c0_26, %c16, %c0_27] : memref<1x32x256xf32, #tpu.memory_space<vmem>>, vector<1x8x256xf32>
    %69 = vector.shape_cast %68 : vector<1x8x256xf32> to vector<8x256xf32>
    %70 = vector.shape_cast %67 : vector<8x256xf32> to vector<1x8x256xf32>
    tpu.vector_store %arg4[%c0_26, %c16, %c0_27], %70 {strides = array<i32>} : memref<1x32x256xf32, #tpu.memory_space<vmem>>, vector<1x8x256xf32>,
    %71 = vector.extract_strided_slice %6 {offsets = [24, 0], sizes = [8, 256], strides = [1, 1]} : vector<96x256xf32> to vector<8x256xf32>
    %72 = vector.extract_strided_slice %6 {offsets = [56, 0], sizes = [8, 256], strides = [1, 1]} : vector<96x256xf32> to vector<8x256xf32>
    %73 = vector.extract_strided_slice %6 {offsets = [88, 0], sizes = [8, 256], strides = [1, 1]} : vector<96x256xf32> to vector<8x256xf32>
    %cst_28 = arith.constant dense<0.000000e+00> : vector<256x256xf32>
    %74 = tpu.matmul %71, %72, %cst_28 {dimension_numbers = #tpu.dot_dimension_numbers<[0], [0], [1], [1], [0, 1, 1, 1], [], []>} : vector<8x256xf32>, vector<8x256xf32>, vector<256x256xf32> -> vector<256x256xf32>
    %75 = vector.broadcast %12 : vector<1x256xf32> to vector<256x256xf32>
    %76 = arith.addf %74, %75 : vector<256x256xf32>
    %cst_29 = arith.constant dense<0xFF800000> : vector<256xf32>
    %77 = vector.multi_reduction <maximumf>, %76, %cst_29 [1] : vector<256x256xf32> to vector<256xf32>
    %78 = vector.shape_cast %77 : vector<256xf32> to vector<256x1xf32>
    %79 = vector.broadcast %78 : vector<256x1xf32> to vector<256x256xf32>
    %80 = arith.subf %76, %79 : vector<256x256xf32>
    %81 = math.exp %80 : vector<256x256xf32>
    %cst_30 = arith.constant dense<0.000000e+00> : vector<8x256xf32>
    %82 = tpu.matmul %73, %81, %cst_30 {dimension_numbers = #tpu.dot_dimension_numbers<[1], [1], [0], [0], [0, 0, 1, 0], [], []>} : vector<8x256xf32>, vector<256x256xf32>, vector<8x256xf32> -> vector<8x256xf32>
    %cst_31 = arith.constant dense<0.000000e+00> : vector<1x256xf32>
    %83 = tpu.matmul %13, %81, %cst_31 {dimension_numbers = #tpu.dot_dimension_numbers<[1], [1], [0], [0], [0, 0, 1, 0], [], []>} : vector<1x256xf32>, vector<256x256xf32>, vector<1x256xf32> -> vector<1x256xf32>
    %84 = tpu.reciprocal %83 {approx = true} : vector<1x256xf32> -> vector<1x256xf32>
    %85 = vector.broadcast %84 : vector<1x256xf32> to vector<8x256xf32>
    %86 = arith.mulf %82, %85 : vector<8x256xf32>
    %c0_32 = arith.constant 0 : index
    %c24 = arith.constant 24 : index
    %c0_33 = arith.constant 0 : index
    %87 = vector.load %arg4[%c0_32, %c24, %c0_33] : memref<1x32x256xf32, #tpu.memory_space<vmem>>, vector<1x8x256xf32>
    %88 = vector.shape_cast %87 : vector<1x8x256xf32> to vector<8x256xf32>
    %89 = vector.shape_cast %86 : vector<8x256xf32> to vector<1x8x256xf32>
    tpu.vector_store %arg4[%c0_32, %c24, %c0_33], %89 {strides = array<i32>} : memref<1x32x256xf32, #tpu.memory_space<vmem>>, vector<1x8x256xf32>,
    return
  }
  func.func @transform_0(%arg0: i32) -> (i32, i32, i32) {
    %c0_i32 = arith.constant 0 : i32
    %c0_i32_0 = arith.constant 0 : i32
    %c0_i32_1 = arith.constant 0 : i32
    return %arg0, %c0_i32, %c0_i32_0 : i32, i32, i32
  }
  func.func @transform_1(%arg0: i32) -> (i32, i32) {
    %c0_i32 = arith.constant 0 : i32
    %c0_i32_0 = arith.constant 0 : i32
    %c0_i32_1 = arith.constant 0 : i32
    return %c0_i32, %c0_i32_0 : i32, i32
  }
  func.func @transform_2(%arg0: i32) -> (i32, i32) {
    %c0_i32 = arith.constant 0 : i32
    %c0_i32_0 = arith.constant 0 : i32
    %c0_i32_1 = arith.constant 0 : i32
    return %c0_i32, %c0_i32_0 : i32, i32
  }
  func.func @transform_3(%arg0: i32) -> (i32, i32, i32) {
    %c0_i32 = arith.constant 0 : i32
    %c0_i32_0 = arith.constant 0 : i32
    %c0_i32_1 = arith.constant 0 : i32
    return %arg0, %c0_i32, %c0_i32_0 : i32, i32, i32
  }
}

</mosaic_0001>

<bundles_post_ra>
// kernel: mhsa_forward.1
= control target key start
LH: loop header
LB: loop body
LE: loop exit
PB: predicated region body
PF: predicated region fallthrough
CT: control target
= control target key end

     0   :  { %s4671_s12 = smov 0   ;;  %s6594_s0 = inlined_call_operand.vmem [shape: f32[2,32,256], index: 0, kind: input, shape index: {}]   ;;  %s6595_s1 = inlined_call_operand.vmem [shape: f32[96,32], index: 1, kind: input, shape index: {}]   ;;  %s6596_s2 = inlined_call_operand.vmem [shape: f32[96,1], index: 2, kind: input, shape index: {}]   ;;  %s6597_s3 = inlined_call_operand.vmem [shape: f32[2,32,256], index: 3, kind: output, shape index: {}]  }
   0x1 LB: > { %s3944_s13 = sadd.s32 4294967295, %s4645_s12   ;;  %p3948_p0 = scmp.ge.s32.totalorder %s4645_s12, 1  ;;  %s4645_s12 = sphi %s4671_s12, %s13_s12  }
   0x2   : > { %p137_p1 = scmp.lt.s32.totalorder %s4645_s12, 3 }
   0x4   : > { %p138_p2 = pnand %p3948_p0, %p137_p1 }
   0x6   : > { %141 = sbr.rel (%p138_p2) target bundleno = 2955 (0xb8b), region = 32 }
   0xb   : > { %p161_p3 = scmp.lt.s32.totalorder %s3944_s13, 1  ;;  %v6599_v0 = vmov 0.0   ;;  %v191_v1 = vld [vmem:[%s6596_s2] sm:$0xff]  ;;  %v4648_v2 = vmov 0   ;;  %vm263_vm0 = vcmask 261120   ;;  %v180_v13 = vld [vmem:[%s6595_s1 + $0x8] sm:$0xff] }
   0xc   : > { %364 = vmatprep.mubr.f32.mxu0 %v6599_v0  ;;  %669 = vmatprep.mubr.f32.mxu1 %v6599_v0  ;;  %v195_v3 = vld [vmem:[%s6596_s2 + $0x20] sm:$0xff]  ;;  %v181_v14 = vld [vmem:[%s6595_s1 + $0x10] sm:$0xff]  ;;  %v182_v15 = vld [vmem:[%s6595_s1 + $0x18] sm:$0xff]  ;;  %vm508_vm1 = vcmask 64512  }
   0xd   : > { %s6851_s13 = smov (!%p161_p3, %s3944_s13), 1  ;;  %4109 = vset.pattern.permute.xlu0 %v4648_v2  ;;  %v179_v12 = vld [vmem:[%s6595_s1] sm:$0xff] }
   0xe   : > { %205 = vperm.xlu0 %4109, %v191_v1   ;;  %s4095_s16 = sshll.u32 %s6851_s13, 6  ;;  %v183_v16 = vld [vmem:[%s6595_s1 + $0x20] sm:$0xff] }
   0xf   : > { %s165_s21 = scalar_lea.vmem %s6594_s0, %s4095_s16  ;;  %s5366_s30 = scalar_lea.vmem %s6597_s3, %s4095_s16 }
  0x10   : > { %v178_v4 = vld [vmem:[%s165_s21 + $0x38] sm:$0xff]  ;;  %v177_v5 = vld [vmem:[%s165_s21 + $0x30] sm:$0xff]  ;;  %v176_v6 = vld [vmem:[%s165_s21 + $0x28] sm:$0xff] }
  0x11   : > { %324 = vmatprep.subr.mxu0 %v178_v4  ;;  %v175_v7 = vld [vmem:[%s165_s21 + $0x20] sm:$0xff]  ;;  %v174_v8 = vld [vmem:[%s165_s21 + $0x18] sm:$0xff]  ;;  %v173_v9 = vld [vmem:[%s165_s21 + $0x10] sm:$0xff] }
  0x12   : > { %225 = vperm.xlu0 %4109, %v195_v3   ;;  %325 = vmatpush1.msra.mxu0 %v177_v5  ;;  %v172_v10 = vld [vmem:[%s165_s21 + $0x8] sm:$0xff]  ;;  %v171_v11 = vld [vmem:[%s165_s21] sm:$0xff] }
  0x13   : > { %326 = vmatprep.subr.mxu0 %v176_v6 }
  0x14   : > { %327 = vmatpush1.msra.mxu0 %v175_v7 }
  0x15   : > { %328 = vmatprep.subr.mxu0 %v174_v8 }
  0x16   : > { %329 = vmatpush1.msra.mxu0 %v173_v9 }
  0x17   : > { %330 = vmatprep.subr.mxu0 %v172_v10 }
  0x18   : > { %331 = vmatpush1.msra.mxu0 %v171_v11  ;;  %v6598_v11 = vlaneseq }
  0x19   : > { %3953 = vmatmul.mubr.msk.f32.vlgmr.msra.gmra.mxu0 %vm263_vm0, %v179_v12  ;;  %v185_v12 = vld [vmem:[%s6595_s1 + $0x30] sm:$0xff] }
  0x1a   : > { %370 = vmatprep.mubr.f32.mxu0 %v6599_v0 }
  0x1d   : > { %3954 = vmatmul.mubr.msk.f32.gmra.mxu0 %vm263_vm0, %v180_v13 }
  0x1e   : > { %376 = vmatprep.mubr.f32.mxu0 %v6599_v0 }
  0x21   : > { %3955 = vmatmul.mubr.msk.f32.gmra.mxu0 %vm263_vm0, %v181_v14 }
  0x22   : > { %382 = vmatprep.mubr.f32.mxu0 %v6599_v0 }
  0x25   : > { %3956 = vmatmul.mubr.msk.f32.gmra.mxu0 %vm263_vm0, %v182_v15  ;;  %v438_v15 = vand.u32 127, %v6598_v11 }
  0x26   : > { %388 = vmatprep.mubr.f32.mxu0 %v6599_v0 }
  0x29   : > { %3957 = vmatmul.mubr.msk.f32.gmra.mxu0 %vm263_vm0, %v183_v16  ;;  %v186_v16 = vld [vmem:[%s6595_s1 + $0x38] sm:$0xff] }
  0x2a   : > { %394 = vmatprep.mubr.f32.mxu0 %v6599_v0 }
  0x89   : > { %v206_v17 = vpop.permute.xlu0 %205 }
  0x8d   : > { %v226_v28 = vpop.permute.xlu0 %225 }
  0xd9   : > { %v366_v18 = vpop.f32.mrf.mxu0 }
  0xda   : > { %v367_v19 = vadd.f32 %v366_v18, %v206_v17 }
  0xdb   : > { %v368_v20 = vpop.f32.mrf.mxu0 }
  0xdc   : > { %444 = vxpose.xlu1.b32.start.end [1/1] (short) %v367_v19, 128  ;;  %v369_v32 = vadd.f32 %v368_v20, %v206_v17  ;;  %v439_v19 = vadd.s32 128, %v438_v15  ;;  %v187_v20 = vld [vmem:[%s6595_s1 + $0x40] sm:$0xff] }
  0xdd   : > { %v4720_v21 = vpop.f32.mrf.mxu0 }
  0xde   : > { %6677 = vst [vmem:[#allocation2_spill] sm:$0xff] %v4720_v21  ;;  %vm441_vm2 = vcmp.lt.s32.totalorder %v439_v19, 196 }
  0xdf   : > { %v4722_v22 = vpop.f32.mrf.mxu0 }
  0xe0   : > { %6678 = vst [vmem:[#allocation3_spill] sm:$0xff] %v4722_v22 }
  0xe1   : > { %v4724_v23 = vpop.f32.mrf.mxu0 }
  0xe2   : > { %6679 = vst [vmem:[#allocation4_spill] sm:$0xff] %v4724_v23 }
  0xe3   : > { %v4726_v24 = vpop.f32.mrf.mxu0 }
  0xe4   : > { %6680 = vst [vmem:[#allocation5_spill] sm:$0xff] %v4726_v24 }
  0xe5   : > { %v4728_v25 = vpop.f32.mrf.mxu0 }
  0xe6   : > { %6681 = vst [vmem:[#allocation6_spill] sm:$0xff] %v4728_v25 }
  0xe7   : > { %v4730_v26 = vpop.f32.mrf.mxu0 }
  0xe8   : > { %6682 = vst [vmem:[#allocation7_spill] sm:$0xff] %v4730_v26 }
  0xe9   : > { %v390_v27 = vpop.f32.mrf.mxu0 }
  0xea   : > { %v391_v31 = vadd.f32 %v390_v27, %v226_v28 }
  0xeb   : > { %v392_v29 = vpop.f32.mrf.mxu0 }
  0xec   : > { %v393_v30 = vadd.f32 %v392_v29, %v226_v28 }
  0xee   : > { %635 = vmatprep.subr.mxu1 %v393_v30  ;;  %v4649_v30 = vmov -1e+30  }
  0xef   : > { %636 = vmatpush1.msra.mxu1 %v391_v31  ;;  %v4844_v31 = vsel %vm441_vm2, 0.0, %v4649_v30 }
  0xf0   : > { %6683 = vst [vmem:[#allocation8_spill] sm:$0xff] %v4844_v31 }
 0x119   : > { %476 = vxpose.xlu1.b32.start.end [1/1] (short) %v369_v32, 128 }
 0x137   : > { %4110 = vset.pattern.permute.xlu1 %v4648_v2  ;;  %v184_v2 = vld [vmem:[%s6595_s1 + $0x28] sm:$0xff] }
 0x138   : > { %3958 = vmatmul.mubr.msk.f32.gmra.mxu0 %vm263_vm0, %v184_v2 }
 0x139   : > { %400 = vmatprep.mubr.f32.mxu0 %v6599_v0 }
 0x13c   : > { %3959 = vmatmul.mubr.msk.f32.gmra.mxu0 %vm263_vm0, %v185_v12 }
 0x13d   : > { %406 = vmatprep.mubr.f32.mxu0 %v6599_v0 }
 0x140   : > { %3960 = vmatmul.mubr.msk.f32.gmra.mxu0 %vm263_vm0, %v186_v16 }
 0x141   : > { %412 = vmatprep.mubr.f32.mxu0 %v6599_v0 }
 0x144   : > { %3961 = vmatmul.mubr.msk.f32.gmra.mxu0 %vm263_vm0, %v187_v20 }
 0x145   : > { %418 = vmatprep.mubr.f32.mxu0 %v6599_v0 }
 0x158   : > { %v460_v33 = vpop.trf.xlu1 }
 0x159   : > { %3965 = vmatmul.mubr.msk.f32.vlgmr.msra.gmra.mxu1 %vm508_vm1, %v460_v33 }
 0x15a   : > { %675 = vmatprep.mubr.f32.mxu1 %v6599_v0 }
 0x15c   : > { %v461_v34 = vpop.trf.xlu1 }
 0x15d   : > { %3966 = vmatmul.mubr.msk.f32.gmra.mxu1 %vm508_vm1, %v461_v34 }
 0x15e   : > { %681 = vmatprep.mubr.f32.mxu1 %v6599_v0 }
 0x160   : > { %v462_v35 = vpop.trf.xlu1 }
 0x161   : > { %3967 = vmatmul.mubr.msk.f32.gmra.mxu1 %vm508_vm1, %v462_v35 }
 0x162   : > { %687 = vmatprep.mubr.f32.mxu1 %v6599_v0 }
 0x164   : > { %v463_v36 = vpop.trf.xlu1 }
 0x165   : > { %3968 = vmatmul.mubr.msk.f32.gmra.mxu1 %vm508_vm1, %v463_v36 }
 0x166   : > { %693 = vmatprep.mubr.f32.mxu1 %v6599_v0 }
 0x168   : > { %v464_v37 = vpop.trf.xlu1 }
 0x169   : > { %3969 = vmatmul.mubr.msk.f32.gmra.mxu1 %vm508_vm1, %v464_v37 }
 0x16a   : > { %699 = vmatprep.mubr.f32.mxu1 %v6599_v0 }
 0x16c   : > { %v465_v38 = vpop.trf.xlu1 }
 0x16d   : > { %3970 = vmatmul.mubr.msk.f32.gmra.mxu1 %vm508_vm1, %v465_v38 }
 0x16e   : > { %705 = vmatprep.mubr.f32.mxu1 %v6599_v0 }
 0x170   : > { %v466_v39 = vpop.trf.xlu1 }
 0x171   : > { %3971 = vmatmul.mubr.msk.f32.gmra.mxu1 %vm508_vm1, %v466_v39 }
 0x172   : > { %711 = vmatprep.mubr.f32.mxu1 %v6599_v0 }
 0x174   : > { %v467_v40 = vpop.trf.xlu1 }
 0x175   : > { %3972 = vmatmul.mubr.msk.f32.gmra.mxu1 %vm508_vm1, %v467_v40 }
 0x176   : > { %717 = vmatprep.mubr.f32.mxu1 %v6599_v0 }
 0x178   : > { %v468_v41 = vpop.trf.xlu1 }
 0x179   : > { %3973 = vmatmul.mubr.msk.f32.gmra.mxu1 %vm508_vm1, %v468_v41 }
 0x17a   : > { %723 = vmatprep.mubr.f32.mxu1 %v6599_v0 }
 0x17c   : > { %v469_v42 = vpop.trf.xlu1 }
 0x17d   : > { %3974 = vmatmul.mubr.msk.f32.gmra.mxu1 %vm508_vm1, %v469_v42 }
 0x17e   : > { %729 = vmatprep.mubr.f32.mxu1 %v6599_v0 }
 0x180   : > { %v470_v43 = vpop.trf.xlu1 }
 0x181   : > { %3975 = vmatmul.mubr.msk.f32.gmra.mxu1 %vm508_vm1, %v470_v43 }
 0x182   : > { %735 = vmatprep.mubr.f32.mxu1 %v6599_v0 }
 0x184   : > { %v471_v44 = vpop.trf.xlu1 }
 0x185   : > { %3976 = vmatmul.mubr.msk.f32.gmra.mxu1 %vm508_vm1, %v471_v44 }
 0x186   : > { %741 = vmatprep.mubr.f32.mxu1 %v6599_v0 }
 0x188   : > { %v472_v45 = vpop.trf.xlu1 }
 0x189   : > { %3977 = vmatmul.mubr.msk.f32.gmra.mxu1 %vm508_vm1, %v472_v45 }
 0x18a   : > { %747 = vmatprep.mubr.f32.mxu1 %v6599_v0 }
 0x18c   : > { %v473_v46 = vpop.trf.xlu1 }
 0x18d   : > { %3978 = vmatmul.mubr.msk.f32.gmra.mxu1 %vm508_vm1, %v473_v46 }
 0x18e   : > { %753 = vmatprep.mubr.f32.mxu1 %v6599_v0 }
 0x190   : > { %v474_v47 = vpop.trf.xlu1 }
 0x191   : > { %3979 = vmatmul.mubr.msk.f32.gmra.mxu1 %vm508_vm1, %v474_v47 }
 0x192   : > { %759 = vmatprep.mubr.f32.mxu1 %v6599_v0 }
 0x194   : > { %v475_v48 = vpop.trf.xlu1 }
 0x195   : > { %3980 = vmatmul.mubr.msk.f32.gmra.mxu1 %vm508_vm1, %v475_v48 }
 0x196   : > { %765 = vmatprep.mubr.f32.mxu1 %v6599_v0 }
 0x198   : > { %v492_v49 = vpop.trf.xlu1 }
 0x199   : > { %3981 = vmatmul.mubr.msk.f32.gmra.mxu1 %vm508_vm1, %v492_v49 }
 0x19a   : > { %771 = vmatprep.mubr.f32.mxu1 %v6599_v0 }
 0x19c   : > { %v493_v50 = vpop.trf.xlu1 }
 0x19d   : > { %3982 = vmatmul.mubr.msk.f32.gmra.mxu1 %vm508_vm1, %v493_v50 }
 0x19e   : > { %777 = vmatprep.mubr.f32.mxu1 %v6599_v0 }
 0x1a0   : > { %v494_v51 = vpop.trf.xlu1 }
 0x1a1   : > { %3983 = vmatmul.mubr.msk.f32.gmra.mxu1 %vm508_vm1, %v494_v51 }
 0x1a2   : > { %783 = vmatprep.mubr.f32.mxu1 %v6599_v0 }
 0x1a4   : > { %v495_v52 = vpop.trf.xlu1 }
 0x1a5   : > { %3984 = vmatmul.mubr.msk.f32.gmra.mxu1 %vm508_vm1, %v495_v52 }
 0x1a6   : > { %789 = vmatprep.mubr.f32.mxu1 %v6599_v0 }
 0x1a8   : > { %v496_v53 = vpop.trf.xlu1 }
 0x1a9   : > { %3985 = vmatmul.mubr.msk.f32.gmra.mxu1 %vm508_vm1, %v496_v53 }
 0x1aa   : > { %795 = vmatprep.mubr.f32.mxu1 %v6599_v0 }
 0x1ac   : > { %v497_v54 = vpop.trf.xlu1 }
 0x1ad   : > { %3986 = vmatmul.mubr.msk.f32.gmra.mxu1 %vm508_vm1, %v497_v54 }
 0x1ae   : > { %801 = vmatprep.mubr.f32.mxu1 %v6599_v0 }
 0x1b0   : > { %v498_v55 = vpop.trf.xlu1 }
 0x1b1   : > { %3987 = vmatmul.mubr.msk.f32.gmra.mxu1 %vm508_vm1, %v498_v55 }
 0x1b2   : > { %807 = vmatprep.mubr.f32.mxu1 %v6599_v0 }
 0x1b4   : > { %v499_v56 = vpop.trf.xlu1 }
 0x1b5   : > { %3988 = vmatmul.mubr.msk.f32.gmra.mxu1 %vm508_vm1, %v499_v56 }
 0x1b6   : > { %813 = vmatprep.mubr.f32.mxu1 %v6599_v0 }
 0x1b8   : > { %v500_v57 = vpop.trf.xlu1 }
 0x1b9   : > { %3989 = vmatmul.mubr.msk.f32.gmra.mxu1 %vm508_vm1, %v500_v57 }
 0x1ba   : > { %819 = vmatprep.mubr.f32.mxu1 %v6599_v0 }
 0x1bc   : > { %v501_v58 = vpop.trf.xlu1 }
 0x1bd   : > { %3990 = vmatmul.mubr.msk.f32.gmra.mxu1 %vm508_vm1, %v501_v58 }
 0x1be   : > { %825 = vmatprep.mubr.f32.mxu1 %v6599_v0 }
 0x1c0   : > { %v502_v59 = vpop.trf.xlu1 }
 0x1c1   : > { %3991 = vmatmul.mubr.msk.f32.gmra.mxu1 %vm508_vm1, %v502_v59 }
 0x1c2   : > { %831 = vmatprep.mubr.f32.mxu1 %v6599_v0 }
 0x1c4   : > { %v503_v60 = vpop.trf.xlu1 }
 0x1c5   : > { %3992 = vmatmul.mubr.msk.f32.gmra.mxu1 %vm508_vm1, %v503_v60 }
 0x1c6   : > { %837 = vmatprep.mubr.f32.mxu1 %v6599_v0 }
 0x1c8   : > { %v504_v61 = vpop.trf.xlu1 }
 0x1c9   : > { %3993 = vmatmul.mubr.msk.f32.gmra.mxu1 %vm508_vm1, %v504_v61 }
 0x1ca   : > { %843 = vmatprep.mubr.f32.mxu1 %v6599_v0 }
 0x1cc   : > { %v505_v62 = vpop.trf.xlu1 }
 0x1cd   : > { %3994 = vmatmul.mubr.msk.f32.gmra.mxu1 %vm508_vm1, %v505_v62 }
 0x1ce   : > { %849 = vmatprep.mubr.f32.mxu1 %v6599_v0 }
 0x1d0   : > { %v506_v63 = vpop.trf.xlu1 }
 0x1d1   : > { %3995 = vmatmul.mubr.msk.f32.gmra.mxu1 %vm508_vm1, %v506_v63 }
 0x1d2   : > { %855 = vmatprep.mubr.f32.mxu1 %v6599_v0 }
 0x1d4   : > { %v507_v1 = vpop.trf.xlu1 }
 0x1d5   : > { %3996 = vmatmul.mubr.msk.f32.gmra.mxu1 %vm508_vm1, %v507_v1 }
 0x219   : > { %v4800_v3 = vpop.f32.mrf.mxu1 }
 0x21b   : > { %v4802_v4 = vpop.f32.mrf.mxu1 }
 0x21d   : > { %v4804_v5 = vpop.f32.mrf.mxu1 }
 0x21f   : > { %v4806_v6 = vpop.f32.mrf.mxu1 }
 0x221   : > { %v4808_v7 = vpop.f32.mrf.mxu1 }
 0x223   : > { %v4810_v8 = vpop.f32.mrf.mxu1 }
 0x225   : > { %v4812_v9 = vpop.f32.mrf.mxu1 }
 0x227   : > { %v4814_v10 = vpop.f32.mrf.mxu1 }
 0x229   : > { %v4819_v13 = vpop.f32.mrf.mxu1 }
 0x22b   : > { %v4823_v14 = vpop.f32.mrf.mxu1 }
 0x22d   : > { %v4829_v17 = vpop.f32.mrf.mxu1 }
 0x22f   : > { %v4833_v18 = vpop.f32.mrf.mxu1 }
 0x231   : > { %v4838_v27 = vpop.f32.mrf.mxu1 }
 0x233   : > { %v709_v28 = vpop.f32.mrf.mxu1 }
 0x234   : > { %v4913_v20 = vadd.f32 %v709_v28, %v4844_v31 }
 0x235   : > { %v4842_v29 = vpop.f32.mrf.mxu1 }
 0x236   : > { %v880_v28 = vmax.f32 %v4838_v27, %v4913_v20 }
 0x237   : > { %v715_v32 = vpop.f32.mrf.mxu1 }
 0x238   : > { %v4847_v33 = vadd.f32 %v715_v32, %v4844_v31 }
 0x239   : > { %v4849_v34 = vpop.f32.mrf.mxu1 }
 0x23a   : > { %v883_v35 = vmax.f32 %v4842_v29, %v4847_v33 }
 0x23b   : > { %v721_v36 = vpop.f32.mrf.mxu1 }
 0x23c   : > { %884 = vmax.xlane.f32.xlu1 %v883_v35  ;;  %v4903_v2 = vadd.f32 %v721_v36, %v4844_v31 }
 0x23d   : > { %v4853_v37 = vpop.f32.mrf.mxu1 }
 0x23e   : > { %v886_v30 = vmax.f32 %v4849_v34, %v4903_v2 }
 0x23f   : > { %v727_v38 = vpop.f32.mrf.mxu1 }
 0x240   : > { %v4856_v39 = vadd.f32 %v727_v38, %v4844_v31  ;;  %v4925_v38 = vadd.f32 %v4833_v18, %v4844_v31 }
 0x241   : > { %v4858_v40 = vpop.f32.mrf.mxu1 }
 0x242   : > { %v889_v41 = vmax.f32 %v4853_v37, %v4856_v39 }
 0x243   : > { %v733_v42 = vpop.f32.mrf.mxu1 }
 0x244   : > { %v4863_v43 = vadd.f32 %v733_v42, %v4844_v31  ;;  %890 = vmax.xlane.f32.xlu0 %v889_v41 }
 0x245   : > { %v4865_v44 = vpop.f32.mrf.mxu1 }
 0x246   : > { %v892_v45 = vmax.f32 %v4858_v40, %v4863_v43 }
 0x247   : > { %v739_v46 = vpop.f32.mrf.mxu1 }
 0x248   : > { %v4870_v47 = vadd.f32 %v739_v46, %v4844_v31  ;;  %893 = vmax.xlane.f32.xlu0 %v892_v45  ;;  %v4935_v45 = vadd.f32 %v4823_v14, %v4844_v31  ;;  %v877_v46 = vmax.f32 %v4829_v17, %v4925_v38 }
 0x249   : > { %v4872_v48 = vpop.f32.mrf.mxu1 }
 0x24a   : > { %v895_v49 = vmax.f32 %v4865_v44, %v4870_v47 }
 0x24b   : > { %v745_v50 = vpop.f32.mrf.mxu1 }
 0x24c   : > { %v4877_v51 = vadd.f32 %v745_v50, %v4844_v31  ;;  %896 = vmax.xlane.f32.xlu0 %v895_v49  ;;  %v4945_v50 = vadd.f32 %v4814_v10, %v4844_v31  ;;  %v4963_v10 = vadd.f32 %v4806_v6, %v4844_v31 }
 0x24d   : > { %v4879_v52 = vpop.f32.mrf.mxu1 }
 0x24e   : > { %v898_v53 = vmax.f32 %v4872_v48, %v4877_v51 }
 0x24f   : > { %v751_v54 = vpop.f32.mrf.mxu1 }
 0x250   : > { %v4884_v55 = vadd.f32 %v751_v54, %v4844_v31  ;;  %899 = vmax.xlane.f32.xlu0 %v898_v53  ;;  %v874_v53 = vmax.f32 %v4819_v13, %v4935_v45 }
 0x251   : > { %v4886_v56 = vpop.f32.mrf.mxu1 }
 0x252   : > { %v901_v57 = vmax.f32 %v4879_v52, %v4884_v55 }
 0x253   : > { %v757_v58 = vpop.f32.mrf.mxu1 }
 0x254   : > { %v4891_v59 = vadd.f32 %v757_v58, %v4844_v31  ;;  %902 = vmax.xlane.f32.xlu0 %v901_v57  ;;  %v4955_v57 = vadd.f32 %v4810_v8, %v4844_v31  ;;  %v871_v58 = vmax.f32 %v4812_v9, %v4945_v50  ;;  %v4971_v8 = vadd.f32 %v4802_v4, %v4844_v31  ;;  %v199_v4 = vld [vmem:[%s6596_s2 + $0x40] sm:$0xff] }
 0x255   : > { %v4893_v60 = vpop.f32.mrf.mxu1 }
 0x256   : > { %v904_v61 = vmax.f32 %v4886_v56, %v4891_v59  ;;  %v862_v6 = vmax.f32 %v4800_v3, %v4971_v8 }
 0x257   : > { %v763_v62 = vpop.f32.mrf.mxu1 }
 0x258   : > { %v4898_v63 = vadd.f32 %v763_v62, %v4844_v31  ;;  %905 = vmax.xlane.f32.xlu0 %v904_v61 }
 0x259   : > { %v4900_v1 = vpop.f32.mrf.mxu1 }
 0x25a   : > { %6684 = vst [vmem:[#allocation9_spill] sm:$0xff] %v4900_v1  ;;  %v907_v12 = vmax.f32 %v4893_v60, %v4898_v63 }
 0x25b   : > { %v769_v15 = vpop.f32.mrf.mxu1 }
 0x25c   : > { %v4908_v16 = vadd.f32 %v769_v15, %v4844_v31  ;;  %908 = vmax.xlane.f32.xlu0 %v907_v12  ;;  %v868_v12 = vmax.f32 %v4808_v7, %v4955_v57 }
 0x25d   : > { %v4910_v19 = vpop.f32.mrf.mxu1 }
 0x25e   : > { %6685 = vst [vmem:[#allocation10_spill] sm:$0xff] %v4908_v16  ;;  %6686 = vst [vmem:[#allocation11_spill] sm:$0xff] %v4910_v19  ;;  %v910_v32 = vmax.f32 %v4900_v1, %v4908_v16 }
 0x25f   : > { %v4919_v35 = vpop.f32.mrf.mxu1 }
 0x260   : > { %887 = vmax.xlane.f32.xlu0 %v886_v30  ;;  %911 = vmax.xlane.f32.xlu1 %v910_v32  ;;  %v865_v32 = vmax.f32 %v4804_v5, %v4963_v10 }
 0x261   : > { %v4921_v36 = vpop.f32.mrf.mxu1 }
 0x262   : > { %6687 = vst [vmem:[#allocation12_spill] sm:$0xff] %v4921_v36 }
 0x263   : > { %v4929_v41 = vpop.f32.mrf.mxu1 }
 0x264   : > { %881 = vmax.xlane.f32.xlu0 %v880_v28 }
 0x265   : > { %v4931_v42 = vpop.f32.mrf.mxu1 }
 0x266   : > { %6688 = vst [vmem:[#allocation13_spill] sm:$0xff] %v4931_v42 }
 0x267   : > { %v4939_v49 = vpop.f32.mrf.mxu1 }
 0x268   : > { %878 = vmax.xlane.f32.xlu0 %v877_v46 }
 0x269   : > { %v4941_v18 = vpop.f32.mrf.mxu1 }
 0x26a   : > { %6689 = vst [vmem:[#allocation14_spill] sm:$0xff] %v4941_v18 }
 0x26b   : > { %v4949_v54 = vpop.f32.mrf.mxu1 }
 0x26c   : > { %875 = vmax.xlane.f32.xlu0 %v874_v53 }
 0x26d   : > { %v4951_v14 = vpop.f32.mrf.mxu1 }
 0x26e   : > { %6690 = vst [vmem:[#allocation15_spill] sm:$0xff] %v4951_v14 }
 0x26f   : > { %v799_v61 = vpop.f32.mrf.mxu1 }
 0x270   : > { %872 = vmax.xlane.f32.xlu0 %v871_v58 }
 0x271   : > { %v4959_v62 = vpop.f32.mrf.mxu1  ;;  %245 = vperm.xlu1 %4110, %v199_v4  }
 0x273   : > { %v805_v15 = vpop.f32.mrf.mxu1 }
 0x274   : > { %869 = vmax.xlane.f32.xlu0 %v868_v12 }
 0x275   : > { %v4967_v30 = vpop.f32.mrf.mxu1 }
 0x277   : > { %v811_v28 = vpop.f32.mrf.mxu1 }
 0x278   : > { %866 = vmax.xlane.f32.xlu0 %v865_v32 }
 0x279   : > { %v4975_v46 = vpop.f32.mrf.mxu1 }
 0x27a   : > { %6691 = vst [vmem:[#allocation16_spill] sm:$0xff] %v4975_v46 }
 0x27b   : > { %v817_v53 = vpop.f32.mrf.mxu1 }
 0x27c   : > { %v4980_v58 = vadd.f32 %v817_v53, %v4844_v31  ;;  %863 = vmax.xlane.f32.xlu0 %v862_v6 }
 0x27d   : > { %v4985_v12 = vpop.f32.mrf.mxu1 }
 0x27e   : > { %6692 = vst [vmem:[#allocation17_spill] sm:$0xff] %v4980_v58  ;;  %6693 = vst [vmem:[#allocation18_spill] sm:$0xff] %v4985_v12  ;;  %v934_v32 = vmax.f32 %v4975_v46, %v4980_v58 }
 0x27f   : > { %v823_v11 = vpop.f32.mrf.mxu1 }
 0x280   : > { %v4990_v0 = vadd.f32 %v823_v11, %v4844_v31  ;;  %935 = vmax.xlane.f32.xlu0 %v934_v32 }
 0x281   : > { %v4992_v26 = vpop.f32.mrf.mxu1 }
 0x282   : > { %6694 = vst [vmem:[#allocation19_spill] sm:$0xff] %v4990_v0  ;;  %6695 = vst [vmem:[#allocation20_spill] sm:$0xff] %v4992_v26  ;;  %v937_v6 = vmax.f32 %v4985_v12, %v4990_v0 }
 0x283   : > { %v829_v53 = vpop.f32.mrf.mxu1 }
 0x284   : > { %v4997_v25 = vadd.f32 %v829_v53, %v4844_v31  ;;  %938 = vmax.xlane.f32.xlu0 %v937_v6 }
 0x285   : > { %v4999_v24 = vpop.f32.mrf.mxu1 }
 0x286   : > { %6696 = vst [vmem:[#allocation21_spill] sm:$0xff] %v4997_v25  ;;  %v940_v4 = vmax.f32 %v4992_v26, %v4997_v25  ;;  %v5045_v25 = vadd.f32 %v799_v61, %v4844_v31 }
 0x287   : > { %v835_v23 = vpop.f32.mrf.mxu1 }
 0x288   : > { %v5004_v11 = vadd.f32 %v835_v23, %v4844_v31  ;;  %941 = vmax.xlane.f32.xlu0 %v940_v4  ;;  %6697 = vst [vmem:[#allocation22_spill] sm:$0xff] %v5045_v25 }
 0x289   : > { %v5006_v32 = vpop.f32.mrf.mxu1 }
 0x28a   : > { %v943_v1 = vmax.f32 %v4999_v24, %v5004_v11 }
 0x28b   : > { %v841_v16 = vpop.f32.mrf.mxu1 }
 0x28c   : > { %v5011_v53 = vadd.f32 %v841_v16, %v4844_v31  ;;  %944 = vmax.xlane.f32.xlu0 %v943_v1 }
 0x28d   : > { %v5013_v6 = vpop.f32.mrf.mxu1 }
 0x28e   : > { %v946_v22 = vmax.f32 %v5006_v32, %v5011_v53 }
 0x28f   : > { %v847_v21 = vpop.f32.mrf.mxu1 }
 0x290   : > { %v5018_v23 = vadd.f32 %v847_v21, %v4844_v31  ;;  %947 = vmax.xlane.f32.xlu0 %v946_v22  ;;  %v5035_v22 = vadd.f32 %v811_v28, %v4844_v31  ;;  %v5051_v28 = vadd.f32 %v4949_v54, %v4844_v31 }
 0x291   : > { %v5020_v4 = vpop.f32.mrf.mxu1 }
 0x292   : > { %v949_v46 = vmax.f32 %v5013_v6, %v5018_v23  ;;  %6698 = vst [vmem:[#allocation23_spill] sm:$0xff] %v5051_v28  ;;  %v922_v61 = vmax.f32 %v4941_v18, %v5051_v28 }
 0x293   : > { %v853_v58 = vpop.f32.mrf.mxu1 }
 0x294   : > { %v5025_v16 = vadd.f32 %v853_v58, %v4844_v31  ;;  %950 = vmax.xlane.f32.xlu0 %v949_v46  ;;  %v5040_v58 = vadd.f32 %v805_v15, %v4844_v31  ;;  %v931_v46 = vmax.f32 %v4967_v30, %v5035_v22  ;;  %v5057_v15 = vadd.f32 %v4939_v49, %v4844_v31 }
 0x295   : > { %v5027_v1 = vpop.f32.mrf.mxu1 }
 0x296   : > { %v952_v12 = vmax.f32 %v5020_v4, %v5025_v16  ;;  %6699 = vst [vmem:[#allocation24_spill] sm:$0xff] %v5057_v15  ;;  %v919_v54 = vmax.f32 %v4931_v42, %v5057_v15 }
 0x297   : > { %v859_v0 = vpop.f32.mrf.mxu1 }
 0x298   : > { %v5032_v21 = vadd.f32 %v859_v0, %v4844_v31  ;;  %953 = vmax.xlane.f32.xlu0 %v952_v12  ;;  %v928_v0 = vmax.f32 %v4959_v62, %v5040_v58  ;;  %v5063_v12 = vadd.f32 %v4929_v41, %v4844_v31  ;;  %v192_v41 = vld [vmem:[%s6596_s2 + $0x8] sm:$0xff] }
 0x29a   : > { %v955_v26 = vmax.f32 %v5027_v1, %v5032_v21  ;;  %6700 = vst [vmem:[#allocation25_spill] sm:$0xff] %v5063_v12  ;;  %v916_v49 = vmax.f32 %v4921_v36, %v5063_v12 }
 0x29c   : > { %956 = vmax.xlane.f32.xlu0 %v955_v26  ;;  %v925_v26 = vmax.f32 %v4951_v14, %v5045_v25 }
 0x2a0   : > { %932 = vmax.xlane.f32.xlu0 %v931_v46  ;;  %v5069_v46 = vadd.f32 %v4919_v35, %v4844_v31  ;;  %v196_v35 = vld [vmem:[%s6596_s2 + $0x28] sm:$0xff] }
 0x2a2   : > { %6701 = vst [vmem:[#allocation26_spill] sm:$0xff] %v5069_v46 }
 0x2a4   : > { %929 = vmax.xlane.f32.xlu0 %v928_v0  ;;  %v913_v0 = vmax.f32 %v4910_v19, %v5069_v46  ;;  %v5086_v46 = vpop.f32.mrf.mxu0 }
 0x2a5   : > { %6702 = vst [vmem:[#allocation27_spill] sm:$0xff] %v5086_v46 }
 0x2a6   : > { %v5094_v25 = vpop.f32.mrf.mxu0 }
 0x2a8   : > { %926 = vmax.xlane.f32.xlu0 %v925_v26 }
 0x2ac   : > { %923 = vmax.xlane.f32.xlu0 %v922_v61 }
 0x2b0   : > { %920 = vmax.xlane.f32.xlu0 %v919_v54 }
 0x2b4   : > { %917 = vmax.xlane.f32.xlu0 %v916_v49 }
 0x2b8   : > { %914 = vmax.xlane.f32.xlu0 %v913_v0 }
 0x2cd   : > { %v5078_v26 = vpop.xlane.xlu0 %890 }
 0x2ce   : > { %210 = vperm.xlu0 %4109, %v192_v41  }
 0x2d1   : > { %v5083_v61 = vpop.xlane.xlu0 %893 }
 0x2d2   : > { %230 = vperm.xlu0 %4109, %v196_v35  }
 0x2d5   : > { %v897_v54 = vpop.xlane.xlu0 %896 }
 0x2d9   : > { %v900_v49 = vpop.xlane.xlu0 %899 }
 0x2dd   : > { %v903_v31 = vpop.xlane.xlu0 %902 }
 0x2de   : > { %v985_v28 = vsub.f32 %v4884_v55, %v903_v31  ;;  %v984_v46 = vsub.f32 %v4879_v52, %v903_v31 }
 0x2e1   : > { %v906_v36 = vpop.xlane.xlu0 %905 }
 0x2e2   : > { %v987_v0 = vsub.f32 %v4891_v59, %v906_v36  ;;  %v986_v42 = vsub.f32 %v4886_v56, %v906_v36  ;;  %v5096_v59 = vpop.f32.mrf.mxu0 }
 0x2e3   : > { %6703 = vst [vmem:[#allocation28_spill] sm:$0xff] %v5096_v59 }
 0x2e4   : > { %v1080_v35 = vmul.f32 1.442695, %v987_v0  ;;  %v5102_v36 = vpop.f32.mrf.mxu0  ;;  %v981_v0 = vsub.f32 %v4870_v47, %v897_v54 }
 0x2e5   : > { %v909_v19 = vpop.xlane.xlu0 %908  ;;  %6704 = vst [vmem:[#allocation29_spill] sm:$0xff] %v5102_v36 }
 0x2e6   : > { %v988_v12 = vsub.f32 %v4893_v60, %v909_v19  ;;  %v989_v41 = vsub.f32 %v4898_v63, %v909_v19  ;;  %v1078_v60 = vmul.f32 1.442695, %v986_v42  ;;  %v983_v63 = vsub.f32 %v4877_v51, %v900_v49  ;;  %v5104_v55 = vpop.f32.mrf.mxu0 }
 0x2e7   : > { %v1076_v19 = vmul.f32 1.442695, %v985_v28  ;;  %6705 = vst [vmem:[#allocation30_spill] sm:$0xff] %v5104_v55  ;;  %v980_v28 = vsub.f32 %v4865_v44, %v897_v54  ;;  %v977_v54 = vsub.f32 %v4856_v39, %v5078_v26  ;;  %v976_v39 = vsub.f32 %v4853_v37, %v5078_v26 }
 0x2e8   : > { %v1082_v15 = vmul.f32 1.442695, %v988_v12  ;;  %v1084_v18 = vmul.f32 1.442695, %v989_v41  ;;  %v5106_v12 = vpop.xlane.xlu1 %884  ;;  %v1072_v31 = vmul.f32 1.442695, %v983_v63  ;;  %v5112_v51 = vpop.f32.mrf.mxu0 }
 0x2e9   : > { %v5092_v14 = vpop.xlane.xlu0 %887  ;;  %6706 = vst [vmem:[#allocation31_spill] sm:$0xff] %v5112_v51  ;;  %v1066_v55 = vmul.f32 1.442695, %v980_v28  ;;  %v1060_v28 = vmul.f32 1.442695, %v977_v54  ;;  %v190_v54 = vld [vmem:[%s6595_s1 + $0x58] sm:$0xff] }
 0x2ea   : > { %4111 = vpow2.f32 %v1082_v15  ;;  %v982_v15 = vsub.f32 %v4872_v48, %v900_v49  ;;  %v5114_v42 = vpop.f32.mrf.mxu0  ;;  %v979_v48 = vsub.f32 %v4863_v43, %v5083_v61  ;;  %v1058_v26 = vmul.f32 1.442695, %v976_v39 }
 0x2eb   : > { %4113 = vpow2.f32 %v1084_v18  ;;  %v1074_v18 = vmul.f32 1.442695, %v984_v46  ;;  %v1068_v46 = vmul.f32 1.442695, %v981_v0  ;;  %v6621_v39 = vmov 1.0  }
 0x2ec   : > { %4115 = vpow2.f32 %v1080_v35  ;;  %v1070_v41 = vmul.f32 1.442695, %v982_v15  ;;  %v5117_v35 = vpop.xlane.xlu1 %911  ;;  %v416_v49 = vpop.f32.mrf.mxu0  ;;  %v1064_v15 = vmul.f32 1.442695, %v979_v48 }
 0x2ed   : > { %v5100_v56 = vpop.xlane.xlu0 %881  ;;  %4117 = vpow2.f32 %v1078_v60 }
 0x2ee   : > { %4119 = vpow2.f32 %v1076_v19  ;;  %v978_v19 = vsub.f32 %v4858_v40, %v5083_v61  ;;  %v188_v40 = vld [vmem:[%s6595_s1 + $0x48] sm:$0xff] }
 0x2ef   : > { %4121 = vpow2.f32 %v1074_v18  ;;  %3962 = vmatmul.mubr.msk.f32.gmra.mxu0 %vm263_vm0, %v188_v40 }
 0x2f0   : > { %4123 = vpow2.f32 %v1072_v31  ;;  %v5125_v44 = vpop.permute.xlu1 %245  ;;  %v1062_v61 = vmul.f32 1.442695, %v978_v19 }
 0x2f1   : > { %v5110_v52 = vpop.xlane.xlu0 %878  ;;  %4125 = vpow2.f32 %v1070_v41  ;;  %v417_v18 = vadd.f32 %v416_v49, %v5125_v44  ;;  %v975_v41 = vsub.f32 %v4903_v2, %v5092_v14  ;;  %v189_v49 = vld [vmem:[%s6595_s1 + $0x50] sm:$0xff] }
 0x2f2   : > { %4127 = vpow2.f32 %v1068_v46  ;;  %v6707_v46 = vmov 0.0  }
 0x2f3   : > { %4129 = vpow2.f32 %v1066_v55  ;;  %1214 = vmatprep.mubr.f32.mxu1 %v417_v18  ;;  %424 = vmatprep.mubr.f32.mxu0 %v6707_v46  ;;  %v974_v55 = vsub.f32 %v4849_v34, %v5092_v14  ;;  %v972_v34 = vsub.f32 %v4842_v29, %v5106_v12 }
 0x2f4   : > { %4131 = vpow2.f32 %v1064_v15  ;;  %3963 = vmatmul.mubr.msk.f32.gmra.mxu0 %vm263_vm0, %v189_v49 }
 0x2f5   : > { %v5121_v47 = vpop.xlane.xlu0 %875  ;;  %4133 = vpow2.f32 %v1062_v61  ;;  %430 = vmatprep.mubr.f32.mxu0 %v6707_v46  ;;  %v1050_v29 = vmul.f32 1.442695, %v972_v34 }
 0x2f6   : > { %4135 = vpow2.f32 %v1060_v28 }
 0x2f7   : > { %v4112_v60 = vpop.eup %4111  ;;  %4137 = vpow2.f32 %v1058_v26  ;;  %v968_v26 = vsub.f32 %v4829_v17, %v5110_v52 }
 0x2f8   : > { %v4114_v63 = vpop.eup %4113  ;;  %3964 = vmatmul.mubr.msk.f32.gmra.mxu0 %vm263_vm0, %v190_v54 }
 0x2f9   : > { %1150 = vmatprep.subr.mxu1 %v4114_v63  ;;  %1221 = vmatprep.subr.mxu0 %v4114_v63  ;;  %v5129_v43 = vpop.xlane.xlu0 %872  ;;  %v4116_v0 = vpop.eup %4115  ;;  %v1056_v63 = vmul.f32 1.442695, %v975_v41 }
 0x2fa   : > { %1151 = vmatpush1.xpose.msra.mxu1 %v4112_v60  ;;  %1222 = vmatpush1.xpose.msra.mxu0 %v4112_v60  ;;  %v4118_v31 = vpop.eup %4117  ;;  %v973_v60 = vsub.f32 %v4847_v33, %v5106_v12  ;;  %v1054_v33 = vmul.f32 1.442695, %v974_v55  ;;  %v970_v12 = vsub.f32 %v4838_v27, %v5100_v56 }
 0x2fb   : > { %1152 = vmatprep.subr.mxu1 %v4116_v0  ;;  %1223 = vmatprep.subr.mxu0 %v4116_v0  ;;  %v4120_v37 = vpop.eup %4119  ;;  %4139 = vpow2.f32 %v1056_v63  ;;  %v971_v0 = vsub.f32 %v4913_v20, %v5100_v56  ;;  %v969_v20 = vsub.f32 %v4925_v38, %v5110_v52  ;;  %v967_v56 = vsub.f32 %v4935_v45, %v5121_v47 }
 0x2fc   : > { %v4122_v2 = vpop.eup %4121  ;;  %v1052_v18 = vmul.f32 1.442695, %v973_v60  ;;  %1285 = vmatprep.mubr.f32.mxu0 %v6621_v39  ;;  %4141 = vpow2.f32 %v1054_v33  ;;  %v1042_v60 = vmul.f32 1.442695, %v968_v26  ;;  %v966_v63 = vsub.f32 %v4819_v13, %v5121_v47 }
 0x2fd   : > { %v5140_v48 = vpop.xlane.xlu0 %869  ;;  %v4124_v15 = vpop.eup %4123  ;;  %v1048_v28 = vmul.f32 1.442695, %v971_v0  ;;  %v1044_v27 = vmul.f32 1.442695, %v969_v20  ;;  %v1040_v17 = vmul.f32 1.442695, %v967_v56  ;;  %v965_v52 = vsub.f32 %v4945_v50, %v5129_v43 }
 0x2fe   : > { %1153 = vmatpush1.xpose.msra.mxu1 %v4118_v31  ;;  %1224 = vmatpush1.xpose.msra.mxu0 %v4118_v31  ;;  %v4126_v14 = vpop.eup %4125  ;;  %4143 = vpow2.f32 %v1052_v18  ;;  %v1038_v34 = vmul.f32 1.442695, %v966_v63  ;;  %v964_v33 = vsub.f32 %v4812_v9, %v5129_v43  ;;  %v963_v47 = vsub.f32 %v4955_v57, %v5140_v48 }
 0x2ff   : > { %1154 = vmatprep.subr.mxu1 %v4120_v37  ;;  %1225 = vmatprep.subr.mxu0 %v4120_v37  ;;  %v4128_v61 = vpop.eup %4127  ;;  %4145 = vpow2.f32 %v1050_v29  ;;  %v1046_v37 = vmul.f32 1.442695, %v970_v12  ;;  %v1036_v13 = vmul.f32 1.442695, %v965_v52 }
 0x300   : > { %v4130_v31 = vpop.eup %4129  ;;  %4147 = vpow2.f32 %v1048_v28  ;;  %v1034_v0 = vmul.f32 1.442695, %v964_v33  ;;  %v1032_v9 = vmul.f32 1.442695, %v963_v47 }
 0x301   : > { %v5151_v19 = vpop.xlane.xlu0 %866  ;;  %v4132_v49 = vpop.eup %4131  ;;  %4149 = vpow2.f32 %v1046_v37 }
 0x302   : > { %1155 = vmatpush1.xpose.msra.mxu1 %v4122_v2  ;;  %1226 = vmatpush1.xpose.msra.mxu0 %v4122_v2  ;;  %v4134_v55 = vpop.eup %4133  ;;  %4151 = vpow2.f32 %v1044_v27  ;;  %v961_v43 = vsub.f32 %v4963_v10, %v5151_v19  ;;  %v960_v28 = vsub.f32 %v4804_v5, %v5151_v19 }
 0x303   : > { %1156 = vmatprep.subr.mxu1 %v4124_v15  ;;  %1227 = vmatprep.subr.mxu0 %v4124_v15  ;;  %v4136_v38 = vpop.eup %4135  ;;  %4153 = vpow2.f32 %v1042_v60 }
 0x304   : > { %v4138_v54 = vpop.eup %4137  ;;  %4155 = vpow2.f32 %v1040_v17  ;;  %v1026_v37 = vmul.f32 1.442695, %v960_v28 }
 0x305   : > { %v5162_v40 = vpop.xlane.xlu0 %863  ;;  %4157 = vpow2.f32 %v1038_v34 }
 0x306   : > { %1157 = vmatpush1.xpose.msra.mxu1 %v4126_v14  ;;  %1228 = vmatpush1.xpose.msra.mxu0 %v4126_v14  ;;  %4159 = vpow2.f32 %v1036_v13  ;;  %v958_v26 = vsub.f32 %v4800_v3, %v5162_v40 }
 0x307   : > { %1158 = vmatprep.subr.mxu1 %v4128_v61  ;;  %1229 = vmatprep.subr.mxu0 %v4128_v61  ;;  %v962_v61 = vsub.f32 %v4808_v7, %v5140_v48  ;;  %4161 = vpow2.f32 %v1034_v0  ;;  %v1028_v7 = vmul.f32 1.442695, %v961_v43  ;;  %v959_v48 = vsub.f32 %v4971_v8, %v5162_v40 }
 0x308   : > { %v4140_v45 = vpop.eup %4139  ;;  %4163 = vpow2.f32 %v1032_v9  ;;  %v1022_v8 = vmul.f32 1.442695, %v958_v26 }
 0x309   : > { %v5169_v41 = vpop.xlane.xlu0 %935  ;;  %v4142_v14 = vpop.eup %4141  ;;  %v1024_v5 = vmul.f32 1.442695, %v959_v48 }
 0x30a   : > { %1159 = vmatpush1.xpose.msra.mxu1 %v4130_v31  ;;  %1230 = vmatpush1.xpose.msra.mxu0 %v4130_v31  ;;  %v1030_v31 = vmul.f32 1.442695, %v962_v61 }
 0x30b   : > { %1160 = vmatprep.subr.mxu1 %v4132_v49  ;;  %1231 = vmatprep.subr.mxu0 %v4132_v49  ;;  %v4144_v50 = vpop.eup %4143 }
 0x30c   : > { %v4146_v29 = vpop.eup %4145  ;;  %4165 = vpow2.f32 %v1030_v31 }
 0x30d   : > { %v5175_v2 = vpop.xlane.xlu0 %938  ;;  %v4148_v57 = vpop.eup %4147  ;;  %4167 = vpow2.f32 %v1028_v7 }
 0x30e   : > { %1161 = vmatpush1.xpose.msra.mxu1 %v4134_v55  ;;  %1232 = vmatpush1.xpose.msra.mxu0 %v4134_v55  ;;  %v4150_v20 = vpop.eup %4149  ;;  %4169 = vpow2.f32 %v1026_v37 }
 0x30f   : > { %1162 = vmatprep.subr.mxu1 %v4136_v38  ;;  %1233 = vmatprep.subr.mxu0 %v4136_v38  ;;  %v4152_v10 = vpop.eup %4151  ;;  %4171 = vpow2.f32 %v1024_v5 }
 0x310   : > { %v4154_v55 = vpop.eup %4153  ;;  %4173 = vpow2.f32 %v1022_v8 }
 0x311   : > { %v5181_v15 = vpop.xlane.xlu0 %941  ;;  %v4156_v27 = vpop.eup %4155 }
 0x312   : > { %1163 = vmatpush1.xpose.msra.mxu1 %v4138_v54  ;;  %1234 = vmatpush1.xpose.msra.mxu0 %v4138_v54  ;;  %v4158_v56 = vpop.eup %4157 }
 0x313   : > { %1164 = vmatprep.subr.mxu1 %v4140_v45  ;;  %1235 = vmatprep.subr.mxu0 %v4140_v45  ;;  %v4160_v63 = vpop.eup %4159 }
 0x314   : > { %v4162_v45 = vpop.eup %4161 }
 0x315   : > { %v5187_v18 = vpop.xlane.xlu0 %944 }
 0x316   : > { %1165 = vmatpush1.xpose.msra.mxu1 %v4142_v14  ;;  %1236 = vmatpush1.xpose.msra.mxu0 %v4142_v14  ;;  %v4164_v14 = vpop.eup %4163 }
 0x317   : > { %1166 = vmatprep.subr.mxu1 %v4144_v50  ;;  %1237 = vmatprep.subr.mxu0 %v4144_v50 }
 0x319   : > { %v5193_v12 = vpop.xlane.xlu0 %947  ;;  %v4166_v13 = vpop.eup %4165 }
 0x31a   : > { %1167 = vmatpush1.xpose.msra.mxu1 %v4146_v29  ;;  %1238 = vmatpush1.xpose.msra.mxu0 %v4146_v29  ;;  %v4168_v50 = vpop.eup %4167  ;;  %v1014_v0 = vsub.f32 %v5006_v32, %v5193_v12  ;;  %v1013_v29 = vsub.f32 %v5004_v11, %v5187_v18 }
 0x31b   : > { %1168 = vmatprep.subr.mxu1 %v4148_v57  ;;  %1239 = vmatprep.subr.mxu0 %v4148_v57  ;;  %v1012_v57 = vsub.f32 %v4999_v24, %v5187_v18  ;;  %v6710_v24 = vld [vmem:[#allocation19_spill] sm:$0xff] }
 0x31c   : > { %v1134_v31 = vmul.f32 1.442695, %v1014_v0  ;;  %v1009_v18 = vsub.f32 %v6710_v24, %v5175_v2 }
 0x31d   : > { %v951_v49 = vpop.xlane.xlu0 %950  ;;  %v1130_v37 = vmul.f32 1.442695, %v1012_v57 }
 0x31e   : > { %1169 = vmatpush1.xpose.msra.mxu1 %v4150_v20  ;;  %1240 = vmatpush1.xpose.msra.mxu0 %v4150_v20  ;;  %v1017_v34 = vsub.f32 %v5018_v23, %v951_v49  ;;  %v1132_v20 = vmul.f32 1.442695, %v1013_v29 }
 0x31f   : > { %1170 = vmatprep.subr.mxu1 %v4152_v10  ;;  %1241 = vmatprep.subr.mxu0 %v4152_v10 }
 0x320   : > { %v1140_v47 = vmul.f32 1.442695, %v1017_v34 }
 0x321   : > { %v954_v19 = vpop.xlane.xlu0 %953 }
 0x322   : > { %1171 = vmatpush1.xpose.msra.mxu1 %v4154_v55  ;;  %1242 = vmatpush1.xpose.msra.mxu0 %v4154_v55  ;;  %v1019_v38 = vsub.f32 %v5025_v16, %v954_v19  ;;  %v1018_v40 = vsub.f32 %v5020_v4, %v954_v19  ;;  %v1015_v4 = vsub.f32 %v5011_v53, %v5193_v12  ;;  %v6708_v12 = vld [vmem:[#allocation21_spill] sm:$0xff]  ;;  %v6711_v19 = vld [vmem:[#allocation18_spill] sm:$0xff] }
 0x323   : > { %1172 = vmatprep.subr.mxu1 %v4156_v27  ;;  %1243 = vmatprep.subr.mxu0 %v4156_v27  ;;  %v1011_v28 = vsub.f32 %v6708_v12, %v5181_v15  ;;  %v1008_v27 = vsub.f32 %v6711_v19, %v5175_v2  ;;  %v6718_v12 = vld [vmem:[#allocation23_spill] sm:$0xff] }
 0x324   : > { %v1144_v33 = vmul.f32 1.442695, %v1019_v38  ;;  %v1136_v9 = vmul.f32 1.442695, %v1015_v4 }
 0x325   : > { %v957_v60 = vpop.xlane.xlu0 %956  ;;  %v1128_v26 = vmul.f32 1.442695, %v1011_v28 }
 0x326   : > { %v1020_v54 = vsub.f32 %v5027_v1, %v957_v60  ;;  %v1021_v3 = vsub.f32 %v5032_v21, %v957_v60  ;;  %1173 = vmatpush1.xpose.msra.mxu1 %v4158_v56  ;;  %1244 = vmatpush1.xpose.msra.mxu0 %v4158_v56  ;;  %v1016_v1 = vsub.f32 %v5013_v6, %v951_v49  ;;  %v1142_v21 = vmul.f32 1.442695, %v1018_v40  ;;  %v4170_v6 = vpop.eup %4169  ;;  %v6709_v49 = vld [vmem:[#allocation20_spill] sm:$0xff]  ;;  %v6712_v56 = vld [vmem:[#allocation17_spill] sm:$0xff] }
 0x327   : > { %1174 = vmatprep.subr.mxu1 %v4160_v63  ;;  %1245 = vmatprep.subr.mxu0 %v4160_v63  ;;  %v4172_v43 = vpop.eup %4171  ;;  %v1010_v10 = vsub.f32 %v6709_v49, %v5181_v15  ;;  %v1007_v38 = vsub.f32 %v6712_v56, %v5169_v41  ;;  %v1124_v60 = vmul.f32 1.442695, %v1009_v18 }
 0x328   : > { %v1146_v17 = vmul.f32 1.442695, %v1020_v54  ;;  %v1148_v52 = vmul.f32 1.442695, %v1021_v3  ;;  %v1138_v61 = vmul.f32 1.442695, %v1016_v1  ;;  %v4174_v32 = vpop.eup %4173 }
 0x329   : > { %v5206_v16 = vpop.xlane.xlu0 %932  ;;  %v1126_v15 = vmul.f32 1.442695, %v1010_v10  ;;  %v6713_v3 = vld [vmem:[#allocation16_spill] sm:$0xff] }
 0x32a   : > { %4175 = vpow2.f32 %v1146_v17  ;;  %1175 = vmatpush1.xpose.msra.mxu1 %v4162_v45  ;;  %1246 = vmatpush1.xpose.msra.mxu0 %v4162_v45  ;;  %v1006_v40 = vsub.f32 %v6713_v3, %v5169_v41  ;;  %v1122_v17 = vmul.f32 1.442695, %v1008_v27  ;;  %v1005_v45 = vsub.f32 %v5035_v22, %v5206_v16 }
 0x32b   : > { %4177 = vpow2.f32 %v1148_v52  ;;  %1176 = vmatprep.subr.mxu1 %v4164_v14  ;;  %1247 = vmatprep.subr.mxu0 %v4164_v14  ;;  %v1120_v52 = vmul.f32 1.442695, %v1007_v38  ;;  %v1004_v14 = vsub.f32 %v4967_v30, %v5206_v16  ;;  %v6714_v16 = vld [vmem:[#allocation22_spill] sm:$0xff] }
 0x32c   : > { %4179 = vpow2.f32 %v1144_v33  ;;  %v1118_v33 = vmul.f32 1.442695, %v1006_v40  ;;  %v1116_v41 = vmul.f32 1.442695, %v1005_v45  ;;  %v6725_v45 = vld [vmem:[#allocation11_spill] sm:$0xff] }
 0x32d   : > { %v5211_v23 = vpop.xlane.xlu0 %929  ;;  %4181 = vpow2.f32 %v1142_v21  ;;  %v1114_v22 = vmul.f32 1.442695, %v1004_v14  ;;  %v6726_v14 = vld [vmem:[#allocation10_spill] sm:$0xff] }
 0x32e   : > { %1177 = vmatpush1.xpose.msra.mxu1 %v4166_v13  ;;  %1248 = vmatpush1.xpose.msra.mxu0 %v4166_v13  ;;  %4183 = vpow2.f32 %v1140_v47  ;;  %v1003_v21 = vsub.f32 %v5040_v58, %v5211_v23  ;;  %v1002_v47 = vsub.f32 %v4959_v62, %v5211_v23  ;;  %v6717_v62 = vld [vmem:[#allocation15_spill] sm:$0xff] }
 0x32f   : > { %1178 = vmatprep.subr.mxu1 %v4168_v50  ;;  %1249 = vmatprep.subr.mxu0 %v4168_v50  ;;  %4185 = vpow2.f32 %v1138_v61 }
 0x330   : > { %4187 = vpow2.f32 %v1136_v9  ;;  %v1112_v30 = vmul.f32 1.442695, %v1003_v21  ;;  %v6716_v9 = vld [vmem:[#allocation3_spill] sm:$0xff]  ;;  %v1110_v57 = vmul.f32 1.442695, %v1002_v47  ;;  %v6727_v21 = vld [vmem:[#allocation9_spill] sm:$0xff] }
 0x331   : > { %v5217_v53 = vpop.xlane.xlu0 %926  ;;  %4189 = vpow2.f32 %v1134_v31 }
 0x332   : > { %1179 = vmatpush1.xpose.msra.mxu1 %v4170_v6  ;;  %1250 = vmatpush1.xpose.msra.mxu0 %v4170_v6  ;;  %4191 = vpow2.f32 %v1132_v20  ;;  %v1001_v0 = vsub.f32 %v6714_v16, %v5217_v53  ;;  %v6715_v6 = vld [vmem:[#allocation2_spill] sm:$0xff]  ;;  %v1000_v23 = vsub.f32 %v6717_v62, %v5217_v53 }
 0x333   : > { %1180 = vmatprep.subr.mxu1 %v4172_v43  ;;  %1251 = vmatprep.subr.mxu0 %v4172_v43  ;;  %4193 = vpow2.f32 %v1130_v37  ;;  %v6720_v37 = vld [vmem:[#allocation24_spill] sm:$0xff] }
 0x334   : > { %4195 = vpow2.f32 %v1128_v26 }
 0x335   : > { %v5223_v11 = vpop.xlane.xlu0 %923  ;;  %4197 = vpow2.f32 %v1126_v15 }
 0x336   : > { %1181 = vmatpush1.xpose.msra.mxu1 %v4174_v32  ;;  %1252 = vmatpush1.xpose.msra.mxu0 %v4174_v32  ;;  %4199 = vpow2.f32 %v1124_v60  ;;  %v1108_v32 = vmul.f32 1.442695, %v1001_v0  ;;  %v999_v28 = vsub.f32 %v6718_v12, %v5223_v11  ;;  %v6723_v60 = vld [vmem:[#allocation12_spill] sm:$0xff] }
 0x337   : > { %v4176_v7 = vpop.eup %4175  ;;  %4201 = vpow2.f32 %v1122_v17 }
 0x338   : > { %v4178_v48 = vpop.eup %4177  ;;  %4203 = vpow2.f32 %v1120_v52  ;;  %v1104_v53 = vmul.f32 1.442695, %v999_v28 }
 0x339   : > { %1182 = vmatprep.subr.mxu1 %v4178_v48  ;;  %1253 = vmatprep.subr.mxu0 %v4178_v48  ;;  %v5229_v55 = vpop.xlane.xlu0 %920  ;;  %v4180_v5 = vpop.eup %4179  ;;  %4205 = vpow2.f32 %v1118_v33  ;;  %v6719_v48 = vld [vmem:[#allocation14_spill] sm:$0xff] }
 0x33a   : > { %1183 = vmatpush2.xpose.msra.mxu1 %v4176_v7  ;;  %1254 = vmatpush2.xpose.msra.mxu0 %v4176_v7  ;;  %v4182_v8 = vpop.eup %4181  ;;  %4207 = vpow2.f32 %v1116_v41  ;;  %v1106_v7 = vmul.f32 1.442695, %v1000_v23  ;;  %v998_v49 = vsub.f32 %v6719_v48, %v5223_v11  ;;  %v997_v24 = vsub.f32 %v6720_v37, %v5229_v55  ;;  %v6722_v11 = vld [vmem:[#allocation25_spill] sm:$0xff] }
 0x33b   : > { %1184 = vmatprep.subr.mxu1 %v4180_v5  ;;  %1255 = vmatprep.subr.mxu0 %v4180_v5  ;;  %v4184_v63 = vpop.eup %4183  ;;  %4209 = vpow2.f32 %v1114_v22  ;;  %v6721_v5 = vld [vmem:[#allocation13_spill] sm:$0xff]  ;;  %v415_v23 = vadd.f32 %v5114_v42, %v5125_v44 }
 0x33c   : > { %v4186_v2 = vpop.eup %4185  ;;  %4211 = vpow2.f32 %v1112_v30  ;;  %v1102_v26 = vmul.f32 1.442695, %v998_v49  ;;  %v996_v19 = vsub.f32 %v6721_v5, %v5229_v55  ;;  %v1100_v15 = vmul.f32 1.442695, %v997_v24  ;;  %v6724_v55 = vld [vmem:[#allocation26_spill] sm:$0xff] }
 0x33d   : > { %v5235_v54 = vpop.xlane.xlu0 %917  ;;  %v4188_v34 = vpop.eup %4187  ;;  %4213 = vpow2.f32 %v1110_v57 }
 0x33e   : > { %1185 = vmatpush2.xpose.msra.mxu1 %v4182_v8  ;;  %1256 = vmatpush2.xpose.msra.mxu0 %v4182_v8  ;;  %v4190_v1 = vpop.eup %4189  ;;  %4215 = vpow2.f32 %v1108_v32  ;;  %v995_v8 = vsub.f32 %v6722_v11, %v5235_v54  ;;  %v1098_v38 = vmul.f32 1.442695, %v996_v19 }
 0x33f   : > { %1186 = vmatprep.subr.mxu1 %v4184_v63  ;;  %1257 = vmatprep.subr.mxu0 %v4184_v63  ;;  %v4192_v4 = vpop.eup %4191  ;;  %4217 = vpow2.f32 %v1106_v7  ;;  %v994_v63 = vsub.f32 %v6723_v60, %v5235_v54  ;;  %v991_v54 = vsub.f32 %v6726_v14, %v5117_v35 }
 0x340   : > { %v4194_v50 = vpop.eup %4193  ;;  %4219 = vpow2.f32 %v1104_v53  ;;  %v1096_v40 = vmul.f32 1.442695, %v995_v8 }
 0x341   : > { %v5245_v13 = vpop.xlane.xlu0 %914  ;;  %v4196_v58 = vpop.eup %4195  ;;  %4221 = vpow2.f32 %v1102_v26  ;;  %v1094_v52 = vmul.f32 1.442695, %v994_v63 }
 0x342   : > { %1187 = vmatpush2.xpose.msra.mxu1 %v4186_v2  ;;  %1258 = vmatpush2.xpose.msra.mxu0 %v4186_v2  ;;  %v4198_v31 = vpop.eup %4197  ;;  %4223 = vpow2.f32 %v1100_v15  ;;  %v993_v17 = vsub.f32 %v6724_v55, %v5245_v13 }
 0x343   : > { %1188 = vmatprep.subr.mxu1 %v4188_v34  ;;  %1259 = vmatprep.subr.mxu0 %v4188_v34  ;;  %v4200_v20 = vpop.eup %4199  ;;  %4225 = vpow2.f32 %v1098_v38  ;;  %v992_v34 = vsub.f32 %v6725_v45, %v5245_v13 }
 0x344   : > { %v4202_v10 = vpop.eup %4201  ;;  %4227 = vpow2.f32 %v1096_v40 }
 0x345   : > { %v4204_v18 = vpop.eup %4203  ;;  %4229 = vpow2.f32 %v1094_v52  ;;  %v1090_v22 = vmul.f32 1.442695, %v992_v34 }
 0x346   : > { %1189 = vmatpush2.xpose.msra.mxu1 %v4190_v1  ;;  %1260 = vmatpush2.xpose.msra.mxu0 %v4190_v1  ;;  %v4206_v27 = vpop.eup %4205  ;;  %v1092_v1 = vmul.f32 1.442695, %v993_v17 }
 0x347   : > { %1190 = vmatprep.subr.mxu1 %v4192_v4  ;;  %1261 = vmatprep.subr.mxu0 %v4192_v4  ;;  %v4208_v56 = vpop.eup %4207  ;;  %v990_v4 = vsub.f32 %v6727_v21, %v5117_v35 }
 0x348   : > { %v4210_v3 = vpop.eup %4209  ;;  %4231 = vpow2.f32 %v1092_v1 }
 0x349   : > { %v211_v61 = vpop.permute.xlu0 %210  ;;  %v4212_v2 = vpop.eup %4211  ;;  %v1086_v30 = vmul.f32 1.442695, %v990_v4  ;;  %4233 = vpow2.f32 %v1090_v22  ;;  %v6735_v4 = vlaneseq }
 0x34a   : > { %v373_v29 = vadd.f32 %v6715_v6, %v211_v61  ;;  %v375_v43 = vadd.f32 %v6716_v9, %v211_v61  ;;  %1191 = vmatpush2.xpose.msra.mxu1 %v4194_v50  ;;  %1262 = vmatpush2.xpose.msra.mxu0 %v4194_v50  ;;  %v4214_v33 = vpop.eup %4213  ;;  %v1088_v50 = vmul.f32 1.442695, %v991_v54 }
 0x34b   : > { %1192 = vmatprep.subr.mxu1 %v4196_v58  ;;  %1263 = vmatprep.subr.mxu0 %v4196_v58  ;;  %v4216_v41 = vpop.eup %4215  ;;  %v1295_v22 = vshrl.u32 %v6735_v4, 7 }
 0x34c   : > { %1338 = vxpose.xlu1.b32.start.end [1/1] (short) %v375_v43, 128  ;;  %1306 = vxpose.xlu0.b32.start.end [1/1] (short) %v373_v29, 128  ;;  %v4218_v47 = vpop.eup %4217  ;;  %4235 = vpow2.f32 %v1088_v50 }
 0x34d   : > { %v4220_v13 = vpop.eup %4219  ;;  %4237 = vpow2.f32 %v1086_v30  ;;  %v231_v43 = vpop.permute.xlu0 %230  ;;  %v5357_v50 = vsub.s32 0, %v1295_v22 }
 0x34e   : > { %1193 = vmatpush2.xpose.msra.mxu1 %v4198_v31  ;;  %1264 = vmatpush2.xpose.msra.mxu0 %v4198_v31  ;;  %v4222_v16 = vpop.eup %4221  ;;  %v399_v62 = vadd.f32 %v5094_v25, %v231_v43  ;;  %v6728_v31 = vld [vmem:[#allocation27_spill] sm:$0xff] }
 0x34f   : > { %1194 = vmatprep.subr.mxu1 %v4200_v20  ;;  %1265 = vmatprep.subr.mxu0 %v4200_v20  ;;  %v4224_v0 = vpop.eup %4223  ;;  %v397_v32 = vadd.f32 %v6728_v31, %v231_v43  ;;  %6736 = vst [vmem:[#allocation22_spill] sm:$0xff] %v5357_v50 }
 0x350   : > { %v4226_v35 = vpop.eup %4225 }
 0x351   : > { %v4228_v61 = vpop.eup %4227 }
 0x352   : > { %1195 = vmatpush2.xpose.msra.mxu1 %v4202_v10  ;;  %1266 = vmatpush2.xpose.msra.mxu0 %v4202_v10  ;;  %v4230_v58 = vpop.eup %4229 }
 0x353   : > { %1196 = vmatprep.subr.mxu1 %v4204_v18  ;;  %1267 = vmatprep.subr.mxu0 %v4204_v18 }
 0x355   : > { %v4232_v6 = vpop.eup %4231 }
 0x356   : > { %1197 = vmatpush2.xpose.msra.mxu1 %v4206_v27  ;;  %1268 = vmatpush2.xpose.msra.mxu0 %v4206_v27  ;;  %v4234_v29 = vpop.eup %4233 }
 0x357   : > { %1198 = vmatprep.subr.mxu1 %v4208_v56  ;;  %1269 = vmatprep.subr.mxu0 %v4208_v56 }
 0x359   : > { %v4236_v9 = vpop.eup %4235 }
 0x35a   : > { %1199 = vmatpush2.xpose.msra.mxu1 %v4210_v3  ;;  %1270 = vmatpush2.xpose.msra.mxu0 %v4210_v3  ;;  %v4238_v57 = vpop.eup %4237 }
 0x35b   : > { %1200 = vmatprep.subr.mxu1 %v4212_v2  ;;  %1271 = vmatprep.subr.mxu0 %v4212_v2 }
 0x35e   : > { %1201 = vmatpush2.xpose.msra.mxu1 %v4214_v33  ;;  %1272 = vmatpush2.xpose.msra.mxu0 %v4214_v33 }
 0x35f   : > { %1202 = vmatprep.subr.mxu1 %v4216_v41  ;;  %1273 = vmatprep.subr.mxu0 %v4216_v41 }
 0x362   : > { %1203 = vmatpush2.xpose.msra.mxu1 %v4218_v47  ;;  %1274 = vmatpush2.xpose.msra.mxu0 %v4218_v47 }
 0x363   : > { %1204 = vmatprep.subr.mxu1 %v4220_v13  ;;  %1275 = vmatprep.subr.mxu0 %v4220_v13 }
 0x366   : > { %1205 = vmatpush2.xpose.msra.mxu1 %v4222_v16  ;;  %1276 = vmatpush2.xpose.msra.mxu0 %v4222_v16 }
 0x367   : > { %1206 = vmatprep.subr.mxu1 %v4224_v0  ;;  %1277 = vmatprep.subr.mxu0 %v4224_v0 }
 0x36a   : > { %1207 = vmatpush2.xpose.msra.mxu1 %v4226_v35  ;;  %1278 = vmatpush2.xpose.msra.mxu0 %v4226_v35 }
 0x36b   : > { %1208 = vmatprep.subr.mxu1 %v4228_v61  ;;  %1279 = vmatprep.subr.mxu0 %v4228_v61 }
 0x36e   : > { %1209 = vmatpush2.xpose.msra.mxu1 %v4230_v58  ;;  %1280 = vmatpush2.xpose.msra.mxu0 %v4230_v58 }
 0x36f   : > { %1210 = vmatprep.subr.mxu1 %v4232_v6  ;;  %1281 = vmatprep.subr.mxu0 %v4232_v6 }
 0x372   : > { %1211 = vmatpush2.xpose.msra.mxu1 %v4234_v29  ;;  %1282 = vmatpush2.xpose.msra.mxu0 %v4234_v29 }
 0x373   : > { %1212 = vmatprep.subr.mxu1 %v4236_v9  ;;  %1283 = vmatprep.subr.mxu0 %v4236_v9 }
 0x376   : > { %1213 = vmatpush2.xpose.msra.mxu1 %v4238_v57  ;;  %1284 = vmatpush2.xpose.msra.mxu0 %v4238_v57 }
 0x377   : > { %1496 = vmatprep.subr.mxu1 %v399_v62 }
 0x379   : > { %1215 = vmatmul.mubr.f32.vlgmr.msra.gmra.mxu1 %v415_v23  ;;  %1286 = vmatmul.mubr.f32.vlgmr.msra.gmra.mxu0 %v6621_v39 }
 0x37a   : > { %1497 = vmatpush1.msra.mxu1 %v397_v32  ;;  %1530 = vmatprep.mubr.f32.mxu1 %v6707_v46 }
 0x37b   : > { %2146 = vmatprep.mubr.f32.mxu0 %v6621_v39 }
 0x3af   : > { %v5327_v40 = vpop.f32.mrf.mxu0 }
 0x3b0   : > { %6729 = vst [vmem:[#allocation21_spill] sm:$0xff] %v5327_v40 }
 0x3b1   : > { %v5331_v17 = vpop.f32.mrf.mxu0 }
 0x3b2   : > { %6730 = vst [vmem:[#allocation20_spill] sm:$0xff] %v5331_v17 }
 0x3b4   : > { %v5335_v2 = vpop.f32.mrf.mxu0 }
 0x3b5   : > { %6731 = vst [vmem:[#allocation19_spill] sm:$0xff] %v5335_v2 }
 0x3b6   : > { %v5339_v45 = vpop.f32.mrf.mxu0 }
 0x3b7   : > { %6732 = vst [vmem:[#allocation18_spill] sm:$0xff] %v5339_v45 }
 0x3b8   : > { %v5343_v33 = vpop.f32.mrf.mxu0 }
 0x3b9   : > { %6733 = vst [vmem:[#allocation17_spill] sm:$0xff] %v5343_v33 }
 0x3ba   : > { %v5347_v14 = vpop.f32.mrf.mxu0 }
 0x3bb   : > { %6734 = vst [vmem:[#allocation16_spill] sm:$0xff] %v5347_v14 }
 0x3c8   : > { %v1322_v12 = vpop.trf.xlu0  ;;  %v1354_v10 = vpop.trf.xlu1 }
 0x3c9   : > { %3997 = vmatmul.mubr.msk.f32.vlgmr.msra.gmra.mxu1 %vm508_vm1, %v1322_v12 }
 0x3ca   : > { %1536 = vmatprep.mubr.f32.mxu1 %v6707_v46 }
 0x3cc   : > { %v1323_v25 = vpop.trf.xlu0  ;;  %v1355_v37 = vpop.trf.xlu1 }
 0x3cd   : > { %3998 = vmatmul.mubr.msk.f32.gmra.mxu1 %vm508_vm1, %v1323_v25 }
 0x3ce   : > { %1542 = vmatprep.mubr.f32.mxu1 %v6707_v46 }
 0x3d0   : > { %v1324_v42 = vpop.trf.xlu0  ;;  %v1356_v26 = vpop.trf.xlu1 }
 0x3d1   : > { %3999 = vmatmul.mubr.msk.f32.gmra.mxu1 %vm508_vm1, %v1324_v42 }
 0x3d2   : > { %1548 = vmatprep.mubr.f32.mxu1 %v6707_v46 }
 0x3d4   : > { %v1325_v44 = vpop.trf.xlu0  ;;  %v1357_v19 = vpop.trf.xlu1 }
 0x3d5   : > { %4000 = vmatmul.mubr.msk.f32.gmra.mxu1 %vm508_vm1, %v1325_v44 }
 0x3d6   : > { %1554 = vmatprep.mubr.f32.mxu1 %v6707_v46 }
 0x3d8   : > { %v1326_v28 = vpop.trf.xlu0  ;;  %v1358_v11 = vpop.trf.xlu1 }
 0x3d9   : > { %4001 = vmatmul.mubr.msk.f32.gmra.mxu1 %vm508_vm1, %v1326_v28 }
 0x3da   : > { %1560 = vmatprep.mubr.f32.mxu1 %v6707_v46 }
 0x3dc   : > { %v1327_v20 = vpop.trf.xlu0  ;;  %v1359_v56 = vpop.trf.xlu1 }
 0x3dd   : > { %4002 = vmatmul.mubr.msk.f32.gmra.mxu1 %vm508_vm1, %v1327_v20 }
 0x3de   : > { %1566 = vmatprep.mubr.f32.mxu1 %v6707_v46 }
 0x3e0   : > { %v1328_v7 = vpop.trf.xlu0  ;;  %v1360_v38 = vpop.trf.xlu1 }
 0x3e1   : > { %4003 = vmatmul.mubr.msk.f32.gmra.mxu1 %vm508_vm1, %v1328_v7 }
 0x3e2   : > { %1572 = vmatprep.mubr.f32.mxu1 %v6707_v46 }
 0x3e4   : > { %v1329_v48 = vpop.trf.xlu0  ;;  %v1361_v60 = vpop.trf.xlu1 }
 0x3e5   : > { %4004 = vmatmul.mubr.msk.f32.gmra.mxu1 %vm508_vm1, %v1329_v48 }
 0x3e6   : > { %1578 = vmatprep.mubr.f32.mxu1 %v6707_v46 }
 0x3e8   : > { %v1330_v49 = vpop.trf.xlu0  ;;  %v1362_v63 = vpop.trf.xlu1 }
 0x3e9   : > { %4005 = vmatmul.mubr.msk.f32.gmra.mxu1 %vm508_vm1, %v1330_v49 }
 0x3ea   : > { %1584 = vmatprep.mubr.f32.mxu1 %v6707_v46 }
 0x3ec   : > { %v1331_v53 = vpop.trf.xlu0  ;;  %v1363_v3 = vpop.trf.xlu1 }
 0x3ed   : > { %4006 = vmatmul.mubr.msk.f32.gmra.mxu1 %vm508_vm1, %v1331_v53 }
 0x3ee   : > { %1590 = vmatprep.mubr.f32.mxu1 %v6707_v46 }
 0x3f0   : > { %v1332_v24 = vpop.trf.xlu0  ;;  %v1364_v55 = vpop.trf.xlu1 }
 0x3f1   : > { %4007 = vmatmul.mubr.msk.f32.gmra.mxu1 %vm508_vm1, %v1332_v24 }
 0x3f2   : > { %1596 = vmatprep.mubr.f32.mxu1 %v6707_v46 }
 0x3f4   : > { %v1333_v18 = vpop.trf.xlu0  ;;  %v1365_v52 = vpop.trf.xlu1 }
 0x3f5   : > { %4008 = vmatmul.mubr.msk.f32.gmra.mxu1 %vm508_vm1, %v1333_v18 }
 0x3f6   : > { %1602 = vmatprep.mubr.f32.mxu1 %v6707_v46 }
 0x3f8   : > { %v1334_v5 = vpop.trf.xlu0  ;;  %v1366_v34 = vpop.trf.xlu1 }
 0x3f9   : > { %4009 = vmatmul.mubr.msk.f32.gmra.mxu1 %vm508_vm1, %v1334_v5 }
 0x3fa   : > { %1608 = vmatprep.mubr.f32.mxu1 %v6707_v46 }
 0x3fc   : > { %v1335_v27 = vpop.trf.xlu0  ;;  %v1367_v54 = vpop.trf.xlu1 }
 0x3fd   : > { %4010 = vmatmul.mubr.msk.f32.gmra.mxu1 %vm508_vm1, %v1335_v27 }
 0x3fe   : > { %1614 = vmatprep.mubr.f32.mxu1 %v6707_v46 }
 0x400   : > { %v1336_v15 = vpop.trf.xlu0  ;;  %v1368_v21 = vpop.trf.xlu1 }
 0x401   : > { %4011 = vmatmul.mubr.msk.f32.gmra.mxu1 %vm508_vm1, %v1336_v15 }
 0x402   : > { %1620 = vmatprep.mubr.f32.mxu1 %v6707_v46 }
 0x404   : > { %v1337_v8 = vpop.trf.xlu0  ;;  %v1369_v47 = vpop.trf.xlu1 }
 0x405   : > { %4012 = vmatmul.mubr.msk.f32.gmra.mxu1 %vm508_vm1, %v1337_v8 }
 0x406   : > { %1626 = vmatprep.mubr.f32.mxu1 %v6707_v46 }
 0x409   : > { %4013 = vmatmul.mubr.msk.f32.gmra.mxu1 %vm508_vm1, %v1354_v10 }
 0x40a   : > { %1632 = vmatprep.mubr.f32.mxu1 %v6707_v46 }
 0x40d   : > { %4014 = vmatmul.mubr.msk.f32.gmra.mxu1 %vm508_vm1, %v1355_v37 }
 0x40e   : > { %1638 = vmatprep.mubr.f32.mxu1 %v6707_v46 }
 0x411   : > { %4015 = vmatmul.mubr.msk.f32.gmra.mxu1 %vm508_vm1, %v1356_v26 }
 0x412   : > { %1644 = vmatprep.mubr.f32.mxu1 %v6707_v46 }
 0x415   : > { %4016 = vmatmul.mubr.msk.f32.gmra.mxu1 %vm508_vm1, %v1357_v19 }
 0x416   : > { %1650 = vmatprep.mubr.f32.mxu1 %v6707_v46 }
 0x419   : > { %4017 = vmatmul.mubr.msk.f32.gmra.mxu1 %vm508_vm1, %v1358_v11 }
 0x41a   : > { %1656 = vmatprep.mubr.f32.mxu1 %v6707_v46 }
 0x41d   : > { %4018 = vmatmul.mubr.msk.f32.gmra.mxu1 %vm508_vm1, %v1359_v56 }
 0x41e   : > { %1662 = vmatprep.mubr.f32.mxu1 %v6707_v46 }
 0x421   : > { %4019 = vmatmul.mubr.msk.f32.gmra.mxu1 %vm508_vm1, %v1360_v38  ;;  %v6741_v38 = vld [vmem:[#allocation8_spill] sm:$0xff] }
 0x422   : > { %1668 = vmatprep.mubr.f32.mxu1 %v6707_v46 }
 0x425   : > { %4020 = vmatmul.mubr.msk.f32.gmra.mxu1 %vm508_vm1, %v1361_v60 }
 0x426   : > { %1674 = vmatprep.mubr.f32.mxu1 %v6707_v46 }
 0x429   : > { %4021 = vmatmul.mubr.msk.f32.gmra.mxu1 %vm508_vm1, %v1362_v63 }
 0x42a   : > { %1680 = vmatprep.mubr.f32.mxu1 %v6707_v46 }
 0x42d   : > { %4022 = vmatmul.mubr.msk.f32.gmra.mxu1 %vm508_vm1, %v1363_v3 }
 0x42e   : > { %1686 = vmatprep.mubr.f32.mxu1 %v6707_v46 }
 0x431   : > { %4023 = vmatmul.mubr.msk.f32.gmra.mxu1 %vm508_vm1, %v1364_v55 }
 0x432   : > { %1692 = vmatprep.mubr.f32.mxu1 %v6707_v46 }
 0x435   : > { %4024 = vmatmul.mubr.msk.f32.gmra.mxu1 %vm508_vm1, %v1365_v52 }
 0x436   : > { %1698 = vmatprep.mubr.f32.mxu1 %v6707_v46 }
 0x439   : > { %4025 = vmatmul.mubr.msk.f32.gmra.mxu1 %vm508_vm1, %v1366_v34  ;;  %v1287_v1 = vpop.f32.mrf.mxu0  ;;  %v1216_v13 = vpop.f32.mrf.mxu1 }
 0x43a   : > { %1704 = vmatprep.mubr.f32.mxu1 %v6707_v46  ;;  %4239 = vrcp.f32 %v1287_v1 }
 0x43b   : > { %v1289_v41 = vpop.f32.mrf.mxu0  ;;  %v1218_v35 = vpop.f32.mrf.mxu1 }
 0x43c   : > { %4241 = vrcp.f32 %v1289_v41 }
 0x43d   : > { %4026 = vmatmul.mubr.msk.f32.gmra.mxu1 %vm508_vm1, %v1367_v54 }
 0x43e   : > { %1710 = vmatprep.mubr.f32.mxu1 %v6707_v46 }
 0x441   : > { %4027 = vmatmul.mubr.msk.f32.gmra.mxu1 %vm508_vm1, %v1368_v21 }
 0x442   : > { %1716 = vmatprep.mubr.f32.mxu1 %v6707_v46 }
 0x445   : > { %4028 = vmatmul.mubr.msk.f32.gmra.mxu1 %vm508_vm1, %v1369_v47 }
 0x447   : > { %v4240_v30 = vpop.eup %4239 }
 0x448   : > { %v1297_v16 = vrot.slane %v4240_v30, %v5357_v50 }
 0x449   : > { %v4242_v0 = vpop.eup %4241 }
 0x44a   : > { %v1302_v61 = vmul.f32 %v1297_v16, %v1216_v13  ;;  %v1301_v58 = vrot.slane %v4242_v0, %v5357_v50 }
 0x44c   : > { %1304 = vst [vmem:[%s5366_s30] sm:$0xff] %v1302_v61  ;;  %v1303_v6 = vmul.f32 %v1301_v58, %v1218_v35 }
 0x44e   : > { %1305 = vst [vmem:[%s5366_s30 + $0x8] sm:$0xff] %v1303_v6 }
 0x489   : > { %v5371_v29 = vpop.f32.mrf.mxu1 }
 0x48a   : > { %6737 = vst [vmem:[#allocation2_spill] sm:$0xff] %v5371_v29 }
 0x48b   : > { %v5373_v9 = vpop.f32.mrf.mxu1 }
 0x48d   : > { %v5375_v43 = vpop.f32.mrf.mxu1 }
 0x48e   : > { %6738 = vst [vmem:[#allocation3_spill] sm:$0xff] %v5375_v43 }
 0x48f   : > { %v5377_v57 = vpop.f32.mrf.mxu1 }
 0x491   : > { %v5379_v62 = vpop.f32.mrf.mxu1 }
 0x492   : > { %6739 = vst [vmem:[#allocation15_spill] sm:$0xff] %v5379_v62 }
 0x493   : > { %v1546_v23 = vpop.f32.mrf.mxu1 }
 0x495   : > { %v5381_v31 = vpop.f32.mrf.mxu1 }
 0x496   : > { %6740 = vst [vmem:[#allocation23_spill] sm:$0xff] %v5381_v31 }
 0x497   : > { %v5383_v32 = vpop.f32.mrf.mxu1 }
 0x499   : > { %v5385_v12 = vpop.f32.mrf.mxu1 }
 0x49b   : > { %v1558_v25 = vpop.f32.mrf.mxu1 }
 0x49c   : > { %v5453_v58 = vadd.f32 %v1558_v25, %v6741_v38 }
 0x49d   : > { %v5387_v42 = vpop.f32.mrf.mxu1 }
 0x49e   : > { %v1735_v25 = vmax.f32 %v5385_v12, %v5453_v58 }
 0x49f   : > { %v5389_v44 = vpop.f32.mrf.mxu1 }
 0x4a1   : > { %v5391_v28 = vpop.f32.mrf.mxu1 }
 0x4a3   : > { %v1570_v20 = vpop.f32.mrf.mxu1 }
 0x4a4   : > { %v5439_v13 = vadd.f32 %v1570_v20, %v6741_v38 }
 0x4a5   : > { %v5393_v7 = vpop.f32.mrf.mxu1 }
 0x4a6   : > { %v1741_v6 = vmax.f32 %v5391_v28, %v5439_v13 }
 0x4a7   : > { %v1576_v48 = vpop.f32.mrf.mxu1 }
 0x4a9   : > { %v5395_v49 = vpop.f32.mrf.mxu1 }
 0x4ab   : > { %v1582_v10 = vpop.f32.mrf.mxu1 }
 0x4ac   : > { %v5425_v1 = vadd.f32 %v1582_v10, %v6741_v38 }
 0x4ad   : > { %v5397_v53 = vpop.f32.mrf.mxu1 }
 0x4ae   : > { %v1747_v30 = vmax.f32 %v5395_v49, %v5425_v1 }
 0x4af   : > { %v1588_v37 = vpop.f32.mrf.mxu1 }
 0x4b1   : > { %v5399_v24 = vpop.f32.mrf.mxu1 }
 0x4b3   : > { %v1594_v18 = vpop.f32.mrf.mxu1 }
 0x4b4   : > { %v5415_v3 = vadd.f32 %v1594_v18, %v6741_v38 }
 0x4b5   : > { %v5401_v26 = vpop.f32.mrf.mxu1 }
 0x4b6   : > { %v1753_v41 = vmax.f32 %v5399_v24, %v5415_v3 }
 0x4b7   : > { %v1600_v5 = vpop.f32.mrf.mxu1 }
 0x4b8   : > { %v5458_v20 = vadd.f32 %v1600_v5, %v6741_v38 }
 0x4b9   : > { %v5403_v19 = vpop.f32.mrf.mxu1 }
 0x4ba   : > { %v1756_v5 = vmax.f32 %v5401_v26, %v5458_v20 }
 0x4bb   : > { %v1606_v27 = vpop.f32.mrf.mxu1 }
 0x4bc   : > { %v5444_v16 = vadd.f32 %v1606_v27, %v6741_v38 }
 0x4bd   : > { %v5405_v15 = vpop.f32.mrf.mxu1 }
 0x4be   : > { %v1759_v10 = vmax.f32 %v5403_v19, %v5444_v16 }
 0x4bf   : > { %v1612_v11 = vpop.f32.mrf.mxu1 }
 0x4c0   : > { %v5430_v21 = vadd.f32 %v1612_v11, %v6741_v38  ;;  %v5467_v11 = vadd.f32 %v1546_v23, %v6741_v38 }
 0x4c1   : > { %v5407_v8 = vpop.f32.mrf.mxu1 }
 0x4c2   : > { %v1762_v0 = vmax.f32 %v5405_v15, %v5430_v21  ;;  %6745 = vst [vmem:[#allocation25_spill] sm:$0xff] %v5467_v11  ;;  %v1729_v23 = vmax.f32 %v5379_v62, %v5467_v11 }
 0x4c3   : > { %v1618_v56 = vpop.f32.mrf.mxu1 }
 0x4c4   : > { %v5410_v60 = vadd.f32 %v1618_v56, %v6741_v38  ;;  %v5472_v56 = vadd.f32 %v1588_v37, %v6741_v38 }
 0x4c5   : > { %v5412_v63 = vpop.f32.mrf.mxu1 }
 0x4c6   : > { %v1765_v55 = vmax.f32 %v5407_v8, %v5410_v60  ;;  %v1750_v37 = vmax.f32 %v5397_v53, %v5472_v56 }
 0x4c7   : > { %v1624_v52 = vpop.f32.mrf.mxu1 }
 0x4c8   : > { %v5420_v34 = vadd.f32 %v1624_v52, %v6741_v38  ;;  %1766 = vmax.xlane.f32.xlu1 %v1765_v55 }
 0x4c9   : > { %v5422_v54 = vpop.f32.mrf.mxu1 }
 0x4ca   : > { %6742 = vst [vmem:[#allocation14_spill] sm:$0xff] %v5422_v54  ;;  %v1768_v4 = vmax.f32 %v5412_v63, %v5420_v34 }
 0x4cb   : > { %v5434_v22 = vpop.f32.mrf.mxu1 }
 0x4cc   : > { %1769 = vmax.xlane.f32.xlu0 %v1768_v4  ;;  %1754 = vmax.xlane.f32.xlu1 %v1753_v41  ;;  %v5482_v41 = vadd.f32 %v5373_v9, %v6741_v38  ;;  %v5487_v4 = vadd.f32 %v1576_v48, %v6741_v38  ;;  %v5497_v9 = vadd.f32 %v5389_v44, %v6741_v38 }
 0x4cd   : > { %v5436_v47 = vpop.f32.mrf.mxu1  ;;  %v5513_v44 = vadd.f32 %v5377_v57, %v6741_v38 }
 0x4ce   : > { %6743 = vst [vmem:[#allocation24_spill] sm:$0xff] %v5436_v47  ;;  %6746 = vst [vmem:[#allocation12_spill] sm:$0xff] %v5482_v41 }
 0x4cf   : > { %v5448_v35 = vpop.f32.mrf.mxu1  ;;  %6747 = vst [vmem:[#allocation26_spill] sm:$0xff] %v5513_v44 }
 0x4d0   : > { %1763 = vmax.xlane.f32.xlu0 %v1762_v0  ;;  %1748 = vmax.xlane.f32.xlu1 %v1747_v30 }
 0x4d1   : > { %v5450_v61 = vpop.f32.mrf.mxu1 }
 0x4d2   : > { %6744 = vst [vmem:[#allocation13_spill] sm:$0xff] %v5450_v61 }
 0x4d3   : > { %v5462_v18 = vpop.f32.mrf.mxu1 }
 0x4d4   : > { %1760 = vmax.xlane.f32.xlu0 %v1759_v10  ;;  %1742 = vmax.xlane.f32.xlu1 %v1741_v6  ;;  %v1723_v6 = vmax.f32 %v5371_v29, %v5482_v41  ;;  %v1744_v10 = vmax.f32 %v5393_v7, %v5487_v4 }
 0x4d5   : > { %v5464_v27 = vpop.f32.mrf.mxu1 }
 0x4d7   : > { %v5476_v55 = vpop.f32.mrf.mxu1 }
 0x4d8   : > { %1757 = vmax.xlane.f32.xlu0 %v1756_v5  ;;  %1736 = vmax.xlane.f32.xlu1 %v1735_v25  ;;  %v5505_v5 = vadd.f32 %v5383_v32, %v6741_v38  ;;  %v1726_v32 = vmax.f32 %v5375_v43, %v5513_v44 }
 0x4d9   : > { %v5478_v52 = vpop.f32.mrf.mxu1 }
 0x4db   : > { %v1654_v30 = vpop.f32.mrf.mxu1 }
 0x4dc   : > { %1751 = vmax.xlane.f32.xlu0 %v1750_v37  ;;  %1730 = vmax.xlane.f32.xlu1 %v1729_v23  ;;  %v1738_v23 = vmax.f32 %v5387_v42, %v5497_v9 }
 0x4dd   : > { %v5491_v0 = vpop.f32.mrf.mxu1 }
 0x4df   : > { %v1660_v48 = vpop.f32.mrf.mxu1 }
 0x4e0   : > { %1745 = vmax.xlane.f32.xlu0 %v1744_v10  ;;  %1724 = vmax.xlane.f32.xlu1 %v1723_v6  ;;  %v1732_v6 = vmax.f32 %v5381_v31, %v5505_v5 }
 0x4e1   : > { %v5501_v25 = vpop.f32.mrf.mxu1 }
 0x4e3   : > { %v1666_v37 = vpop.f32.mrf.mxu1 }
 0x4e4   : > { %1739 = vmax.xlane.f32.xlu0 %v1738_v23 }
 0x4e5   : > { %v5509_v39 = vpop.f32.mrf.mxu1 }
 0x4e7   : > { %v1672_v10 = vpop.f32.mrf.mxu1 }
 0x4e8   : > { %1733 = vmax.xlane.f32.xlu0 %v1732_v6 }
 0x4e9   : > { %v5517_v33 = vpop.f32.mrf.mxu1 }
 0x4eb   : > { %v1678_v14 = vpop.f32.mrf.mxu1 }
 0x4ec   : > { %1727 = vmax.xlane.f32.xlu0 %v1726_v32 }
 0x4ed   : > { %v5521_v2 = vpop.f32.mrf.mxu1 }
 0x4ef   : > { %v1684_v23 = vpop.f32.mrf.mxu1 }
 0x4f1   : > { %v5523_v51 = vpop.f32.mrf.mxu1 }
 0x4f3   : > { %v1690_v45 = vpop.f32.mrf.mxu1 }
 0x4f4   : > { %v5547_v11 = vadd.f32 %v1690_v45, %v6741_v38 }
 0x4f5   : > { %v5525_v57 = vpop.f32.mrf.mxu1 }
 0x4f7   : > { %v1696_v50 = vpop.f32.mrf.mxu1 }
 0x4f8   : > { %v5562_v45 = vadd.f32 %v1696_v50, %v6741_v38  ;;  %v5577_v50 = vadd.f32 %v1654_v30, %v6741_v38  ;;  %v5593_v30 = vadd.f32 %v1660_v48, %v6741_v38  ;;  %v5607_v48 = vadd.f32 %v5448_v35, %v6741_v38  ;;  %v193_v35 = vld [vmem:[%s6596_s2 + $0x10] sm:$0xff] }
 0x4f9   : > { %v5527_v46 = vpop.f32.mrf.mxu1 }
 0x4fa   : > { %6750 = vst [vmem:[#allocation9_spill] sm:$0xff] %v5607_v48 }
 0x4fb   : > { %v1702_v59 = vpop.f32.mrf.mxu1 }
 0x4fc   : > { %v5539_v41 = vadd.f32 %v1702_v59, %v6741_v38 }
 0x4fd   : > { %v5529_v6 = vpop.f32.mrf.mxu1 }
 0x4ff   : > { %v1708_v40 = vpop.f32.mrf.mxu1 }
 0x500   : > { %v5552_v31 = vadd.f32 %v1708_v40, %v6741_v38  ;;  %v5567_v40 = vadd.f32 %v1666_v37, %v6741_v38  ;;  %v5582_v37 = vadd.f32 %v1672_v10, %v6741_v38 }
 0x501   : > { %v5531_v36 = vpop.f32.mrf.mxu1 }
 0x502   : > { %6748 = vst [vmem:[#allocation11_spill] sm:$0xff] %v5531_v36 }
 0x503   : > { %v1714_v17 = vpop.f32.mrf.mxu1 }
 0x504   : > { %v5534_v32 = vadd.f32 %v1714_v17, %v6741_v38  ;;  %v1807_v17 = vmax.f32 %v5527_v46, %v5539_v41 }
 0x505   : > { %v5536_v29 = vpop.f32.mrf.mxu1 }
 0x506   : > { %v1813_v43 = vmax.f32 %v5531_v36, %v5534_v32  ;;  %v5557_v36 = vadd.f32 %v1678_v14, %v6741_v38  ;;  %v5572_v14 = vadd.f32 %v1684_v23, %v6741_v38  ;;  %v5588_v23 = vadd.f32 %v5462_v18, %v6741_v38 }
 0x507   : > { %v1720_v44 = vpop.f32.mrf.mxu1  ;;  %v1786_v18 = vmax.f32 %v5491_v0, %v5593_v30 }
 0x508   : > { %v5544_v62 = vadd.f32 %v1720_v44, %v6741_v38  ;;  %1814 = vmax.xlane.f32.xlu1 %v1813_v43  ;;  %v1801_v43 = vmax.f32 %v5523_v51, %v5547_v11  ;;  %v1810_v44 = vmax.f32 %v5529_v6, %v5552_v31  ;;  %6749 = vst [vmem:[#allocation10_spill] sm:$0xff] %v5588_v23 }
 0x509   : > { %v1777_v10 = vmax.f32 %v5450_v61, %v5588_v23 }
 0x50a   : > { %v1816_v59 = vmax.f32 %v5536_v29, %v5544_v62 }
 0x50c   : > { %1808 = vmax.xlane.f32.xlu1 %v1807_v17  ;;  %1817 = vmax.xlane.f32.xlu0 %v1816_v59  ;;  %v1795_v17 = vmax.f32 %v5517_v33, %v5557_v36  ;;  %v1804_v59 = vmax.f32 %v5525_v57, %v5562_v45 }
 0x510   : > { %1802 = vmax.xlane.f32.xlu1 %v1801_v43  ;;  %1811 = vmax.xlane.f32.xlu0 %v1810_v44  ;;  %v1789_v43 = vmax.f32 %v5501_v25, %v5567_v40  ;;  %v1798_v44 = vmax.f32 %v5521_v2, %v5572_v14 }
 0x514   : > { %1796 = vmax.xlane.f32.xlu1 %v1795_v17  ;;  %1805 = vmax.xlane.f32.xlu0 %v1804_v59  ;;  %v1783_v17 = vmax.f32 %v5478_v52, %v5577_v50  ;;  %v1792_v59 = vmax.f32 %v5509_v39, %v5582_v37 }
 0x518   : > { %1790 = vmax.xlane.f32.xlu1 %v1789_v43  ;;  %1799 = vmax.xlane.f32.xlu0 %v1798_v44  ;;  %v5601_v43 = vadd.f32 %v5476_v55, %v6741_v38  ;;  %v1774_v55 = vmax.f32 %v5436_v47, %v5607_v48 }
 0x51a   : > { %v1780_v44 = vmax.f32 %v5464_v27, %v5601_v43 }
 0x51c   : > { %1784 = vmax.xlane.f32.xlu1 %v1783_v17  ;;  %1793 = vmax.xlane.f32.xlu0 %v1792_v59  ;;  %v5613_v17 = vadd.f32 %v5434_v22, %v6741_v38  ;;  %v200_v22 = vld [vmem:[%s6596_s2 + $0x48] sm:$0xff] }
 0x51e   : > { %6751 = vst [vmem:[#allocation27_spill] sm:$0xff] %v5613_v17  ;;  %v1771_v59 = vmax.f32 %v5422_v54, %v5613_v17 }
 0x520   : > { %1778 = vmax.xlane.f32.xlu1 %v1777_v10  ;;  %1787 = vmax.xlane.f32.xlu0 %v1786_v18  ;;  %v197_v10 = vld [vmem:[%s6596_s2 + $0x30] sm:$0xff] }
 0x524   : > { %1781 = vmax.xlane.f32.xlu0 %v1780_v44 }
 0x528   : > { %1775 = vmax.xlane.f32.xlu0 %v1774_v55 }
 0x52c   : > { %1772 = vmax.xlane.f32.xlu0 %v1771_v59 }
 0x531   : > { %215 = vperm.xlu1 %4110, %v193_v35  }
 0x535   : > { %235 = vperm.xlu1 %4110, %v197_v10  }
 0x542   : > { %250 = vperm.xlu0 %4109, %v200_v22  }
 0x551   : > { %v1767_v18 = vpop.xlane.xlu1 %1766 }
 0x552   : > { %v1848_v44 = vsub.f32 %v5410_v60, %v1767_v18  ;;  %v1847_v35 = vsub.f32 %v5407_v8, %v1767_v18 }
 0x554   : > { %v1941_v47 = vmul.f32 1.442695, %v1848_v44  ;;  %v1939_v61 = vmul.f32 1.442695, %v1847_v35 }
 0x555   : > { %v1770_v55 = vpop.xlane.xlu0 %1769  ;;  %v1755_v44 = vpop.xlane.xlu1 %1754 }
 0x556   : > { %v1849_v59 = vsub.f32 %v5412_v63, %v1770_v55  ;;  %v1850_v38 = vsub.f32 %v5420_v34, %v1770_v55  ;;  %v1839_v55 = vsub.f32 %v5399_v24, %v1755_v44 }
 0x558   : > { %v1943_v54 = vmul.f32 1.442695, %v1849_v59  ;;  %v1945_v17 = vmul.f32 1.442695, %v1850_v38 }
 0x559   : > { %v1764_v48 = vpop.xlane.xlu0 %1763  ;;  %v1749_v35 = vpop.xlane.xlu1 %1748 }
 0x55a   : > { %4243 = vpow2.f32 %v1943_v54  ;;  %v1846_v10 = vsub.f32 %v5430_v21, %v1764_v48  ;;  %v1845_v22 = vsub.f32 %v5405_v15, %v1764_v48  ;;  %v1840_v15 = vsub.f32 %v5415_v3, %v1755_v44 }
 0x55b   : > { %4245 = vpow2.f32 %v1945_v17  ;;  %v1836_v24 = vsub.f32 %v5425_v1, %v1749_v35 }
 0x55c   : > { %4247 = vpow2.f32 %v1941_v47  ;;  %v1937_v60 = vmul.f32 1.442695, %v1846_v10  ;;  %v1935_v34 = vmul.f32 1.442695, %v1845_v22 }
 0x55d   : > { %v1761_v23 = vpop.xlane.xlu0 %1760  ;;  %4249 = vpow2.f32 %v1939_v61  ;;  %v1743_v44 = vpop.xlane.xlu1 %1742 }
 0x55e   : > { %v1844_v63 = vsub.f32 %v5444_v16, %v1761_v23  ;;  %v1843_v8 = vsub.f32 %v5403_v19, %v1761_v23  ;;  %4251 = vpow2.f32 %v1937_v60  ;;  %v1925_v23 = vmul.f32 1.442695, %v1840_v15 }
 0x55f   : > { %4253 = vpow2.f32 %v1935_v34 }
 0x560   : > { %v1933_v38 = vmul.f32 1.442695, %v1844_v63  ;;  %v1931_v21 = vmul.f32 1.442695, %v1843_v8 }
 0x561   : > { %v1758_v18 = vpop.xlane.xlu0 %1757 }
 0x562   : > { %v1842_v54 = vsub.f32 %v5458_v20, %v1758_v18  ;;  %v1841_v17 = vsub.f32 %v5401_v26, %v1758_v18  ;;  %4255 = vpow2.f32 %v1933_v38  ;;  %v1923_v26 = vmul.f32 1.442695, %v1839_v55 }
 0x563   : > { %4257 = vpow2.f32 %v1931_v21  ;;  %v1917_v38 = vmul.f32 1.442695, %v1836_v24 }
 0x564   : > { %v1929_v47 = vmul.f32 1.442695, %v1842_v54  ;;  %v1927_v19 = vmul.f32 1.442695, %v1841_v17 }
 0x565   : > { %v1752_v48 = vpop.xlane.xlu0 %1751 }
 0x566   : > { %4259 = vpow2.f32 %v1929_v47  ;;  %v1838_v59 = vsub.f32 %v5472_v56, %v1752_v48  ;;  %v1837_v3 = vsub.f32 %v5397_v53, %v1752_v48  ;;  %v1835_v56 = vsub.f32 %v5395_v49, %v1749_v35 }
 0x567   : > { %v4244_v16 = vpop.eup %4243  ;;  %4261 = vpow2.f32 %v1927_v19  ;;  %v1832_v49 = vsub.f32 %v5439_v13, %v1743_v44  ;;  %v1737_v19 = vpop.xlane.xlu1 %1736 }
 0x568   : > { %v4246_v61 = vpop.eup %4245  ;;  %4263 = vpow2.f32 %v1925_v23  ;;  %v1921_v22 = vmul.f32 1.442695, %v1838_v59  ;;  %v1919_v34 = vmul.f32 1.442695, %v1837_v3  ;;  %v1915_v1 = vmul.f32 1.442695, %v1835_v56 }
 0x569   : > { %2011 = vmatprep.subr.mxu1 %v4246_v61  ;;  %2082 = vmatprep.subr.mxu0 %v4246_v61  ;;  %v4248_v20 = vpop.eup %4247  ;;  %v1746_v63 = vpop.xlane.xlu0 %1745  ;;  %4265 = vpow2.f32 %v1923_v26  ;;  %v1909_v61 = vmul.f32 1.442695, %v1832_v49  ;;  %v6755_v49 = vld [vmem:[#allocation26_spill] sm:$0xff] }
 0x56a   : > { %2012 = vmatpush1.xpose.msra.mxu1 %v4244_v16  ;;  %2083 = vmatpush1.xpose.msra.mxu0 %v4244_v16  ;;  %v4250_v10 = vpop.eup %4249  ;;  %4267 = vpow2.f32 %v1921_v22  ;;  %v1834_v53 = vsub.f32 %v5487_v4, %v1746_v63  ;;  %v1833_v54 = vsub.f32 %v5393_v7, %v1746_v63  ;;  %v1831_v4 = vsub.f32 %v5391_v28, %v1743_v44  ;;  %v6752_v63 = vld [vmem:[#allocation23_spill] sm:$0xff] }
 0x56b   : > { %2013 = vmatprep.subr.mxu1 %v4248_v20  ;;  %2084 = vmatprep.subr.mxu0 %v4248_v20  ;;  %v4252_v60 = vpop.eup %4251  ;;  %4269 = vpow2.f32 %v1919_v34  ;;  %v1828_v28 = vsub.f32 %v5453_v58, %v1737_v19 }
 0x56c   : > { %v4254_v8 = vpop.eup %4253  ;;  %4271 = vpow2.f32 %v1917_v38  ;;  %v1913_v17 = vmul.f32 1.442695, %v1834_v53  ;;  %v1911_v48 = vmul.f32 1.442695, %v1833_v54  ;;  %v1907_v13 = vmul.f32 1.442695, %v1831_v4 }
 0x56d   : > { %v1740_v47 = vpop.xlane.xlu0 %1739  ;;  %4273 = vpow2.f32 %v1915_v1  ;;  %v1901_v24 = vmul.f32 1.442695, %v1828_v28 }
 0x56e   : > { %2014 = vmatpush1.xpose.msra.mxu1 %v4250_v10  ;;  %2085 = vmatpush1.xpose.msra.mxu0 %v4250_v10  ;;  %4275 = vpow2.f32 %v1913_v17  ;;  %v1830_v7 = vsub.f32 %v5497_v9, %v1740_v47  ;;  %v1829_v23 = vsub.f32 %v5387_v42, %v1740_v47  ;;  %v1827_v9 = vsub.f32 %v5385_v12, %v1737_v19 }
 0x56f   : > { %2015 = vmatprep.subr.mxu1 %v4252_v60  ;;  %2086 = vmatprep.subr.mxu0 %v4252_v60  ;;  %v4256_v18 = vpop.eup %4255  ;;  %4277 = vpow2.f32 %v1911_v48  ;;  %v1731_v60 = vpop.xlane.xlu1 %1730  ;;  %v6756_v48 = vld [vmem:[#allocation3_spill] sm:$0xff] }
 0x570   : > { %v4258_v21 = vpop.eup %4257  ;;  %4279 = vpow2.f32 %v1909_v61  ;;  %v1905_v20 = vmul.f32 1.442695, %v1830_v7  ;;  %v1903_v3 = vmul.f32 1.442695, %v1829_v23  ;;  %v1899_v58 = vmul.f32 1.442695, %v1827_v9 }
 0x571   : > { %v1734_v26 = vpop.xlane.xlu0 %1733  ;;  %4281 = vpow2.f32 %v1907_v13  ;;  %v6757_v7 = vld [vmem:[#allocation12_spill] sm:$0xff]  ;;  %v6758_v23 = vld [vmem:[#allocation2_spill] sm:$0xff] }
 0x572   : > { %2016 = vmatpush1.xpose.msra.mxu1 %v4254_v8  ;;  %2087 = vmatpush1.xpose.msra.mxu0 %v4254_v8  ;;  %4283 = vpow2.f32 %v1905_v20  ;;  %v1826_v42 = vsub.f32 %v5505_v5, %v1734_v26  ;;  %v1825_v56 = vsub.f32 %v6752_v63, %v1734_v26  ;;  %v6753_v8 = vld [vmem:[#allocation25_spill] sm:$0xff]  ;;  %v6754_v5 = vld [vmem:[#allocation15_spill] sm:$0xff] }
 0x573   : > { %2017 = vmatprep.subr.mxu1 %v4256_v18  ;;  %2088 = vmatprep.subr.mxu0 %v4256_v18  ;;  %v4260_v15 = vpop.eup %4259  ;;  %4285 = vpow2.f32 %v1903_v3  ;;  %v1824_v12 = vsub.f32 %v6753_v8, %v1731_v60  ;;  %v1823_v44 = vsub.f32 %v6754_v5, %v1731_v60  ;;  %v1725_v47 = vpop.xlane.xlu1 %1724 }
 0x574   : > { %v4262_v16 = vpop.eup %4261  ;;  %4287 = vpow2.f32 %v1901_v24  ;;  %v1897_v38 = vmul.f32 1.442695, %v1826_v42  ;;  %v1895_v1 = vmul.f32 1.442695, %v1825_v56  ;;  %v6759_v56 = vld [vmem:[#allocation11_spill] sm:$0xff] }
 0x575   : > { %v4264_v55 = vpop.eup %4263  ;;  %v1728_v18 = vpop.xlane.xlu0 %1727  ;;  %4289 = vpow2.f32 %v1899_v58  ;;  %v1891_v4 = vmul.f32 1.442695, %v1823_v44 }
 0x576   : > { %2018 = vmatpush1.xpose.msra.mxu1 %v4258_v21  ;;  %2089 = vmatpush1.xpose.msra.mxu0 %v4258_v21  ;;  %v4266_v59 = vpop.eup %4265  ;;  %v1893_v21 = vmul.f32 1.442695, %v1824_v12  ;;  %4291 = vpow2.f32 %v1897_v38  ;;  %v1822_v17 = vsub.f32 %v6755_v49, %v1728_v18 }
 0x577   : > { %2019 = vmatprep.subr.mxu1 %v4260_v15  ;;  %2090 = vmatprep.subr.mxu0 %v4260_v15  ;;  %v4268_v35 = vpop.eup %4267  ;;  %4293 = vpow2.f32 %v1895_v1 }
 0x578   : > { %v4270_v10 = vpop.eup %4269  ;;  %4295 = vpow2.f32 %v1893_v21  ;;  %v1889_v19 = vmul.f32 1.442695, %v1822_v17 }
 0x579   : > { %v4272_v22 = vpop.eup %4271  ;;  %4297 = vpow2.f32 %v1891_v4 }
 0x57a   : > { %2020 = vmatpush1.xpose.msra.mxu1 %v4262_v16  ;;  %2091 = vmatpush1.xpose.msra.mxu0 %v4262_v16  ;;  %v4274_v34 = vpop.eup %4273  ;;  %v1821_v16 = vsub.f32 %v6756_v48, %v1728_v18  ;;  %4299 = vpow2.f32 %v1889_v19 }
 0x57b   : > { %2021 = vmatprep.subr.mxu1 %v4264_v55  ;;  %2092 = vmatprep.subr.mxu0 %v4264_v55  ;;  %v4276_v53 = vpop.eup %4275  ;;  %v1820_v55 = vsub.f32 %v6757_v7, %v1725_v47 }
 0x57c   : > { %v4278_v54 = vpop.eup %4277  ;;  %v1887_v28 = vmul.f32 1.442695, %v1821_v16 }
 0x57d   : > { %v4280_v15 = vpop.eup %4279 }
 0x57e   : > { %2022 = vmatpush1.xpose.msra.mxu1 %v4266_v59  ;;  %2093 = vmatpush1.xpose.msra.mxu0 %v4266_v59  ;;  %v4282_v61 = vpop.eup %4281  ;;  %v1819_v59 = vsub.f32 %v6758_v23, %v1725_v47  ;;  %4301 = vpow2.f32 %v1887_v28 }
 0x57f   : > { %2023 = vmatprep.subr.mxu1 %v4268_v35  ;;  %2094 = vmatprep.subr.mxu0 %v4268_v35  ;;  %v4284_v13 = vpop.eup %4283  ;;  %v1885_v35 = vmul.f32 1.442695, %v1820_v55 }
 0x580   : > { %v4286_v20 = vpop.eup %4285  ;;  %v1883_v3 = vmul.f32 1.442695, %v1819_v59 }
 0x581   : > { %v4288_v9 = vpop.eup %4287  ;;  %4303 = vpow2.f32 %v1885_v35 }
 0x582   : > { %2024 = vmatpush1.xpose.msra.mxu1 %v4270_v10  ;;  %2095 = vmatpush1.xpose.msra.mxu0 %v4270_v10  ;;  %v4290_v10 = vpop.eup %4289  ;;  %4305 = vpow2.f32 %v1883_v3 }
 0x583   : > { %2025 = vmatprep.subr.mxu1 %v4272_v22  ;;  %2096 = vmatprep.subr.mxu0 %v4272_v22  ;;  %v4292_v60 = vpop.eup %4291 }
 0x584   : > { %v4294_v38 = vpop.eup %4293 }
 0x585   : > { %v4296_v5 = vpop.eup %4295 }
 0x586   : > { %2026 = vmatpush1.xpose.msra.mxu1 %v4274_v34  ;;  %2097 = vmatpush1.xpose.msra.mxu0 %v4274_v34  ;;  %v4298_v1 = vpop.eup %4297 }
 0x587   : > { %2027 = vmatprep.subr.mxu1 %v4276_v53  ;;  %2098 = vmatprep.subr.mxu0 %v4276_v53 }
 0x58a   : > { %2028 = vmatpush1.xpose.msra.mxu1 %v4278_v54  ;;  %2099 = vmatpush1.xpose.msra.mxu0 %v4278_v54 }
 0x58b   : > { %2029 = vmatprep.subr.mxu1 %v4280_v15  ;;  %2100 = vmatprep.subr.mxu0 %v4280_v15  ;;  %v4300_v15 = vpop.eup %4299 }
 0x58c   : > { %v4302_v4 = vpop.eup %4301 }
 0x58e   : > { %2030 = vmatpush1.xpose.msra.mxu1 %v4282_v61  ;;  %2101 = vmatpush1.xpose.msra.mxu0 %v4282_v61  ;;  %v4304_v61 = vpop.eup %4303 }
 0x58f   : > { %2031 = vmatprep.subr.mxu1 %v4284_v13  ;;  %2102 = vmatprep.subr.mxu0 %v4284_v13  ;;  %v4306_v19 = vpop.eup %4305 }
 0x591   : > { %v1815_v26 = vpop.xlane.xlu1 %1814 }
 0x592   : > { %2032 = vmatpush1.xpose.msra.mxu1 %v4286_v20  ;;  %2103 = vmatpush1.xpose.msra.mxu0 %v4286_v20  ;;  %v1880_v24 = vsub.f32 %v5534_v32, %v1815_v26  ;;  %v1879_v34 = vsub.f32 %v6759_v56, %v1815_v26 }
 0x593   : > { %2033 = vmatprep.subr.mxu1 %v4288_v9  ;;  %2104 = vmatprep.subr.mxu0 %v4288_v9 }
 0x594   : > { %v2005_v53 = vmul.f32 1.442695, %v1880_v24 }
 0x595   : > { %v1818_v42 = vpop.xlane.xlu0 %1817  ;;  %v1809_v22 = vpop.xlane.xlu1 %1808 }
 0x596   : > { %v1881_v58 = vsub.f32 %v5536_v29, %v1818_v42  ;;  %v1882_v63 = vsub.f32 %v5544_v62, %v1818_v42  ;;  %2034 = vmatpush1.xpose.msra.mxu1 %v4290_v10  ;;  %2105 = vmatpush1.xpose.msra.mxu0 %v4290_v10  ;;  %v2003_v62 = vmul.f32 1.442695, %v1879_v34  ;;  %v1876_v54 = vsub.f32 %v5539_v41, %v1809_v22  ;;  %v6761_v34 = vld [vmem:[#allocation5_spill] sm:$0xff] }
 0x597   : > { %2035 = vmatprep.subr.mxu1 %v4292_v60  ;;  %2106 = vmatprep.subr.mxu0 %v4292_v60 }
 0x598   : > { %v2007_v8 = vmul.f32 1.442695, %v1881_v58  ;;  %v2009_v12 = vmul.f32 1.442695, %v1882_v63  ;;  %v1997_v48 = vmul.f32 1.442695, %v1876_v54 }
 0x599   : > { %v1812_v18 = vpop.xlane.xlu0 %1811  ;;  %v5664_v32 = vpop.xlane.xlu1 %1802  ;;  %v6760_v63 = vld [vmem:[#allocation4_spill] sm:$0xff] }
 0x59a   : > { %4307 = vpow2.f32 %v2007_v8  ;;  %v1878_v29 = vsub.f32 %v5552_v31, %v1812_v18  ;;  %2036 = vmatpush1.xpose.msra.mxu1 %v4294_v38  ;;  %2107 = vmatpush1.xpose.msra.mxu0 %v4294_v38  ;;  %v1877_v44 = vsub.f32 %v5529_v6, %v1812_v18  ;;  %v1875_v31 = vsub.f32 %v5527_v46, %v1809_v22 }
 0x59b   : > { %4309 = vpow2.f32 %v2009_v12  ;;  %2037 = vmatprep.subr.mxu1 %v4296_v5  ;;  %2108 = vmatprep.subr.mxu0 %v4296_v5  ;;  %v1872_v46 = vsub.f32 %v5547_v11, %v5664_v32  ;;  %v1871_v20 = vsub.f32 %v5523_v51, %v5664_v32 }
 0x59c   : > { %4311 = vpow2.f32 %v2005_v53  ;;  %v2001_v21 = vmul.f32 1.442695, %v1878_v29  ;;  %v1999_v47 = vmul.f32 1.442695, %v1877_v44  ;;  %v1995_v7 = vmul.f32 1.442695, %v1875_v31 }
 0x59d   : > { %v1806_v49 = vpop.xlane.xlu0 %1805  ;;  %v5669_v17 = vpop.xlane.xlu1 %1796  ;;  %4313 = vpow2.f32 %v2003_v62  ;;  %v1987_v10 = vmul.f32 1.442695, %v1871_v20 }
 0x59e   : > { %2038 = vmatpush1.xpose.msra.mxu1 %v4298_v1  ;;  %2109 = vmatpush1.xpose.msra.mxu0 %v4298_v1  ;;  %4315 = vpow2.f32 %v2001_v21  ;;  %v1874_v6 = vsub.f32 %v5562_v45, %v1806_v49  ;;  %v1873_v55 = vsub.f32 %v5525_v57, %v1806_v49  ;;  %v1989_v57 = vmul.f32 1.442695, %v1872_v46 }
 0x59f   : > { %2039 = vmatprep.subr.mxu1 %v4300_v15  ;;  %2110 = vmatprep.subr.mxu0 %v4300_v15  ;;  %4317 = vpow2.f32 %v1999_v47 }
 0x5a0   : > { %4319 = vpow2.f32 %v1997_v48  ;;  %v1993_v13 = vmul.f32 1.442695, %v1874_v6  ;;  %v1991_v35 = vmul.f32 1.442695, %v1873_v55  ;;  %v6762_v6 = vld [vmem:[#allocation20_spill] sm:$0xff] }
 0x5a1   : > { %v1800_v16 = vpop.xlane.xlu0 %1799  ;;  %v5673_v41 = vpop.xlane.xlu1 %1790  ;;  %4321 = vpow2.f32 %v1995_v7 }
 0x5a2   : > { %2040 = vmatpush1.xpose.msra.mxu1 %v4302_v4  ;;  %2111 = vmatpush1.xpose.msra.mxu0 %v4302_v4  ;;  %4323 = vpow2.f32 %v1993_v13  ;;  %v1870_v26 = vsub.f32 %v5572_v14, %v1800_v16  ;;  %v1869_v51 = vsub.f32 %v5521_v2, %v1800_v16  ;;  %v1868_v14 = vsub.f32 %v5557_v36, %v5669_v17 }
 0x5a3   : > { %2041 = vmatprep.subr.mxu1 %v4304_v61  ;;  %2112 = vmatprep.subr.mxu0 %v4304_v61  ;;  %4325 = vpow2.f32 %v1991_v35  ;;  %v1867_v2 = vsub.f32 %v5517_v33, %v5669_v17  ;;  %v1864_v62 = vsub.f32 %v5567_v40, %v5673_v41  ;;  %v1863_v1 = vsub.f32 %v5501_v25, %v5673_v41 }
 0x5a4   : > { %4327 = vpow2.f32 %v1989_v57  ;;  %v1985_v42 = vmul.f32 1.442695, %v1870_v26  ;;  %v1983_v12 = vmul.f32 1.442695, %v1869_v51  ;;  %v1981_v38 = vmul.f32 1.442695, %v1868_v14 }
 0x5a5   : > { %v5678_v23 = vpop.xlane.xlu0 %1793  ;;  %v5680_v45 = vpop.xlane.xlu1 %1784  ;;  %4329 = vpow2.f32 %v1987_v10  ;;  %v1979_v5 = vmul.f32 1.442695, %v1867_v2  ;;  %v1973_v49 = vmul.f32 1.442695, %v1864_v62  ;;  %v1971_v15 = vmul.f32 1.442695, %v1863_v1 }
 0x5a6   : > { %2042 = vmatpush1.xpose.msra.mxu1 %v4306_v19  ;;  %2113 = vmatpush1.xpose.msra.mxu0 %v4306_v19  ;;  %4331 = vpow2.f32 %v1985_v42  ;;  %v1866_v53 = vsub.f32 %v5582_v37, %v5678_v23  ;;  %v1865_v33 = vsub.f32 %v5509_v39, %v5678_v23  ;;  %v1860_v47 = vsub.f32 %v5577_v50, %v5680_v45  ;;  %v6766_v10 = vld [vmem:[#allocation24_spill] sm:$0xff]  ;;  %v6767_v14 = vld [vmem:[#allocation27_spill] sm:$0xff]  ;;  %v6770_v1 = vld [vmem:[#allocation21_spill] sm:$0xff] }
 0x5a7   : > { %v4308_v59 = vpop.eup %4307  ;;  %4333 = vpow2.f32 %v1983_v12 }
 0x5a8   : > { %v4310_v28 = vpop.eup %4309  ;;  %4335 = vpow2.f32 %v1981_v38  ;;  %v1977_v44 = vmul.f32 1.442695, %v1866_v53  ;;  %v1975_v54 = vmul.f32 1.442695, %v1865_v33  ;;  %v1965_v7 = vmul.f32 1.442695, %v1860_v47 }
 0x5a9   : > { %2043 = vmatprep.subr.mxu1 %v4310_v28  ;;  %2114 = vmatprep.subr.mxu0 %v4310_v28  ;;  %v5685_v11 = vpop.xlane.xlu0 %1787  ;;  %v5687_v9 = vpop.xlane.xlu1 %1778  ;;  %4337 = vpow2.f32 %v1979_v5 }
 0x5aa   : > { %v4312_v3 = vpop.eup %4311  ;;  %2044 = vmatpush2.xpose.msra.mxu1 %v4308_v59  ;;  %2115 = vmatpush2.xpose.msra.mxu0 %v4308_v59  ;;  %4339 = vpow2.f32 %v1977_v44  ;;  %v1862_v39 = vsub.f32 %v5593_v30, %v5685_v11  ;;  %v1861_v31 = vsub.f32 %v5491_v0, %v5685_v11  ;;  %v1859_v0 = vsub.f32 %v5478_v52, %v5680_v45  ;;  %v6763_v52 = vld [vmem:[#allocation10_spill] sm:$0xff]  ;;  %v6769_v44 = vld [vmem:[#allocation29_spill] sm:$0xff] }
 0x5ab   : > { %2045 = vmatprep.subr.mxu1 %v4312_v3  ;;  %2116 = vmatprep.subr.mxu0 %v4312_v3  ;;  %v4314_v24 = vpop.eup %4313  ;;  %4341 = vpow2.f32 %v1975_v54  ;;  %v1856_v23 = vsub.f32 %v6763_v52, %v5687_v9 }
 0x5ac   : > { %v4316_v58 = vpop.eup %4315  ;;  %4343 = vpow2.f32 %v1973_v49  ;;  %v1969_v4 = vmul.f32 1.442695, %v1862_v39  ;;  %v1967_v41 = vmul.f32 1.442695, %v1861_v31  ;;  %v1963_v19 = vmul.f32 1.442695, %v1859_v0 }
 0x5ad   : > { %v5692_v22 = vpop.xlane.xlu0 %1781  ;;  %v216_v60 = vpop.permute.xlu1 %215  ;;  %4345 = vpow2.f32 %v1971_v15  ;;  %v1957_v57 = vmul.f32 1.442695, %v1856_v23  ;;  %v6772_v39 = vmov 1.0  }
 0x5ae   : > { %2046 = vmatpush2.xpose.msra.mxu1 %v4314_v24  ;;  %2117 = vmatpush2.xpose.msra.mxu0 %v4314_v24  ;;  %v379_v56 = vadd.f32 %v6760_v63, %v216_v60  ;;  %v381_v8 = vadd.f32 %v6761_v34, %v216_v60  ;;  %v4318_v36 = vpop.eup %4317  ;;  %4347 = vpow2.f32 %v1969_v4  ;;  %v1858_v50 = vsub.f32 %v5601_v43, %v5692_v22  ;;  %v6764_v43 = vld [vmem:[#allocation13_spill] sm:$0xff] }
 0x5af   : > { %2047 = vmatprep.subr.mxu1 %v4316_v58  ;;  %2118 = vmatprep.subr.mxu0 %v4316_v58  ;;  %v4320_v18 = vpop.eup %4319  ;;  %4349 = vpow2.f32 %v1967_v41  ;;  %v1857_v46 = vsub.f32 %v5464_v27, %v5692_v22  ;;  %v1855_v28 = vsub.f32 %v6764_v43, %v5687_v9  ;;  %v6765_v27 = vld [vmem:[#allocation9_spill] sm:$0xff]  ;;  %v6768_v58 = vld [vmem:[#allocation14_spill] sm:$0xff] }
 0x5b0   : > { %2167 = vxpose.xlu1.b32.start.end [1/1] (short) %v379_v56, 128  ;;  %2199 = vxpose.xlu0.b32.start.end [1/1] (short) %v381_v8, 128  ;;  %v4322_v29 = vpop.eup %4321  ;;  %4351 = vpow2.f32 %v1965_v7  ;;  %v1961_v45 = vmul.f32 1.442695, %v1858_v50 }
 0x5b1   : > { %v5700_v32 = vpop.xlane.xlu0 %1775  ;;  %v4324_v37 = vpop.eup %4323  ;;  %4353 = vpow2.f32 %v1963_v19  ;;  %v1959_v20 = vmul.f32 1.442695, %v1857_v46  ;;  %v1955_v3 = vmul.f32 1.442695, %v1855_v28 }
 0x5b2   : > { %2048 = vmatpush2.xpose.msra.mxu1 %v4318_v36  ;;  %2119 = vmatpush2.xpose.msra.mxu0 %v4318_v36  ;;  %v4326_v21 = vpop.eup %4325  ;;  %4355 = vpow2.f32 %v1961_v45  ;;  %v1854_v26 = vsub.f32 %v6765_v27, %v5700_v32  ;;  %v1853_v51 = vsub.f32 %v6766_v10, %v5700_v32 }
 0x5b3   : > { %2049 = vmatprep.subr.mxu1 %v4320_v18  ;;  %2120 = vmatprep.subr.mxu0 %v4320_v18  ;;  %v4328_v40 = vpop.eup %4327  ;;  %4357 = vpow2.f32 %v1959_v20 }
 0x5b4   : > { %v4330_v25 = vpop.eup %4329  ;;  %4359 = vpow2.f32 %v1957_v57  ;;  %v1953_v9 = vmul.f32 1.442695, %v1854_v26  ;;  %v1951_v60 = vmul.f32 1.442695, %v1853_v51 }
 0x5b5   : > { %v5710_v17 = vpop.xlane.xlu0 %1772  ;;  %v4332_v30 = vpop.eup %4331  ;;  %4361 = vpow2.f32 %v1955_v3 }
 0x5b6   : > { %2050 = vmatpush2.xpose.msra.mxu1 %v4322_v29  ;;  %2121 = vmatpush2.xpose.msra.mxu0 %v4322_v29  ;;  %v4334_v61 = vpop.eup %4333  ;;  %v1852_v42 = vsub.f32 %v6767_v14, %v5710_v17  ;;  %v1851_v63 = vsub.f32 %v6768_v58, %v5710_v17  ;;  %4363 = vpow2.f32 %v1953_v9  ;;  %v236_v29 = vpop.permute.xlu1 %235  ;;  %v6773_v17 = vmov 0.0   ;;  %v6774_v14 = vld [vmem:[#allocation22_spill] sm:$0xff] }
 0x5b7   : > { %2051 = vmatprep.subr.mxu1 %v4324_v37  ;;  %2122 = vmatprep.subr.mxu0 %v4324_v37  ;;  %v4336_v55 = vpop.eup %4335  ;;  %4365 = vpow2.f32 %v1951_v60  ;;  %v405_v37 = vadd.f32 %v6769_v44, %v236_v29 }
 0x5b8   : > { %v4338_v13 = vpop.eup %4337  ;;  %v1949_v34 = vmul.f32 1.442695, %v1852_v42  ;;  %v1947_v2 = vmul.f32 1.442695, %v1851_v63 }
 0x5b9   : > { %v4340_v59 = vpop.eup %4339 }
 0x5ba   : > { %2052 = vmatpush2.xpose.msra.mxu1 %v4326_v21  ;;  %2123 = vmatpush2.xpose.msra.mxu0 %v4326_v21  ;;  %v4342_v35 = vpop.eup %4341  ;;  %4367 = vpow2.f32 %v1949_v34  ;;  %v6771_v21 = vld [vmem:[#allocation28_spill] sm:$0xff] }
 0x5bb   : > { %2053 = vmatprep.subr.mxu1 %v4328_v40  ;;  %2124 = vmatprep.subr.mxu0 %v4328_v40  ;;  %v4344_v11 = vpop.eup %4343  ;;  %4369 = vpow2.f32 %v1947_v2  ;;  %v403_v49 = vadd.f32 %v6771_v21, %v236_v29 }
 0x5bc   : > { %v4346_v24 = vpop.eup %4345 }
 0x5bd   : > { %v5716_v48 = vpop.permute.xlu0 %250  ;;  %v4348_v22 = vpop.eup %4347 }
 0x5be   : > { %v423_v16 = vadd.f32 %v6762_v6, %v5716_v48  ;;  %2054 = vmatpush2.xpose.msra.mxu1 %v4330_v25  ;;  %2125 = vmatpush2.xpose.msra.mxu0 %v4330_v25  ;;  %v4350_v56 = vpop.eup %4349  ;;  %v421_v54 = vadd.f32 %v6770_v1, %v5716_v48 }
 0x5bf   : > { %2055 = vmatprep.subr.mxu1 %v4332_v30  ;;  %2126 = vmatprep.subr.mxu0 %v4332_v30  ;;  %v4352_v8 = vpop.eup %4351 }
 0x5c0   : > { %2075 = vmatprep.mubr.f32.mxu1 %v423_v16  ;;  %v4354_v12 = vpop.eup %4353 }
 0x5c1   : > { %v4356_v36 = vpop.eup %4355 }
 0x5c2   : > { %2056 = vmatpush2.xpose.msra.mxu1 %v4334_v61  ;;  %2127 = vmatpush2.xpose.msra.mxu0 %v4334_v61  ;;  %v4358_v38 = vpop.eup %4357 }
 0x5c3   : > { %2057 = vmatprep.subr.mxu1 %v4336_v55  ;;  %2128 = vmatprep.subr.mxu0 %v4336_v55  ;;  %v4360_v53 = vpop.eup %4359 }
 0x5c4   : > { %v4362_v18 = vpop.eup %4361 }
 0x5c5   : > { %v4364_v32 = vpop.eup %4363 }
 0x5c6   : > { %2058 = vmatpush2.xpose.msra.mxu1 %v4338_v13  ;;  %2129 = vmatpush2.xpose.msra.mxu0 %v4338_v13  ;;  %v4366_v5 = vpop.eup %4365 }
 0x5c7   : > { %2059 = vmatprep.subr.mxu1 %v4340_v59  ;;  %2130 = vmatprep.subr.mxu0 %v4340_v59  ;;  %v4368_v33 = vpop.eup %4367 }
 0x5c8   : > { %v4370_v62 = vpop.eup %4369 }
 0x5ca   : > { %2060 = vmatpush2.xpose.msra.mxu1 %v4342_v35  ;;  %2131 = vmatpush2.xpose.msra.mxu0 %v4342_v35 }
 0x5cb   : > { %2061 = vmatprep.subr.mxu1 %v4344_v11  ;;  %2132 = vmatprep.subr.mxu0 %v4344_v11 }
 0x5ce   : > { %2062 = vmatpush2.xpose.msra.mxu1 %v4346_v24  ;;  %2133 = vmatpush2.xpose.msra.mxu0 %v4346_v24 }
 0x5cf   : > { %2063 = vmatprep.subr.mxu1 %v4348_v22  ;;  %2134 = vmatprep.subr.mxu0 %v4348_v22 }
 0x5d2   : > { %2064 = vmatpush2.xpose.msra.mxu1 %v4350_v56  ;;  %2135 = vmatpush2.xpose.msra.mxu0 %v4350_v56 }
 0x5d3   : > { %2065 = vmatprep.subr.mxu1 %v4352_v8  ;;  %2136 = vmatprep.subr.mxu0 %v4352_v8 }
 0x5d6   : > { %2066 = vmatpush2.xpose.msra.mxu1 %v4354_v12  ;;  %2137 = vmatpush2.xpose.msra.mxu0 %v4354_v12 }
 0x5d7   : > { %2067 = vmatprep.subr.mxu1 %v4356_v36  ;;  %2138 = vmatprep.subr.mxu0 %v4356_v36 }
 0x5da   : > { %2068 = vmatpush2.xpose.msra.mxu1 %v4358_v38  ;;  %2139 = vmatpush2.xpose.msra.mxu0 %v4358_v38 }
 0x5db   : > { %2069 = vmatprep.subr.mxu1 %v4360_v53  ;;  %2140 = vmatprep.subr.mxu0 %v4360_v53 }
 0x5de   : > { %2070 = vmatpush2.xpose.msra.mxu1 %v4362_v18  ;;  %2141 = vmatpush2.xpose.msra.mxu0 %v4362_v18 }
 0x5df   : > { %2071 = vmatprep.subr.mxu1 %v4364_v32  ;;  %2142 = vmatprep.subr.mxu0 %v4364_v32 }
 0x5e2   : > { %2072 = vmatpush2.xpose.msra.mxu1 %v4366_v5  ;;  %2143 = vmatpush2.xpose.msra.mxu0 %v4366_v5 }
 0x5e3   : > { %2073 = vmatprep.subr.mxu1 %v4368_v33  ;;  %2144 = vmatprep.subr.mxu0 %v4368_v33 }
 0x5e6   : > { %2074 = vmatpush2.xpose.msra.mxu1 %v4370_v62  ;;  %2145 = vmatpush2.xpose.msra.mxu0 %v4370_v62 }
 0x5e7   : > { %2357 = vmatprep.subr.mxu1 %v405_v37 }
 0x5e9   : > { %2076 = vmatmul.mubr.f32.vlgmr.msra.gmra.mxu1 %v421_v54  ;;  %2147 = vmatmul.mubr.f32.vlgmr.msra.gmra.mxu0 %v6772_v39 }
 0x5ea   : > { %2358 = vmatpush1.msra.mxu1 %v403_v49  ;;  %2391 = vmatprep.mubr.f32.mxu1 %v6773_v17 }
 0x62c   : > { %v2183_v40 = vpop.trf.xlu1  ;;  %v2215_v16 = vpop.trf.xlu0 }
 0x62d   : > { %4029 = vmatmul.mubr.msk.f32.vlgmr.msra.gmra.mxu1 %vm508_vm1, %v2183_v40 }
 0x62e   : > { %2397 = vmatprep.mubr.f32.mxu1 %v6773_v17 }
 0x630   : > { %v2184_v15 = vpop.trf.xlu1  ;;  %v2216_v41 = vpop.trf.xlu0 }
 0x631   : > { %4030 = vmatmul.mubr.msk.f32.gmra.mxu1 %vm508_vm1, %v2184_v15 }
 0x632   : > { %2403 = vmatprep.mubr.f32.mxu1 %v6773_v17 }
 0x634   : > { %v2185_v31 = vpop.trf.xlu1  ;;  %v2217_v50 = vpop.trf.xlu0 }
 0x635   : > { %4031 = vmatmul.mubr.msk.f32.gmra.mxu1 %vm508_vm1, %v2185_v31 }
 0x636   : > { %2409 = vmatprep.mubr.f32.mxu1 %v6773_v17 }
 0x638   : > { %v2186_v25 = vpop.trf.xlu1  ;;  %v2218_v19 = vpop.trf.xlu0 }
 0x639   : > { %4032 = vmatmul.mubr.msk.f32.gmra.mxu1 %vm508_vm1, %v2186_v25 }
 0x63a   : > { %2415 = vmatprep.mubr.f32.mxu1 %v6773_v17 }
 0x63c   : > { %v2187_v47 = vpop.trf.xlu1  ;;  %v2219_v52 = vpop.trf.xlu0 }
 0x63d   : > { %4033 = vmatmul.mubr.msk.f32.gmra.mxu1 %vm508_vm1, %v2187_v47 }
 0x63e   : > { %2421 = vmatprep.mubr.f32.mxu1 %v6773_v17 }
 0x640   : > { %v2188_v4 = vpop.trf.xlu1  ;;  %v2220_v45 = vpop.trf.xlu0 }
 0x641   : > { %4034 = vmatmul.mubr.msk.f32.gmra.mxu1 %vm508_vm1, %v2188_v4 }
 0x642   : > { %2427 = vmatprep.mubr.f32.mxu1 %v6773_v17 }
 0x644   : > { %v2189_v48 = vpop.trf.xlu1  ;;  %v2221_v59 = vpop.trf.xlu0 }
 0x645   : > { %4035 = vmatmul.mubr.msk.f32.gmra.mxu1 %vm508_vm1, %v2189_v48 }
 0x646   : > { %2433 = vmatprep.mubr.f32.mxu1 %v6773_v17 }
 0x648   : > { %v2190_v30 = vpop.trf.xlu1  ;;  %v2222_v43 = vpop.trf.xlu0 }
 0x649   : > { %4036 = vmatmul.mubr.msk.f32.gmra.mxu1 %vm508_vm1, %v2190_v30 }
 0x64a   : > { %2439 = vmatprep.mubr.f32.mxu1 %v6773_v17 }
 0x64c   : > { %v2191_v6 = vpop.trf.xlu1  ;;  %v2223_v28 = vpop.trf.xlu0 }
 0x64d   : > { %4037 = vmatmul.mubr.msk.f32.gmra.mxu1 %vm508_vm1, %v2191_v6 }
 0x64e   : > { %2445 = vmatprep.mubr.f32.mxu1 %v6773_v17 }
 0x650   : > { %v2192_v0 = vpop.trf.xlu1  ;;  %v2224_v20 = vpop.trf.xlu0 }
 0x651   : > { %4038 = vmatmul.mubr.msk.f32.gmra.mxu1 %vm508_vm1, %v2192_v0 }
 0x652   : > { %2451 = vmatprep.mubr.f32.mxu1 %v6773_v17 }
 0x654   : > { %v2193_v61 = vpop.trf.xlu1  ;;  %v2225_v35 = vpop.trf.xlu0 }
 0x655   : > { %4039 = vmatmul.mubr.msk.f32.gmra.mxu1 %vm508_vm1, %v2193_v61 }
 0x656   : > { %2457 = vmatprep.mubr.f32.mxu1 %v6773_v17 }
 0x658   : > { %v2194_v7 = vpop.trf.xlu1  ;;  %v2226_v57 = vpop.trf.xlu0 }
 0x659   : > { %4040 = vmatmul.mubr.msk.f32.gmra.mxu1 %vm508_vm1, %v2194_v7 }
 0x65a   : > { %2463 = vmatprep.mubr.f32.mxu1 %v6773_v17 }
 0x65c   : > { %v2195_v55 = vpop.trf.xlu1  ;;  %v2227_v27 = vpop.trf.xlu0 }
 0x65d   : > { %4041 = vmatmul.mubr.msk.f32.gmra.mxu1 %vm508_vm1, %v2195_v55 }
 0x65e   : > { %2469 = vmatprep.mubr.f32.mxu1 %v6773_v17 }
 0x660   : > { %v2196_v46 = vpop.trf.xlu1  ;;  %v2228_v26 = vpop.trf.xlu0 }
 0x661   : > { %4042 = vmatmul.mubr.msk.f32.gmra.mxu1 %vm508_vm1, %v2196_v46 }
 0x662   : > { %2475 = vmatprep.mubr.f32.mxu1 %v6773_v17 }
 0x664   : > { %v2197_v13 = vpop.trf.xlu1  ;;  %v2229_v11 = vpop.trf.xlu0 }
 0x665   : > { %4043 = vmatmul.mubr.msk.f32.gmra.mxu1 %vm508_vm1, %v2197_v13 }
 0x666   : > { %2481 = vmatprep.mubr.f32.mxu1 %v6773_v17 }
 0x668   : > { %v2198_v23 = vpop.trf.xlu1  ;;  %v2230_v3 = vpop.trf.xlu0 }
 0x669   : > { %4044 = vmatmul.mubr.msk.f32.gmra.mxu1 %vm508_vm1, %v2198_v23 }
 0x66a   : > { %2487 = vmatprep.mubr.f32.mxu1 %v6773_v17 }
 0x66d   : > { %4045 = vmatmul.mubr.msk.f32.gmra.mxu1 %vm508_vm1, %v2215_v16 }
 0x66e   : > { %2493 = vmatprep.mubr.f32.mxu1 %v6773_v17 }
 0x671   : > { %4046 = vmatmul.mubr.msk.f32.gmra.mxu1 %vm508_vm1, %v2216_v41  ;;  %v6779_v41 = vld [vmem:[#allocation8_spill] sm:$0xff] }
 0x672   : > { %2499 = vmatprep.mubr.f32.mxu1 %v6773_v17 }
 0x675   : > { %4047 = vmatmul.mubr.msk.f32.gmra.mxu1 %vm508_vm1, %v2217_v50 }
 0x676   : > { %2505 = vmatprep.mubr.f32.mxu1 %v6773_v17 }
 0x679   : > { %4048 = vmatmul.mubr.msk.f32.gmra.mxu1 %vm508_vm1, %v2218_v19 }
 0x67a   : > { %2511 = vmatprep.mubr.f32.mxu1 %v6773_v17 }
 0x67d   : > { %4049 = vmatmul.mubr.msk.f32.gmra.mxu1 %vm508_vm1, %v2219_v52 }
 0x67e   : > { %2517 = vmatprep.mubr.f32.mxu1 %v6773_v17 }
 0x681   : > { %4050 = vmatmul.mubr.msk.f32.gmra.mxu1 %vm508_vm1, %v2220_v45 }
 0x682   : > { %2523 = vmatprep.mubr.f32.mxu1 %v6773_v17 }
 0x685   : > { %4051 = vmatmul.mubr.msk.f32.gmra.mxu1 %vm508_vm1, %v2221_v59 }
 0x686   : > { %2529 = vmatprep.mubr.f32.mxu1 %v6773_v17 }
 0x689   : > { %4052 = vmatmul.mubr.msk.f32.gmra.mxu1 %vm508_vm1, %v2222_v43 }
 0x68a   : > { %2535 = vmatprep.mubr.f32.mxu1 %v6773_v17 }
 0x68d   : > { %4053 = vmatmul.mubr.msk.f32.gmra.mxu1 %vm508_vm1, %v2223_v28 }
 0x68e   : > { %2541 = vmatprep.mubr.f32.mxu1 %v6773_v17 }
 0x691   : > { %4054 = vmatmul.mubr.msk.f32.gmra.mxu1 %vm508_vm1, %v2224_v20 }
 0x692   : > { %2547 = vmatprep.mubr.f32.mxu1 %v6773_v17 }
 0x695   : > { %4055 = vmatmul.mubr.msk.f32.gmra.mxu1 %vm508_vm1, %v2225_v35 }
 0x696   : > { %2553 = vmatprep.mubr.f32.mxu1 %v6773_v17 }
 0x699   : > { %4056 = vmatmul.mubr.msk.f32.gmra.mxu1 %vm508_vm1, %v2226_v57 }
 0x69a   : > { %2559 = vmatprep.mubr.f32.mxu1 %v6773_v17 }
 0x69d   : > { %4057 = vmatmul.mubr.msk.f32.gmra.mxu1 %vm508_vm1, %v2227_v27 }
 0x69e   : > { %2565 = vmatprep.mubr.f32.mxu1 %v6773_v17 }
 0x6a1   : > { %4058 = vmatmul.mubr.msk.f32.gmra.mxu1 %vm508_vm1, %v2228_v26 }
 0x6a2   : > { %2571 = vmatprep.mubr.f32.mxu1 %v6773_v17 }
 0x6a5   : > { %4059 = vmatmul.mubr.msk.f32.gmra.mxu1 %vm508_vm1, %v2229_v11 }
 0x6a6   : > { %2577 = vmatprep.mubr.f32.mxu1 %v6773_v17 }
 0x6a9   : > { %v2148_v10 = vpop.f32.mrf.mxu0  ;;  %4060 = vmatmul.mubr.msk.f32.gmra.mxu1 %vm508_vm1, %v2230_v3  ;;  %v2077_v9 = vpop.f32.mrf.mxu1 }
 0x6aa   : > { %4371 = vrcp.f32 %v2148_v10  ;;  %3007 = vmatprep.mubr.f32.mxu1 %v6772_v39 }
 0x6ab   : > { %v2150_v51 = vpop.f32.mrf.mxu0  ;;  %v2079_v63 = vpop.f32.mrf.mxu1 }
 0x6ac   : > { %4373 = vrcp.f32 %v2150_v51 }
 0x6b7   : > { %v4372_v24 = vpop.eup %4371 }
 0x6b8   : > { %v2158_v42 = vrot.slane %v4372_v24, %v6774_v14 }
 0x6b9   : > { %v4374_v22 = vpop.eup %4373 }
 0x6ba   : > { %v2163_v60 = vmul.f32 %v2158_v42, %v2077_v9  ;;  %v2162_v58 = vrot.slane %v4374_v22, %v6774_v14 }
 0x6bc   : > { %2165 = vst [vmem:[%s5366_s30 + $0x10] sm:$0xff] %v2163_v60  ;;  %v2164_v56 = vmul.f32 %v2162_v58, %v2079_v63 }
 0x6be   : > { %2166 = vst [vmem:[%s5366_s30 + $0x18] sm:$0xff] %v2164_v56 }
 0x6ed   : > { %v5812_v34 = vpop.f32.mrf.mxu1 }
 0x6ee   : > { %6775 = vst [vmem:[#allocation23_spill] sm:$0xff] %v5812_v34 }
 0x6ef   : > { %v5814_v8 = vpop.f32.mrf.mxu1 }
 0x6f1   : > { %v5816_v2 = vpop.f32.mrf.mxu1 }
 0x6f2   : > { %6776 = vst [vmem:[#allocation25_spill] sm:$0xff] %v5816_v2 }
 0x6f3   : > { %v5818_v12 = vpop.f32.mrf.mxu1 }
 0x6f5   : > { %v5820_v36 = vpop.f32.mrf.mxu1 }
 0x6f6   : > { %6777 = vst [vmem:[#allocation15_spill] sm:$0xff] %v5820_v36 }
 0x6f7   : > { %v5822_v38 = vpop.f32.mrf.mxu1 }
 0x6f9   : > { %v5824_v53 = vpop.f32.mrf.mxu1 }
 0x6fa   : > { %6778 = vst [vmem:[#allocation26_spill] sm:$0xff] %v5824_v53 }
 0x6fb   : > { %v5826_v18 = vpop.f32.mrf.mxu1 }
 0x6fd   : > { %v5828_v32 = vpop.f32.mrf.mxu1 }
 0x6ff   : > { %v2419_v5 = vpop.f32.mrf.mxu1 }
 0x701   : > { %v5830_v33 = vpop.f32.mrf.mxu1 }
 0x703   : > { %v2425_v29 = vpop.f32.mrf.mxu1 }
 0x704   : > { %v5908_v22 = vadd.f32 %v2425_v29, %v6779_v41  ;;  %v5926_v29 = vadd.f32 %v2419_v5, %v6779_v41 }
 0x705   : > { %v5832_v62 = vpop.f32.mrf.mxu1 }
 0x707   : > { %v2431_v44 = vpop.f32.mrf.mxu1 }
 0x708   : > { %v5911_v60 = vadd.f32 %v2431_v44, %v6779_v41  ;;  %v2599_v44 = vmax.f32 %v5830_v33, %v5908_v22 }
 0x709   : > { %v5834_v37 = vpop.f32.mrf.mxu1 }
 0x70b   : > { %v2437_v1 = vpop.f32.mrf.mxu1 }
 0x70c   : > { %v5894_v3 = vadd.f32 %v2437_v1, %v6779_v41 }
 0x70d   : > { %v5836_v54 = vpop.f32.mrf.mxu1 }
 0x70e   : > { %v2605_v58 = vmax.f32 %v5834_v37, %v5894_v3 }
 0x70f   : > { %v2443_v21 = vpop.f32.mrf.mxu1 }
 0x710   : > { %v5897_v10 = vadd.f32 %v2443_v21, %v6779_v41  ;;  %v5923_v21 = vadd.f32 %v5826_v18, %v6779_v41  ;;  %v5940_v18 = vadd.f32 %v5822_v38, %v6779_v41 }
 0x711   : > { %v5838_v49 = vpop.f32.mrf.mxu1 }
 0x712   : > { %v2608_v63 = vmax.f32 %v5836_v54, %v5897_v10  ;;  %6785 = vst [vmem:[#allocation5_spill] sm:$0xff] %v5940_v18  ;;  %v2593_v5 = vmax.f32 %v5824_v53, %v5923_v21  ;;  %v2590_v38 = vmax.f32 %v5820_v36, %v5940_v18 }
 0x713   : > { %v2449_v40 = vpop.f32.mrf.mxu1 }
 0x714   : > { %v5880_v20 = vadd.f32 %v2449_v40, %v6779_v41  ;;  %v2602_v40 = vmax.f32 %v5832_v62, %v5911_v60 }
 0x715   : > { %v5840_v15 = vpop.f32.mrf.mxu1 }
 0x716   : > { %v2611_v51 = vmax.f32 %v5838_v49, %v5880_v20 }
 0x717   : > { %v2455_v31 = vpop.f32.mrf.mxu1 }
 0x718   : > { %v5883_v35 = vadd.f32 %v2455_v31, %v6779_v41 }
 0x719   : > { %v5842_v25 = vpop.f32.mrf.mxu1 }
 0x71a   : > { %v2614_v24 = vmax.f32 %v5840_v15, %v5883_v35 }
 0x71b   : > { %v2461_v47 = vpop.f32.mrf.mxu1 }
 0x71c   : > { %v5866_v52 = vadd.f32 %v2461_v47, %v6779_v41 }
 0x71d   : > { %v5844_v4 = vpop.f32.mrf.mxu1 }
 0x71e   : > { %v2617_v57 = vmax.f32 %v5842_v25, %v5866_v52 }
 0x71f   : > { %v2467_v48 = vpop.f32.mrf.mxu1 }
 0x720   : > { %v5869_v23 = vadd.f32 %v2467_v48, %v6779_v41  ;;  %v5936_v48 = vadd.f32 %v5818_v12, %v6779_v41 }
 0x721   : > { %v5846_v30 = vpop.f32.mrf.mxu1 }
 0x722   : > { %v2620_v27 = vmax.f32 %v5844_v4, %v5869_v23  ;;  %6784 = vst [vmem:[#allocation4_spill] sm:$0xff] %v5936_v48  ;;  %v2587_v12 = vmax.f32 %v5816_v2, %v5936_v48 }
 0x723   : > { %v2473_v6 = vpop.f32.mrf.mxu1 }
 0x724   : > { %v5856_v50 = vadd.f32 %v2473_v6, %v6779_v41  ;;  %v2596_v6 = vmax.f32 %v5828_v32, %v5926_v29 }
 0x725   : > { %v5848_v16 = vpop.f32.mrf.mxu1 }
 0x726   : > { %v2623_v45 = vmax.f32 %v5846_v30, %v5856_v50 }
 0x727   : > { %v2479_v0 = vpop.f32.mrf.mxu1 }
 0x728   : > { %v5851_v61 = vadd.f32 %v2479_v0, %v6779_v41 }
 0x729   : > { %v5853_v7 = vpop.f32.mrf.mxu1 }
 0x72a   : > { %v2626_v55 = vmax.f32 %v5848_v16, %v5851_v61 }
 0x72b   : > { %v2485_v19 = vpop.f32.mrf.mxu1 }
 0x72c   : > { %v5861_v46 = vadd.f32 %v2485_v19, %v6779_v41  ;;  %2627 = vmax.xlane.f32.xlu1 %v2626_v55  ;;  %v5950_v19 = vadd.f32 %v5814_v8, %v6779_v41 }
 0x72d   : > { %v5863_v13 = vpop.f32.mrf.mxu1 }
 0x72e   : > { %6780 = vst [vmem:[#allocation3_spill] sm:$0xff] %v5863_v13  ;;  %v2629_v59 = vmax.f32 %v5853_v7, %v5861_v46  ;;  %6786 = vst [vmem:[#allocation20_spill] sm:$0xff] %v5950_v19 }
 0x72f   : > { %v5875_v43 = vpop.f32.mrf.mxu1 }
 0x730   : > { %2624 = vmax.xlane.f32.xlu1 %v2623_v45  ;;  %2630 = vmax.xlane.f32.xlu0 %v2629_v59 }
 0x731   : > { %v5877_v28 = vpop.f32.mrf.mxu1 }
 0x732   : > { %6781 = vst [vmem:[#allocation12_spill] sm:$0xff] %v5877_v28 }
 0x733   : > { %v5889_v26 = vpop.f32.mrf.mxu1 }
 0x734   : > { %2618 = vmax.xlane.f32.xlu1 %v2617_v57  ;;  %2621 = vmax.xlane.f32.xlu0 %v2620_v27  ;;  %v2584_v57 = vmax.f32 %v5812_v34, %v5950_v19 }
 0x735   : > { %v5891_v11 = vpop.f32.mrf.mxu1 }
 0x736   : > { %6782 = vst [vmem:[#allocation2_spill] sm:$0xff] %v5891_v11 }
 0x737   : > { %v5903_v9 = vpop.f32.mrf.mxu1 }
 0x738   : > { %2612 = vmax.xlane.f32.xlu1 %v2611_v51  ;;  %2615 = vmax.xlane.f32.xlu0 %v2614_v24 }
 0x739   : > { %v5905_v42 = vpop.f32.mrf.mxu1 }
 0x73a   : > { %6783 = vst [vmem:[#allocation11_spill] sm:$0xff] %v5905_v42 }
 0x73b   : > { %v5917_v56 = vpop.f32.mrf.mxu1 }
 0x73c   : > { %2606 = vmax.xlane.f32.xlu1 %v2605_v58  ;;  %2609 = vmax.xlane.f32.xlu0 %v2608_v63 }
 0x73d   : > { %v5919_v1 = vpop.f32.mrf.mxu1 }
 0x73f   : > { %v2515_v31 = vpop.f32.mrf.mxu1 }
 0x740   : > { %2600 = vmax.xlane.f32.xlu1 %v2599_v44  ;;  %2603 = vmax.xlane.f32.xlu0 %v2602_v40 }
 0x741   : > { %v5932_v47 = vpop.f32.mrf.mxu1 }
 0x743   : > { %v2521_v0 = vpop.f32.mrf.mxu1 }
 0x744   : > { %2594 = vmax.xlane.f32.xlu1 %v2593_v5  ;;  %2597 = vmax.xlane.f32.xlu0 %v2596_v6 }
 0x745   : > { %v5946_v55 = vpop.f32.mrf.mxu1 }
 0x747   : > { %v2527_v45 = vpop.f32.mrf.mxu1 }
 0x748   : > { %2588 = vmax.xlane.f32.xlu1 %v2587_v12  ;;  %2591 = vmax.xlane.f32.xlu0 %v2590_v38 }
 0x749   : > { %v5956_v59 = vpop.f32.mrf.mxu1 }
 0x74b   : > { %v2533_v27 = vpop.f32.mrf.mxu1 }
 0x74c   : > { %2585 = vmax.xlane.f32.xlu0 %v2584_v57 }
 0x74d   : > { %v5960_v51 = vpop.f32.mrf.mxu1 }
 0x74f   : > { %v2539_v8 = vpop.f32.mrf.mxu1 }
 0x751   : > { %v5962_v24 = vpop.f32.mrf.mxu1 }
 0x753   : > { %v2545_v58 = vpop.f32.mrf.mxu1 }
 0x755   : > { %v5964_v63 = vpop.f32.mrf.mxu1 }
 0x757   : > { %v2551_v44 = vpop.f32.mrf.mxu1 }
 0x758   : > { %v5988_v18 = vadd.f32 %v2551_v44, %v6779_v41 }
 0x759   : > { %v5966_v40 = vpop.f32.mrf.mxu1 }
 0x75b   : > { %v2557_v5 = vpop.f32.mrf.mxu1 }
 0x75d   : > { %v5968_v6 = vpop.f32.mrf.mxu1 }
 0x75f   : > { %v2563_v12 = vpop.f32.mrf.mxu1 }
 0x760   : > { %v5980_v19 = vadd.f32 %v2563_v12, %v6779_v41 }
 0x761   : > { %v5970_v38 = vpop.f32.mrf.mxu1 }
 0x763   : > { %v2569_v14 = vpop.f32.mrf.mxu1 }
 0x764   : > { %v5993_v53 = vadd.f32 %v2569_v14, %v6779_v41  ;;  %v6008_v14 = vadd.f32 %v2527_v45, %v6779_v41  ;;  %v6023_v45 = vadd.f32 %v2533_v27, %v6779_v41 }
 0x765   : > { %v5972_v17 = vpop.f32.mrf.mxu1 }
 0x766   : > { %6787 = vst [vmem:[#allocation10_spill] sm:$0xff] %v5972_v17  ;;  %v2671_v44 = vmax.f32 %v5970_v38, %v5993_v53 }
 0x767   : > { %v2575_v57 = vpop.f32.mrf.mxu1 }
 0x768   : > { %v5975_v39 = vadd.f32 %v2575_v57, %v6779_v41  ;;  %v2668_v57 = vmax.f32 %v5968_v6, %v5980_v19 }
 0x769   : > { %v5977_v34 = vpop.f32.mrf.mxu1 }
 0x76a   : > { %v2674_v2 = vmax.f32 %v5972_v17, %v5975_v39  ;;  %v5998_v17 = vadd.f32 %v2539_v8, %v6779_v41  ;;  %v6013_v8 = vadd.f32 %v2545_v58, %v6779_v41  ;;  %v6029_v58 = vadd.f32 %v5903_v9, %v6779_v41 }
 0x76b   : > { %v2581_v48 = vpop.f32.mrf.mxu1 }
 0x76c   : > { %v5985_v36 = vadd.f32 %v2581_v48, %v6779_v41  ;;  %2675 = vmax.xlane.f32.xlu0 %v2674_v2  ;;  %v2662_v2 = vmax.f32 %v5964_v63, %v5988_v18  ;;  %v6003_v48 = vadd.f32 %v2557_v5, %v6779_v41  ;;  %v6018_v5 = vadd.f32 %v2515_v31, %v6779_v41 }
 0x76d   : > { %6788 = vst [vmem:[#allocation13_spill] sm:$0xff] %v6029_v58  ;;  %v6034_v31 = vadd.f32 %v2521_v0, %v6779_v41  ;;  %v2638_v27 = vmax.f32 %v5891_v11, %v6029_v58  ;;  %v6048_v0 = vadd.f32 %v5889_v26, %v6779_v41  ;;  %v194_v26 = vld [vmem:[%s6596_s2 + $0x18] sm:$0xff] }
 0x76e   : > { %v2677_v12 = vmax.f32 %v5977_v34, %v5985_v36 }
 0x76f   : > { %v2647_v9 = vmax.f32 %v5932_v47, %v6034_v31  ;;  %6789 = vst [vmem:[#allocation9_spill] sm:$0xff] %v6048_v0 }
 0x770   : > { %2678 = vmax.xlane.f32.xlu1 %v2677_v12  ;;  %2669 = vmax.xlane.f32.xlu0 %v2668_v57  ;;  %v2656_v57 = vmax.f32 %v5960_v51, %v5998_v17  ;;  %v2665_v12 = vmax.f32 %v5966_v40, %v6003_v48 }
 0x774   : > { %2672 = vmax.xlane.f32.xlu1 %v2671_v44  ;;  %2663 = vmax.xlane.f32.xlu0 %v2662_v2  ;;  %v2650_v2 = vmax.f32 %v5946_v55, %v6008_v14  ;;  %v2659_v44 = vmax.f32 %v5962_v24, %v6013_v8 }
 0x778   : > { %2666 = vmax.xlane.f32.xlu1 %v2665_v12  ;;  %2657 = vmax.xlane.f32.xlu0 %v2656_v57  ;;  %v2644_v57 = vmax.f32 %v5919_v1, %v6018_v5  ;;  %v2653_v12 = vmax.f32 %v5956_v59, %v6023_v45 }
 0x77c   : > { %2660 = vmax.xlane.f32.xlu1 %v2659_v44  ;;  %2651 = vmax.xlane.f32.xlu0 %v2650_v2  ;;  %v6042_v2 = vadd.f32 %v5917_v56, %v6779_v41  ;;  %v2635_v56 = vmax.f32 %v5877_v28, %v6048_v0 }
 0x77e   : > { %v2641_v44 = vmax.f32 %v5905_v42, %v6042_v2 }
 0x780   : > { %2654 = vmax.xlane.f32.xlu1 %v2653_v12  ;;  %2645 = vmax.xlane.f32.xlu0 %v2644_v57  ;;  %v6054_v57 = vadd.f32 %v5875_v43, %v6779_v41  ;;  %v201_v43 = vld [vmem:[%s6596_s2 + $0x50] sm:$0xff] }
 0x782   : > { %6790 = vst [vmem:[#allocation24_spill] sm:$0xff] %v6054_v57  ;;  %v2632_v12 = vmax.f32 %v5863_v13, %v6054_v57 }
 0x784   : > { %2648 = vmax.xlane.f32.xlu1 %v2647_v9  ;;  %2639 = vmax.xlane.f32.xlu0 %v2638_v27  ;;  %v198_v27 = vld [vmem:[%s6596_s2 + $0x38] sm:$0xff] }
 0x788   : > { %2642 = vmax.xlane.f32.xlu1 %v2641_v44 }
 0x78c   : > { %2636 = vmax.xlane.f32.xlu1 %v2635_v56 }
 0x790   : > { %2633 = vmax.xlane.f32.xlu1 %v2632_v12 }
 0x79a   : > { %220 = vperm.xlu0 %4109, %v194_v26  }
 0x79e   : > { %240 = vperm.xlu0 %4109, %v198_v27  }
 0x7a1   : > { %255 = vperm.xlu1 %4110, %v201_v43  }
 0x7b5   : > { %v2628_v9 = vpop.xlane.xlu1 %2627 }
 0x7b6   : > { %v2709_v44 = vsub.f32 %v5851_v61, %v2628_v9  ;;  %v2708_v26 = vsub.f32 %v5848_v16, %v2628_v9 }
 0x7b8   : > { %v2802_v0 = vmul.f32 1.442695, %v2709_v44  ;;  %v2800_v43 = vmul.f32 1.442695, %v2708_v26 }
 0x7b9   : > { %v2631_v56 = vpop.xlane.xlu0 %2630  ;;  %v2625_v13 = vpop.xlane.xlu1 %2624 }
 0x7ba   : > { %v2710_v12 = vsub.f32 %v5853_v7, %v2631_v56  ;;  %v2711_v41 = vsub.f32 %v5861_v46, %v2631_v56  ;;  %v2707_v27 = vsub.f32 %v5856_v50, %v2625_v13  ;;  %v2706_v58 = vsub.f32 %v5846_v30, %v2625_v13 }
 0x7bc   : > { %v2804_v57 = vmul.f32 1.442695, %v2710_v12  ;;  %v2806_v28 = vmul.f32 1.442695, %v2711_v41  ;;  %v2798_v61 = vmul.f32 1.442695, %v2707_v27 }
 0x7bd   : > { %v2622_v11 = vpop.xlane.xlu0 %2621  ;;  %v2619_v42 = vpop.xlane.xlu1 %2618  ;;  %v2796_v46 = vmul.f32 1.442695, %v2706_v58 }
 0x7be   : > { %4375 = vpow2.f32 %v2804_v57  ;;  %v2705_v7 = vsub.f32 %v5869_v23, %v2622_v11  ;;  %v2704_v16 = vsub.f32 %v5844_v4, %v2622_v11  ;;  %v2703_v9 = vsub.f32 %v5866_v52, %v2619_v42 }
 0x7bf   : > { %4377 = vpow2.f32 %v2806_v28  ;;  %v2702_v28 = vsub.f32 %v5842_v25, %v2619_v42 }
 0x7c0   : > { %4379 = vpow2.f32 %v2802_v0  ;;  %v2794_v41 = vmul.f32 1.442695, %v2705_v7  ;;  %v2792_v57 = vmul.f32 1.442695, %v2704_v16  ;;  %v2790_v30 = vmul.f32 1.442695, %v2703_v9 }
 0x7c1   : > { %4381 = vpow2.f32 %v2800_v43  ;;  %v2616_v50 = vpop.xlane.xlu0 %2615  ;;  %v2613_v0 = vpop.xlane.xlu1 %2612  ;;  %v2788_v58 = vmul.f32 1.442695, %v2702_v28 }
 0x7c2   : > { %4383 = vpow2.f32 %v2798_v61  ;;  %v2701_v13 = vsub.f32 %v5883_v35, %v2616_v50  ;;  %v2700_v4 = vsub.f32 %v5840_v15, %v2616_v50  ;;  %v2699_v52 = vsub.f32 %v5880_v20, %v2613_v0 }
 0x7c3   : > { %4385 = vpow2.f32 %v2796_v46  ;;  %v2698_v35 = vsub.f32 %v5838_v49, %v2613_v0 }
 0x7c4   : > { %4387 = vpow2.f32 %v2794_v41  ;;  %v2786_v11 = vmul.f32 1.442695, %v2701_v13  ;;  %v2784_v25 = vmul.f32 1.442695, %v2700_v4  ;;  %v2782_v26 = vmul.f32 1.442695, %v2699_v52 }
 0x7c5   : > { %4389 = vpow2.f32 %v2792_v57  ;;  %v2610_v12 = vpop.xlane.xlu0 %2609  ;;  %v2607_v43 = vpop.xlane.xlu1 %2606  ;;  %v2780_v20 = vmul.f32 1.442695, %v2698_v35 }
 0x7c6   : > { %4391 = vpow2.f32 %v2790_v30  ;;  %v2697_v15 = vsub.f32 %v5897_v10, %v2610_v12  ;;  %v2696_v61 = vsub.f32 %v5836_v54, %v2610_v12  ;;  %v2695_v49 = vsub.f32 %v5894_v3, %v2607_v43 }
 0x7c7   : > { %4393 = vpow2.f32 %v2788_v58  ;;  %v2694_v9 = vsub.f32 %v5834_v37, %v2607_v43 }
 0x7c8   : > { %4395 = vpow2.f32 %v2786_v11  ;;  %v2778_v46 = vmul.f32 1.442695, %v2697_v15  ;;  %v2776_v10 = vmul.f32 1.442695, %v2696_v61  ;;  %v2774_v57 = vmul.f32 1.442695, %v2695_v49 }
 0x7c9   : > { %4397 = vpow2.f32 %v2784_v25  ;;  %v2604_v41 = vpop.xlane.xlu0 %2603  ;;  %v2601_v30 = vpop.xlane.xlu1 %2600  ;;  %v2772_v3 = vmul.f32 1.442695, %v2694_v9 }
 0x7ca   : > { %4399 = vpow2.f32 %v2782_v26  ;;  %v2693_v54 = vsub.f32 %v5911_v60, %v2604_v41  ;;  %v2692_v13 = vsub.f32 %v5832_v62, %v2604_v41  ;;  %v2691_v37 = vsub.f32 %v5908_v22, %v2601_v30 }
 0x7cb   : > { %v4376_v23 = vpop.eup %4375  ;;  %4401 = vpow2.f32 %v2780_v20  ;;  %v2690_v4 = vsub.f32 %v5830_v33, %v2601_v30 }
 0x7cc   : > { %v4378_v44 = vpop.eup %4377  ;;  %4403 = vpow2.f32 %v2778_v46  ;;  %v2768_v60 = vmul.f32 1.442695, %v2692_v13  ;;  %v2766_v52 = vmul.f32 1.442695, %v2691_v37  ;;  %v6796_v37 = vld [vmem:[#allocation20_spill] sm:$0xff] }
 0x7cd   : > { %2872 = vmatprep.subr.mxu0 %v4378_v44  ;;  %2943 = vmatprep.subr.mxu1 %v4378_v44  ;;  %v4380_v56 = vpop.eup %4379  ;;  %4405 = vpow2.f32 %v2776_v10  ;;  %v2598_v58 = vpop.xlane.xlu0 %2597  ;;  %v2764_v22 = vmul.f32 1.442695, %v2690_v4  ;;  %v6797_v4 = vld [vmem:[#allocation23_spill] sm:$0xff] }
 0x7ce   : > { %2873 = vmatpush1.xpose.msra.mxu0 %v4376_v23  ;;  %2944 = vmatpush1.xpose.msra.mxu1 %v4376_v23  ;;  %v4382_v42 = vpop.eup %4381  ;;  %4407 = vpow2.f32 %v2774_v57  ;;  %v2770_v23 = vmul.f32 1.442695, %v2693_v54  ;;  %v2689_v62 = vsub.f32 %v5926_v29, %v2598_v58  ;;  %v2595_v12 = vpop.xlane.xlu1 %2594  ;;  %v2688_v25 = vsub.f32 %v5828_v32, %v2598_v58 }
 0x7cf   : > { %2874 = vmatprep.subr.mxu0 %v4380_v56  ;;  %2945 = vmatprep.subr.mxu1 %v4380_v56  ;;  %v4384_v27 = vpop.eup %4383  ;;  %4409 = vpow2.f32 %v2772_v3  ;;  %v2687_v33 = vsub.f32 %v5923_v21, %v2595_v12  ;;  %v6795_v3 = vld [vmem:[#allocation25_spill] sm:$0xff] }
 0x7d0   : > { %v4386_v7 = vpop.eup %4385  ;;  %4411 = vpow2.f32 %v2770_v23  ;;  %v2760_v29 = vmul.f32 1.442695, %v2688_v25 }
 0x7d1   : > { %v4388_v16 = vpop.eup %4387  ;;  %4413 = vpow2.f32 %v2768_v60  ;;  %v2592_v15 = vpop.xlane.xlu0 %2591  ;;  %v2758_v61 = vmul.f32 1.442695, %v2687_v33 }
 0x7d2   : > { %2875 = vmatpush1.xpose.msra.mxu0 %v4382_v42  ;;  %2946 = vmatpush1.xpose.msra.mxu1 %v4382_v42  ;;  %v4390_v50 = vpop.eup %4389  ;;  %4415 = vpow2.f32 %v2766_v52  ;;  %v2762_v42 = vmul.f32 1.442695, %v2689_v62  ;;  %v2589_v49 = vpop.xlane.xlu1 %2588 }
 0x7d3   : > { %2876 = vmatprep.subr.mxu0 %v4384_v27  ;;  %2947 = vmatprep.subr.mxu1 %v4384_v27  ;;  %v4392_v28 = vpop.eup %4391  ;;  %4417 = vpow2.f32 %v2764_v22  ;;  %v6791_v27 = vld [vmem:[#allocation26_spill] sm:$0xff]  ;;  %v2682_v13 = vsub.f32 %v6795_v3, %v2589_v49 }
 0x7d4   : > { %v4394_v0 = vpop.eup %4393  ;;  %v2686_v43 = vsub.f32 %v6791_v27, %v2595_v12  ;;  %4419 = vpow2.f32 %v2762_v42 }
 0x7d5   : > { %v4396_v44 = vpop.eup %4395  ;;  %4421 = vpow2.f32 %v2760_v29  ;;  %v2748_v60 = vmul.f32 1.442695, %v2682_v13 }
 0x7d6   : > { %2877 = vmatpush1.xpose.msra.mxu0 %v4386_v7  ;;  %2948 = vmatpush1.xpose.msra.mxu1 %v4386_v7  ;;  %v4398_v11 = vpop.eup %4397  ;;  %v6792_v7 = vld [vmem:[#allocation5_spill] sm:$0xff]  ;;  %v2756_v21 = vmul.f32 1.442695, %v2686_v43  ;;  %4423 = vpow2.f32 %v2758_v61 }
 0x7d7   : > { %2878 = vmatprep.subr.mxu0 %v4388_v16  ;;  %2949 = vmatprep.subr.mxu1 %v4388_v16  ;;  %v4400_v56 = vpop.eup %4399  ;;  %v2685_v32 = vsub.f32 %v6792_v7, %v2592_v15  ;;  %v6793_v16 = vld [vmem:[#allocation15_spill] sm:$0xff] }
 0x7d8   : > { %v4402_v35 = vpop.eup %4401  ;;  %v2684_v41 = vsub.f32 %v6793_v16, %v2592_v15  ;;  %4425 = vpow2.f32 %v2756_v21 }
 0x7d9   : > { %v4404_v26 = vpop.eup %4403  ;;  %v2754_v9 = vmul.f32 1.442695, %v2685_v32 }
 0x7da   : > { %2879 = vmatpush1.xpose.msra.mxu0 %v4390_v50  ;;  %2950 = vmatpush1.xpose.msra.mxu1 %v4390_v50  ;;  %v4406_v20 = vpop.eup %4405  ;;  %v6794_v50 = vld [vmem:[#allocation4_spill] sm:$0xff]  ;;  %v2752_v30 = vmul.f32 1.442695, %v2684_v41 }
 0x7db   : > { %2880 = vmatprep.subr.mxu0 %v4392_v28  ;;  %2951 = vmatprep.subr.mxu1 %v4392_v28  ;;  %v4408_v46 = vpop.eup %4407  ;;  %v2683_v57 = vsub.f32 %v6794_v50, %v2589_v49  ;;  %v2586_v28 = vpop.xlane.xlu0 %2585  ;;  %4427 = vpow2.f32 %v2754_v9 }
 0x7dc   : > { %v4410_v10 = vpop.eup %4409  ;;  %4429 = vpow2.f32 %v2752_v30 }
 0x7dd   : > { %v4412_v54 = vpop.eup %4411  ;;  %v2750_v23 = vmul.f32 1.442695, %v2683_v57 }
 0x7de   : > { %2881 = vmatpush1.xpose.msra.mxu0 %v4394_v0  ;;  %2952 = vmatpush1.xpose.msra.mxu1 %v4394_v0  ;;  %v4414_v0 = vpop.eup %4413 }
 0x7df   : > { %2882 = vmatprep.subr.mxu0 %v4396_v44  ;;  %2953 = vmatprep.subr.mxu1 %v4396_v44  ;;  %v2681_v44 = vsub.f32 %v6796_v37, %v2586_v28  ;;  %v4416_v58 = vpop.eup %4415  ;;  %4431 = vpow2.f32 %v2750_v23 }
 0x7e0   : > { %v4418_v52 = vpop.eup %4417  ;;  %4433 = vpow2.f32 %v2748_v60 }
 0x7e1   : > { %v2746_v62 = vmul.f32 1.442695, %v2681_v44  ;;  %v4420_v12 = vpop.eup %4419 }
 0x7e2   : > { %2883 = vmatpush1.xpose.msra.mxu0 %v4398_v11  ;;  %2954 = vmatpush1.xpose.msra.mxu1 %v4398_v11  ;;  %v2680_v11 = vsub.f32 %v6797_v4, %v2586_v28  ;;  %v4422_v25 = vpop.eup %4421 }
 0x7e3   : > { %2884 = vmatprep.subr.mxu0 %v4400_v56  ;;  %2955 = vmatprep.subr.mxu1 %v4400_v56  ;;  %4435 = vpow2.f32 %v2746_v62  ;;  %v4424_v33 = vpop.eup %4423 }
 0x7e4   : > { %v2744_v22 = vmul.f32 1.442695, %v2680_v11 }
 0x7e5   : > { %v4426_v43 = vpop.eup %4425 }
 0x7e6   : > { %2885 = vmatpush1.xpose.msra.mxu0 %v4402_v35  ;;  %2956 = vmatpush1.xpose.msra.mxu1 %v4402_v35  ;;  %4437 = vpow2.f32 %v2744_v22 }
 0x7e7   : > { %2886 = vmatprep.subr.mxu0 %v4404_v26  ;;  %2957 = vmatprep.subr.mxu1 %v4404_v26 }
 0x7e8   : > { %v4428_v32 = vpop.eup %4427 }
 0x7ea   : > { %2887 = vmatpush1.xpose.msra.mxu0 %v4406_v20  ;;  %2958 = vmatpush1.xpose.msra.mxu1 %v4406_v20 }
 0x7eb   : > { %2888 = vmatprep.subr.mxu0 %v4408_v46  ;;  %2959 = vmatprep.subr.mxu1 %v4408_v46  ;;  %v6798_v46 = vld [vmem:[#allocation10_spill] sm:$0xff] }
 0x7ee   : > { %2889 = vmatpush1.xpose.msra.mxu0 %v4410_v10  ;;  %2960 = vmatpush1.xpose.msra.mxu1 %v4410_v10 }
 0x7ef   : > { %2890 = vmatprep.subr.mxu0 %v4412_v54  ;;  %2961 = vmatprep.subr.mxu1 %v4412_v54 }
 0x7f2   : > { %2891 = vmatpush1.xpose.msra.mxu0 %v4414_v0  ;;  %2962 = vmatpush1.xpose.msra.mxu1 %v4414_v0 }
 0x7f3   : > { %2892 = vmatprep.subr.mxu0 %v4416_v58  ;;  %2963 = vmatprep.subr.mxu1 %v4416_v58 }
 0x7f5   : > { %v2676_v56 = vpop.xlane.xlu0 %2675 }
 0x7f6   : > { %2893 = vmatpush1.xpose.msra.mxu0 %v4418_v52  ;;  %2964 = vmatpush1.xpose.msra.mxu1 %v4418_v52  ;;  %v2741_v15 = vsub.f32 %v5975_v39, %v2676_v56  ;;  %v2740_v49 = vsub.f32 %v6798_v46, %v2676_v56  ;;  %v4430_v39 = vpop.eup %4429 }
 0x7f7   : > { %2894 = vmatprep.subr.mxu0 %v4420_v12  ;;  %2965 = vmatprep.subr.mxu1 %v4420_v12  ;;  %v4432_v41 = vpop.eup %4431 }
 0x7f8   : > { %v2866_v21 = vmul.f32 1.442695, %v2741_v15  ;;  %v2864_v10 = vmul.f32 1.442695, %v2740_v49 }
 0x7f9   : > { %v2670_v35 = vpop.xlane.xlu0 %2669  ;;  %v2679_v42 = vpop.xlane.xlu1 %2678 }
 0x7fa   : > { %2895 = vmatpush1.xpose.msra.mxu0 %v4422_v25  ;;  %2966 = vmatpush1.xpose.msra.mxu1 %v4422_v25  ;;  %v2742_v26 = vsub.f32 %v5977_v34, %v2679_v42  ;;  %v2743_v29 = vsub.f32 %v5985_v36, %v2679_v42  ;;  %v2737_v50 = vsub.f32 %v5980_v19, %v2670_v35 }
 0x7fb   : > { %2896 = vmatprep.subr.mxu0 %v4424_v33  ;;  %2967 = vmatprep.subr.mxu1 %v4424_v33  ;;  %v2736_v3 = vsub.f32 %v5968_v6, %v2670_v35 }
 0x7fc   : > { %v2868_v27 = vmul.f32 1.442695, %v2742_v26  ;;  %v2870_v20 = vmul.f32 1.442695, %v2743_v29 }
 0x7fd   : > { %v6104_v61 = vpop.xlane.xlu0 %2663  ;;  %v2673_v7 = vpop.xlane.xlu1 %2672  ;;  %v2856_v37 = vmul.f32 1.442695, %v2736_v3 }
 0x7fe   : > { %2897 = vmatpush1.xpose.msra.mxu0 %v4426_v43  ;;  %2968 = vmatpush1.xpose.msra.mxu1 %v4426_v43  ;;  %v2739_v34 = vsub.f32 %v5993_v53, %v2673_v7  ;;  %4439 = vpow2.f32 %v2868_v27  ;;  %v2738_v9 = vsub.f32 %v5970_v38, %v2673_v7  ;;  %v4434_v53 = vpop.eup %4433  ;;  %v2858_v38 = vmul.f32 1.442695, %v2737_v50 }
 0x7ff   : > { %2898 = vmatprep.subr.mxu0 %v4428_v32  ;;  %2969 = vmatprep.subr.mxu1 %v4428_v32  ;;  %4441 = vpow2.f32 %v2870_v20  ;;  %v4436_v30 = vpop.eup %4435  ;;  %v2733_v6 = vsub.f32 %v5988_v18, %v6104_v61  ;;  %v6800_v20 = vld [vmem:[#allocation7_spill] sm:$0xff] }
 0x800   : > { %4443 = vpow2.f32 %v2866_v21  ;;  %v2862_v57 = vmul.f32 1.442695, %v2739_v34  ;;  %v2860_v13 = vmul.f32 1.442695, %v2738_v9  ;;  %v4438_v19 = vpop.eup %4437 }
 0x801   : > { %v6108_v36 = vpop.xlane.xlu0 %2657  ;;  %v2667_v16 = vpop.xlane.xlu1 %2666  ;;  %4445 = vpow2.f32 %v2864_v10  ;;  %v2850_v56 = vmul.f32 1.442695, %v2733_v6  ;;  %v6801_v10 = vld [vmem:[#allocation18_spill] sm:$0xff] }
 0x802   : > { %2899 = vmatpush1.xpose.msra.mxu0 %v4430_v39  ;;  %2970 = vmatpush1.xpose.msra.mxu1 %v4430_v39  ;;  %4447 = vpow2.f32 %v2862_v57  ;;  %v2735_v0 = vsub.f32 %v6003_v48, %v2667_v16  ;;  %v2734_v44 = vsub.f32 %v5966_v40, %v2667_v16  ;;  %v2732_v48 = vsub.f32 %v5964_v63, %v6104_v61 }
 0x803   : > { %2900 = vmatprep.subr.mxu0 %v4432_v41  ;;  %2971 = vmatprep.subr.mxu1 %v4432_v41  ;;  %4449 = vpow2.f32 %v2860_v13  ;;  %v2728_v29 = vsub.f32 %v5960_v51, %v6108_v36 }
 0x804   : > { %4451 = vpow2.f32 %v2858_v38  ;;  %v2854_v58 = vmul.f32 1.442695, %v2735_v0  ;;  %v2852_v62 = vmul.f32 1.442695, %v2734_v44  ;;  %v2848_v18 = vmul.f32 1.442695, %v2732_v48 }
 0x805   : > { %v6112_v54 = vpop.xlane.xlu0 %2651  ;;  %v2661_v28 = vpop.xlane.xlu1 %2660  ;;  %4453 = vpow2.f32 %v2856_v37  ;;  %v2840_v21 = vmul.f32 1.442695, %v2728_v29  ;;  %v6802_v37 = vld [vmem:[#allocation11_spill] sm:$0xff] }
 0x806   : > { %2901 = vmatpush1.xpose.msra.mxu0 %v4434_v53  ;;  %2972 = vmatpush1.xpose.msra.mxu1 %v4434_v53  ;;  %4455 = vpow2.f32 %v2854_v58  ;;  %v2731_v40 = vsub.f32 %v6013_v8, %v2661_v28  ;;  %v2730_v25 = vsub.f32 %v5962_v24, %v2661_v28  ;;  %v2729_v8 = vsub.f32 %v5998_v17, %v6108_v36  ;;  %v6799_v24 = vld [vmem:[#allocation6_spill] sm:$0xff]  ;;  %v6808_v29 = vld [vmem:[#allocation3_spill] sm:$0xff] }
 0x807   : > { %2902 = vmatprep.subr.mxu0 %v4436_v30  ;;  %2973 = vmatprep.subr.mxu1 %v4436_v30  ;;  %4457 = vpow2.f32 %v2852_v62  ;;  %v2725_v39 = vsub.f32 %v6008_v14, %v6112_v54  ;;  %v2724_v41 = vsub.f32 %v5946_v55, %v6112_v54 }
 0x808   : > { %4459 = vpow2.f32 %v2850_v56  ;;  %v2846_v42 = vmul.f32 1.442695, %v2731_v40  ;;  %v2844_v27 = vmul.f32 1.442695, %v2730_v25  ;;  %v2842_v17 = vmul.f32 1.442695, %v2729_v8 }
 0x809   : > { %v6116_v23 = vpop.xlane.xlu1 %2654  ;;  %v6121_v60 = vpop.xlane.xlu0 %2645  ;;  %4461 = vpow2.f32 %v2848_v18  ;;  %v2834_v57 = vmul.f32 1.442695, %v2725_v39  ;;  %v2832_v30 = vmul.f32 1.442695, %v2724_v41  ;;  %v6805_v56 = vld [vmem:[#allocation9_spill] sm:$0xff]  ;;  %v6807_v8 = vld [vmem:[#allocation24_spill] sm:$0xff] }
 0x80a   : > { %2903 = vmatpush1.xpose.msra.mxu0 %v4438_v19  ;;  %2974 = vmatpush1.xpose.msra.mxu1 %v4438_v19  ;;  %4463 = vpow2.f32 %v2846_v42  ;;  %v2727_v32 = vsub.f32 %v6023_v45, %v6116_v23  ;;  %v2726_v51 = vsub.f32 %v5956_v59, %v6116_v23  ;;  %v2721_v54 = vsub.f32 %v6018_v5, %v6121_v60  ;;  %v6810_v41 = vld [vmem:[#allocation19_spill] sm:$0xff] }
 0x80b   : > { %v4440_v4 = vpop.eup %4439  ;;  %4465 = vpow2.f32 %v2844_v27 }
 0x80c   : > { %v4442_v52 = vpop.eup %4441  ;;  %4467 = vpow2.f32 %v2842_v17  ;;  %v2838_v45 = vmul.f32 1.442695, %v2727_v32  ;;  %v2836_v59 = vmul.f32 1.442695, %v2726_v51  ;;  %v2826_v19 = vmul.f32 1.442695, %v2721_v54 }
 0x80d   : > { %v6125_v11 = vpop.xlane.xlu1 %2648  ;;  %2904 = vmatprep.subr.mxu0 %v4442_v52  ;;  %2975 = vmatprep.subr.mxu1 %v4442_v52  ;;  %v4444_v12 = vpop.eup %4443  ;;  %4469 = vpow2.f32 %v2840_v21 }
 0x80e   : > { %2905 = vmatpush2.xpose.msra.mxu0 %v4440_v4  ;;  %2976 = vmatpush2.xpose.msra.mxu1 %v4440_v4  ;;  %v6128_v22 = vpop.xlane.xlu0 %2639  ;;  %v4446_v35 = vpop.eup %4445  ;;  %4471 = vpow2.f32 %v2838_v45  ;;  %v2723_v14 = vsub.f32 %v6034_v31, %v6125_v11  ;;  %v2722_v55 = vsub.f32 %v5932_v47, %v6125_v11  ;;  %v2720_v31 = vsub.f32 %v5919_v1, %v6121_v60  ;;  %v6803_v1 = vld [vmem:[#allocation13_spill] sm:$0xff]  ;;  %v6809_v45 = vld [vmem:[#allocation31_spill] sm:$0xff] }
 0x80f   : > { %2906 = vmatprep.subr.mxu0 %v4444_v12  ;;  %2977 = vmatprep.subr.mxu1 %v4444_v12  ;;  %v4448_v33 = vpop.eup %4447  ;;  %4473 = vpow2.f32 %v2836_v59  ;;  %v2717_v58 = vsub.f32 %v6803_v1, %v6128_v22 }
 0x810   : > { %v4450_v7 = vpop.eup %4449  ;;  %4475 = vpow2.f32 %v2834_v57  ;;  %v2830_v3 = vmul.f32 1.442695, %v2723_v14  ;;  %v2828_v38 = vmul.f32 1.442695, %v2722_v55  ;;  %v2824_v5 = vmul.f32 1.442695, %v2720_v31 }
 0x811   : > { %v6130_v63 = vpop.xlane.xlu1 %2642  ;;  %v4452_v46 = vpop.eup %4451  ;;  %4477 = vpow2.f32 %v2832_v30  ;;  %v2818_v62 = vmul.f32 1.442695, %v2717_v58  ;;  %v6813_v57 = vmov 0.0  }
 0x812   : > { %2907 = vmatpush2.xpose.msra.mxu0 %v4446_v35  ;;  %2978 = vmatpush2.xpose.msra.mxu1 %v4446_v35  ;;  %v4454_v34 = vpop.eup %4453  ;;  %4479 = vpow2.f32 %v2830_v3  ;;  %v2719_v47 = vsub.f32 %v6042_v2, %v6130_v63  ;;  %v2718_v44 = vsub.f32 %v6802_v37, %v6130_v63  ;;  %v6804_v2 = vld [vmem:[#allocation2_spill] sm:$0xff]  ;;  %v6806_v63 = vld [vmem:[#allocation12_spill] sm:$0xff] }
 0x813   : > { %2908 = vmatprep.subr.mxu0 %v4448_v33  ;;  %2979 = vmatprep.subr.mxu1 %v4448_v33  ;;  %v4456_v36 = vpop.eup %4455  ;;  %4481 = vpow2.f32 %v2828_v38  ;;  %v2716_v48 = vsub.f32 %v6804_v2, %v6128_v22 }
 0x814   : > { %v4458_v50 = vpop.eup %4457  ;;  %4483 = vpow2.f32 %v2826_v19  ;;  %v2822_v60 = vmul.f32 1.442695, %v2719_v47  ;;  %v2820_v11 = vmul.f32 1.442695, %v2718_v44 }
 0x815   : > { %v221_v26 = vpop.permute.xlu0 %220  ;;  %v6135_v15 = vpop.xlane.xlu1 %2636  ;;  %4485 = vpow2.f32 %v2824_v5  ;;  %v2816_v18 = vmul.f32 1.442695, %v2716_v48 }
 0x816   : > { %v385_v43 = vadd.f32 %v6799_v24, %v221_v26  ;;  %v387_v61 = vadd.f32 %v6800_v20, %v221_v26  ;;  %2909 = vmatpush2.xpose.msra.mxu0 %v4450_v7  ;;  %2980 = vmatpush2.xpose.msra.mxu1 %v4450_v7  ;;  %v4460_v53 = vpop.eup %4459  ;;  %4487 = vpow2.f32 %v2822_v60  ;;  %v2715_v40 = vsub.f32 %v6805_v56, %v6135_v15 }
 0x817   : > { %2910 = vmatprep.subr.mxu0 %v4452_v46  ;;  %2981 = vmatprep.subr.mxu1 %v4452_v46  ;;  %v4462_v28 = vpop.eup %4461  ;;  %4489 = vpow2.f32 %v2820_v11  ;;  %v2714_v25 = vsub.f32 %v6806_v63, %v6135_v15 }
 0x818   : > { %3060 = vxpose.xlu0.b32.start.end [1/1] (short) %v387_v61, 128  ;;  %3028 = vxpose.xlu1.b32.start.end [1/1] (short) %v385_v43, 128  ;;  %v4464_v13 = vpop.eup %4463  ;;  %4491 = vpow2.f32 %v2818_v62  ;;  %v2814_v22 = vmul.f32 1.442695, %v2715_v40 }
 0x819   : > { %v6143_v49 = vpop.xlane.xlu1 %2633  ;;  %v4466_v0 = vpop.eup %4465  ;;  %4493 = vpow2.f32 %v2816_v18  ;;  %v2812_v26 = vmul.f32 1.442695, %v2714_v25 }
 0x81a   : > { %2911 = vmatpush2.xpose.msra.mxu0 %v4454_v34  ;;  %2982 = vmatpush2.xpose.msra.mxu1 %v4454_v34  ;;  %v4468_v23 = vpop.eup %4467  ;;  %v2713_v42 = vsub.f32 %v6807_v8, %v6143_v49  ;;  %v2712_v27 = vsub.f32 %v6808_v29, %v6143_v49  ;;  %4495 = vpow2.f32 %v2814_v22  ;;  %v241_v34 = vpop.permute.xlu0 %240  ;;  %v6814_v8 = vld [vmem:[#allocation22_spill] sm:$0xff] }
 0x81b   : > { %2912 = vmatprep.subr.mxu0 %v4456_v36  ;;  %2983 = vmatprep.subr.mxu1 %v4456_v36  ;;  %v4470_v6 = vpop.eup %4469  ;;  %4497 = vpow2.f32 %v2812_v26  ;;  %v411_v36 = vadd.f32 %v6809_v45, %v241_v34 }
 0x81c   : > { %v4472_v4 = vpop.eup %4471  ;;  %v2810_v43 = vmul.f32 1.442695, %v2713_v42  ;;  %v2808_v20 = vmul.f32 1.442695, %v2712_v27 }
 0x81d   : > { %v6149_v16 = vpop.permute.xlu1 %255  ;;  %v4474_v52 = vpop.eup %4473 }
 0x81e   : > { %v429_v9 = vadd.f32 %v6801_v10, %v6149_v16  ;;  %2913 = vmatpush2.xpose.msra.mxu0 %v4458_v50  ;;  %2984 = vmatpush2.xpose.msra.mxu1 %v4458_v50  ;;  %v4476_v12 = vpop.eup %4475  ;;  %4499 = vpow2.f32 %v2810_v43  ;;  %v427_v59 = vadd.f32 %v6810_v41, %v6149_v16  ;;  %v6811_v10 = vld [vmem:[#allocation30_spill] sm:$0xff]  ;;  %v6812_v50 = vmov 1.0  }
 0x81f   : > { %2914 = vmatprep.subr.mxu0 %v4460_v53  ;;  %2985 = vmatprep.subr.mxu1 %v4460_v53  ;;  %v4478_v35 = vpop.eup %4477  ;;  %4501 = vpow2.f32 %v2808_v20 }
 0x820   : > { %2936 = vmatprep.mubr.f32.mxu0 %v429_v9  ;;  %v4480_v33 = vpop.eup %4479  ;;  %v409_v9 = vadd.f32 %v6811_v10, %v241_v34 }
 0x821   : > { %v4482_v24 = vpop.eup %4481 }
 0x822   : > { %2915 = vmatpush2.xpose.msra.mxu0 %v4462_v28  ;;  %2986 = vmatpush2.xpose.msra.mxu1 %v4462_v28  ;;  %v4484_v15 = vpop.eup %4483 }
 0x823   : > { %2916 = vmatprep.subr.mxu0 %v4464_v13  ;;  %2987 = vmatprep.subr.mxu1 %v4464_v13  ;;  %v4486_v61 = vpop.eup %4485 }
 0x824   : > { %v4488_v7 = vpop.eup %4487 }
 0x825   : > { %v4490_v17 = vpop.eup %4489 }
 0x826   : > { %2917 = vmatpush2.xpose.msra.mxu0 %v4466_v0  ;;  %2988 = vmatpush2.xpose.msra.mxu1 %v4466_v0  ;;  %v4492_v32 = vpop.eup %4491 }
 0x827   : > { %2918 = vmatprep.subr.mxu0 %v4468_v23  ;;  %2989 = vmatprep.subr.mxu1 %v4468_v23  ;;  %v4494_v46 = vpop.eup %4493 }
 0x828   : > { %v4496_v49 = vpop.eup %4495 }
 0x829   : > { %v4498_v21 = vpop.eup %4497 }
 0x82a   : > { %2919 = vmatpush2.xpose.msra.mxu0 %v4470_v6  ;;  %2990 = vmatpush2.xpose.msra.mxu1 %v4470_v6 }
 0x82b   : > { %2920 = vmatprep.subr.mxu0 %v4472_v4  ;;  %2991 = vmatprep.subr.mxu1 %v4472_v4  ;;  %v4500_v51 = vpop.eup %4499 }
 0x82c   : > { %v4502_v39 = vpop.eup %4501 }
 0x82e   : > { %2921 = vmatpush2.xpose.msra.mxu0 %v4474_v52  ;;  %2992 = vmatpush2.xpose.msra.mxu1 %v4474_v52 }
 0x82f   : > { %2922 = vmatprep.subr.mxu0 %v4476_v12  ;;  %2993 = vmatprep.subr.mxu1 %v4476_v12 }
 0x832   : > { %2923 = vmatpush2.xpose.msra.mxu0 %v4478_v35  ;;  %2994 = vmatpush2.xpose.msra.mxu1 %v4478_v35 }
 0x833   : > { %2924 = vmatprep.subr.mxu0 %v4480_v33  ;;  %2995 = vmatprep.subr.mxu1 %v4480_v33 }
 0x836   : > { %2925 = vmatpush2.xpose.msra.mxu0 %v4482_v24  ;;  %2996 = vmatpush2.xpose.msra.mxu1 %v4482_v24 }
 0x837   : > { %2926 = vmatprep.subr.mxu0 %v4484_v15  ;;  %2997 = vmatprep.subr.mxu1 %v4484_v15 }
 0x83a   : > { %2927 = vmatpush2.xpose.msra.mxu0 %v4486_v61  ;;  %2998 = vmatpush2.xpose.msra.mxu1 %v4486_v61 }
 0x83b   : > { %2928 = vmatprep.subr.mxu0 %v4488_v7  ;;  %2999 = vmatprep.subr.mxu1 %v4488_v7 }
 0x83e   : > { %2929 = vmatpush2.xpose.msra.mxu0 %v4490_v17  ;;  %3000 = vmatpush2.xpose.msra.mxu1 %v4490_v17 }
 0x83f   : > { %2930 = vmatprep.subr.mxu0 %v4492_v32  ;;  %3001 = vmatprep.subr.mxu1 %v4492_v32 }
 0x842   : > { %2931 = vmatpush2.xpose.msra.mxu0 %v4494_v46  ;;  %3002 = vmatpush2.xpose.msra.mxu1 %v4494_v46 }
 0x843   : > { %2932 = vmatprep.subr.mxu0 %v4496_v49  ;;  %3003 = vmatprep.subr.mxu1 %v4496_v49 }
 0x846   : > { %2933 = vmatpush2.xpose.msra.mxu0 %v4498_v21  ;;  %3004 = vmatpush2.xpose.msra.mxu1 %v4498_v21 }
 0x847   : > { %2934 = vmatprep.subr.mxu0 %v4500_v51  ;;  %3005 = vmatprep.subr.mxu1 %v4500_v51 }
 0x84a   : > { %2935 = vmatpush2.xpose.msra.mxu0 %v4502_v39  ;;  %3006 = vmatpush2.xpose.msra.mxu1 %v4502_v39 }
 0x84b   : > { %3218 = vmatprep.subr.mxu0 %v411_v36 }
 0x84d   : > { %2937 = vmatmul.mubr.f32.vlgmr.msra.gmra.mxu0 %v427_v59  ;;  %3008 = vmatmul.mubr.f32.vlgmr.msra.gmra.mxu1 %v6812_v50 }
 0x84e   : > { %3219 = vmatpush1.msra.mxu0 %v409_v9  ;;  %3252 = vmatprep.mubr.f32.mxu0 %v6813_v57 }
 0x894   : > { %v3044_v14 = vpop.trf.xlu1  ;;  %v3076_v31 = vpop.trf.xlu0 }
 0x895   : > { %4061 = vmatmul.mubr.msk.f32.vlgmr.msra.gmra.mxu0 %vm508_vm1, %v3044_v14 }
 0x896   : > { %3258 = vmatprep.mubr.f32.mxu0 %v6813_v57 }
 0x898   : > { %v3045_v53 = vpop.trf.xlu1  ;;  %v3077_v0 = vpop.trf.xlu0 }
 0x899   : > { %4062 = vmatmul.mubr.msk.f32.gmra.mxu0 %vm508_vm1, %v3045_v53 }
 0x89a   : > { %3264 = vmatprep.mubr.f32.mxu0 %v6813_v57 }
 0x89c   : > { %v3046_v16 = vpop.trf.xlu1  ;;  %v3078_v23 = vpop.trf.xlu0 }
 0x89d   : > { %4063 = vmatmul.mubr.msk.f32.gmra.mxu0 %vm508_vm1, %v3046_v16 }
 0x89e   : > { %3270 = vmatprep.mubr.f32.mxu0 %v6813_v57 }
 0x8a0   : > { %v3047_v28 = vpop.trf.xlu1  ;;  %v3079_v37 = vpop.trf.xlu0 }
 0x8a1   : > { %4064 = vmatmul.mubr.msk.f32.gmra.mxu0 %vm508_vm1, %v3047_v28 }
 0x8a2   : > { %3276 = vmatprep.mubr.f32.mxu0 %v6813_v57 }
 0x8a4   : > { %v3048_v30 = vpop.trf.xlu1  ;;  %v3080_v1 = vpop.trf.xlu0 }
 0x8a5   : > { %4065 = vmatmul.mubr.msk.f32.gmra.mxu0 %vm508_vm1, %v3048_v30 }
 0x8a6   : > { %3282 = vmatprep.mubr.f32.mxu0 %v6813_v57 }
 0x8a8   : > { %v3049_v55 = vpop.trf.xlu1  ;;  %v3081_v60 = vpop.trf.xlu0 }
 0x8a9   : > { %4066 = vmatmul.mubr.msk.f32.gmra.mxu0 %vm508_vm1, %v3049_v55 }
 0x8aa   : > { %3288 = vmatprep.mubr.f32.mxu0 %v6813_v57 }
 0x8ac   : > { %v3050_v54 = vpop.trf.xlu1  ;;  %v3082_v4 = vpop.trf.xlu0 }
 0x8ad   : > { %4067 = vmatmul.mubr.msk.f32.gmra.mxu0 %vm508_vm1, %v3050_v54 }
 0x8ae   : > { %3294 = vmatprep.mubr.f32.mxu0 %v6813_v57 }
 0x8b0   : > { %v3051_v3 = vpop.trf.xlu1  ;;  %v3083_v2 = vpop.trf.xlu0 }
 0x8b1   : > { %4068 = vmatmul.mubr.msk.f32.gmra.mxu0 %vm508_vm1, %v3051_v3 }
 0x8b2   : > { %3300 = vmatprep.mubr.f32.mxu0 %v6813_v57 }
 0x8b4   : > { %v3052_v13 = vpop.trf.xlu1  ;;  %v3084_v48 = vpop.trf.xlu0 }
 0x8b5   : > { %4069 = vmatmul.mubr.msk.f32.gmra.mxu0 %vm508_vm1, %v3052_v13 }
 0x8b6   : > { %3306 = vmatprep.mubr.f32.mxu0 %v6813_v57 }
 0x8b8   : > { %v3053_v38 = vpop.trf.xlu1  ;;  %v3085_v11 = vpop.trf.xlu0 }
 0x8b9   : > { %4070 = vmatmul.mubr.msk.f32.gmra.mxu0 %vm508_vm1, %v3053_v38  ;;  %v6819_v38 = vld [vmem:[#allocation8_spill] sm:$0xff] }
 0x8ba   : > { %3312 = vmatprep.mubr.f32.mxu0 %v6813_v57 }
 0x8bc   : > { %v3054_v19 = vpop.trf.xlu1  ;;  %v3086_v52 = vpop.trf.xlu0 }
 0x8bd   : > { %4071 = vmatmul.mubr.msk.f32.gmra.mxu0 %vm508_vm1, %v3054_v19 }
 0x8be   : > { %3318 = vmatprep.mubr.f32.mxu0 %v6813_v57 }
 0x8c0   : > { %v3055_v47 = vpop.trf.xlu1  ;;  %v3087_v62 = vpop.trf.xlu0 }
 0x8c1   : > { %4072 = vmatmul.mubr.msk.f32.gmra.mxu0 %vm508_vm1, %v3055_v47 }
 0x8c2   : > { %3324 = vmatprep.mubr.f32.mxu0 %v6813_v57 }
 0x8c4   : > { %v3056_v5 = vpop.trf.xlu1  ;;  %v3088_v56 = vpop.trf.xlu0 }
 0x8c5   : > { %4073 = vmatmul.mubr.msk.f32.gmra.mxu0 %vm508_vm1, %v3056_v5 }
 0x8c6   : > { %3330 = vmatprep.mubr.f32.mxu0 %v6813_v57 }
 0x8c8   : > { %v3057_v44 = vpop.trf.xlu1  ;;  %v3089_v40 = vpop.trf.xlu0 }
 0x8c9   : > { %4074 = vmatmul.mubr.msk.f32.gmra.mxu0 %vm508_vm1, %v3057_v44 }
 0x8ca   : > { %3336 = vmatprep.mubr.f32.mxu0 %v6813_v57 }
 0x8cc   : > { %v3058_v6 = vpop.trf.xlu1  ;;  %v3090_v12 = vpop.trf.xlu0 }
 0x8cd   : > { %4075 = vmatmul.mubr.msk.f32.gmra.mxu0 %vm508_vm1, %v3058_v6 }
 0x8ce   : > { %3342 = vmatprep.mubr.f32.mxu0 %v6813_v57 }
 0x8d0   : > { %v3059_v58 = vpop.trf.xlu1  ;;  %v3091_v63 = vpop.trf.xlu0 }
 0x8d1   : > { %4076 = vmatmul.mubr.msk.f32.gmra.mxu0 %vm508_vm1, %v3059_v58 }
 0x8d2   : > { %3348 = vmatprep.mubr.f32.mxu0 %v6813_v57 }
 0x8d5   : > { %4077 = vmatmul.mubr.msk.f32.gmra.mxu0 %vm508_vm1, %v3076_v31 }
 0x8d6   : > { %3354 = vmatprep.mubr.f32.mxu0 %v6813_v57 }
 0x8d9   : > { %4078 = vmatmul.mubr.msk.f32.gmra.mxu0 %vm508_vm1, %v3077_v0 }
 0x8da   : > { %3360 = vmatprep.mubr.f32.mxu0 %v6813_v57 }
 0x8dd   : > { %4079 = vmatmul.mubr.msk.f32.gmra.mxu0 %vm508_vm1, %v3078_v23 }
 0x8de   : > { %3366 = vmatprep.mubr.f32.mxu0 %v6813_v57 }
 0x8e1   : > { %4080 = vmatmul.mubr.msk.f32.gmra.mxu0 %vm508_vm1, %v3079_v37 }
 0x8e2   : > { %3372 = vmatprep.mubr.f32.mxu0 %v6813_v57 }
 0x8e5   : > { %4081 = vmatmul.mubr.msk.f32.gmra.mxu0 %vm508_vm1, %v3080_v1 }
 0x8e6   : > { %3378 = vmatprep.mubr.f32.mxu0 %v6813_v57 }
 0x8e9   : > { %4082 = vmatmul.mubr.msk.f32.gmra.mxu0 %vm508_vm1, %v3081_v60 }
 0x8ea   : > { %3384 = vmatprep.mubr.f32.mxu0 %v6813_v57 }
 0x8ed   : > { %4083 = vmatmul.mubr.msk.f32.gmra.mxu0 %vm508_vm1, %v3082_v4 }
 0x8ee   : > { %3390 = vmatprep.mubr.f32.mxu0 %v6813_v57 }
 0x8f1   : > { %4084 = vmatmul.mubr.msk.f32.gmra.mxu0 %vm508_vm1, %v3083_v2 }
 0x8f2   : > { %3396 = vmatprep.mubr.f32.mxu0 %v6813_v57 }
 0x8f5   : > { %4085 = vmatmul.mubr.msk.f32.gmra.mxu0 %vm508_vm1, %v3084_v48 }
 0x8f6   : > { %3402 = vmatprep.mubr.f32.mxu0 %v6813_v57 }
 0x8f9   : > { %4086 = vmatmul.mubr.msk.f32.gmra.mxu0 %vm508_vm1, %v3085_v11 }
 0x8fa   : > { %3408 = vmatprep.mubr.f32.mxu0 %v6813_v57 }
 0x8fd   : > { %4087 = vmatmul.mubr.msk.f32.gmra.mxu0 %vm508_vm1, %v3086_v52 }
 0x8fe   : > { %3414 = vmatprep.mubr.f32.mxu0 %v6813_v57 }
 0x901   : > { %4088 = vmatmul.mubr.msk.f32.gmra.mxu0 %vm508_vm1, %v3087_v62 }
 0x902   : > { %3420 = vmatprep.mubr.f32.mxu0 %v6813_v57 }
 0x905   : > { %4089 = vmatmul.mubr.msk.f32.gmra.mxu0 %vm508_vm1, %v3088_v56 }
 0x906   : > { %3426 = vmatprep.mubr.f32.mxu0 %v6813_v57 }
 0x909   : > { %4090 = vmatmul.mubr.msk.f32.gmra.mxu0 %vm508_vm1, %v3089_v40 }
 0x90a   : > { %3432 = vmatprep.mubr.f32.mxu0 %v6813_v57 }
 0x90d   : > { %v3009_v18 = vpop.f32.mrf.mxu1  ;;  %4091 = vmatmul.mubr.msk.f32.gmra.mxu0 %vm508_vm1, %v3090_v12  ;;  %v2938_v22 = vpop.f32.mrf.mxu0 }
 0x90e   : > { %4503 = vrcp.f32 %v3009_v18  ;;  %3438 = vmatprep.mubr.f32.mxu0 %v6813_v57 }
 0x90f   : > { %v3011_v25 = vpop.f32.mrf.mxu1  ;;  %v2940_v27 = vpop.f32.mrf.mxu0 }
 0x910   : > { %4505 = vrcp.f32 %v3011_v25 }
 0x911   : > { %4092 = vmatmul.mubr.msk.f32.gmra.mxu0 %vm508_vm1, %v3091_v63 }
 0x912   : > { %3868 = vmatprep.mubr.f32.mxu0 %v6812_v50 }
 0x91b   : > { %v4504_v35 = vpop.eup %4503 }
 0x91c   : > { %v3019_v42 = vrot.slane %v4504_v35, %v6814_v8 }
 0x91d   : > { %v4506_v33 = vpop.eup %4505 }
 0x91e   : > { %v3024_v26 = vmul.f32 %v3019_v42, %v2938_v22  ;;  %v3023_v29 = vrot.slane %v4506_v33, %v6814_v8 }
 0x920   : > { %3026 = vst [vmem:[%s5366_s30 + $0x20] sm:$0xff] %v3024_v26  ;;  %v3025_v24 = vmul.f32 %v3023_v29, %v2940_v27 }
 0x922   : > { %3027 = vst [vmem:[%s5366_s30 + $0x28] sm:$0xff] %v3025_v24 }
 0x955   : > { %v6253_v43 = vpop.f32.mrf.mxu0 }
 0x956   : > { %6815 = vst [vmem:[#allocation27_spill] sm:$0xff] %v6253_v43 }
 0x957   : > { %v6255_v15 = vpop.f32.mrf.mxu0 }
 0x959   : > { %v6257_v20 = vpop.f32.mrf.mxu0 }
 0x95a   : > { %6816 = vst [vmem:[#allocation14_spill] sm:$0xff] %v6257_v20 }
 0x95b   : > { %v6259_v61 = vpop.f32.mrf.mxu0 }
 0x95d   : > { %v6261_v7 = vpop.f32.mrf.mxu0 }
 0x95e   : > { %6817 = vst [vmem:[#allocation29_spill] sm:$0xff] %v6261_v7 }
 0x95f   : > { %v6263_v17 = vpop.f32.mrf.mxu0 }
 0x961   : > { %v6265_v32 = vpop.f32.mrf.mxu0 }
 0x962   : > { %6818 = vst [vmem:[#allocation21_spill] sm:$0xff] %v6265_v32 }
 0x963   : > { %v6267_v46 = vpop.f32.mrf.mxu0 }
 0x965   : > { %v6269_v49 = vpop.f32.mrf.mxu0 }
 0x967   : > { %v3280_v21 = vpop.f32.mrf.mxu0 }
 0x968   : > { %v6349_v42 = vadd.f32 %v3280_v21, %v6819_v38 }
 0x969   : > { %v6271_v51 = vpop.f32.mrf.mxu0 }
 0x96a   : > { %v3457_v21 = vmax.f32 %v6269_v49, %v6349_v42 }
 0x96b   : > { %v3286_v34 = vpop.f32.mrf.mxu0 }
 0x96d   : > { %v6273_v39 = vpop.f32.mrf.mxu0 }
 0x96f   : > { %v3292_v45 = vpop.f32.mrf.mxu0 }
 0x970   : > { %v6335_v12 = vadd.f32 %v3292_v45, %v6819_v38  ;;  %v6364_v45 = vadd.f32 %v6263_v17, %v6819_v38 }
 0x971   : > { %v6275_v36 = vpop.f32.mrf.mxu0 }
 0x972   : > { %v3463_v33 = vmax.f32 %v6273_v39, %v6335_v12  ;;  %6824 = vst [vmem:[#allocation4_spill] sm:$0xff] %v6364_v45  ;;  %v3451_v17 = vmax.f32 %v6261_v7, %v6364_v45 }
 0x973   : > { %v3298_v41 = vpop.f32.mrf.mxu0 }
 0x974   : > { %v6354_v26 = vadd.f32 %v3298_v41, %v6819_v38 }
 0x975   : > { %v6277_v59 = vpop.f32.mrf.mxu0 }
 0x976   : > { %v3466_v41 = vmax.f32 %v6275_v36, %v6354_v26 }
 0x977   : > { %v3304_v10 = vpop.f32.mrf.mxu0 }
 0x978   : > { %v6321_v48 = vadd.f32 %v3304_v10, %v6819_v38  ;;  %v6369_v10 = vadd.f32 %v3286_v34, %v6819_v38 }
 0x979   : > { %v6279_v9 = vpop.f32.mrf.mxu0 }
 0x97a   : > { %v3469_v18 = vmax.f32 %v6277_v59, %v6321_v48  ;;  %v3460_v34 = vmax.f32 %v6271_v51, %v6369_v10 }
 0x97b   : > { %v3310_v57 = vpop.f32.mrf.mxu0 }
 0x97c   : > { %v6340_v63 = vadd.f32 %v3310_v57, %v6819_v38 }
 0x97d   : > { %v6281_v14 = vpop.f32.mrf.mxu0 }
 0x97e   : > { %v3472_v29 = vmax.f32 %v6279_v9, %v6340_v63 }
 0x97f   : > { %v3316_v53 = vpop.f32.mrf.mxu0 }
 0x980   : > { %v6307_v6 = vadd.f32 %v3316_v53, %v6819_v38 }
 0x981   : > { %v6283_v16 = vpop.f32.mrf.mxu0 }
 0x982   : > { %v3475_v11 = vmax.f32 %v6281_v14, %v6307_v6 }
 0x983   : > { %v3322_v28 = vpop.f32.mrf.mxu0 }
 0x984   : > { %v6326_v52 = vadd.f32 %v3322_v28, %v6819_v38  ;;  %v6377_v28 = vadd.f32 %v6255_v15, %v6819_v38  ;;  %v6393_v15 = vadd.f32 %v6259_v61, %v6819_v38 }
 0x985   : > { %v6285_v30 = vpop.f32.mrf.mxu0 }
 0x986   : > { %v3478_v25 = vmax.f32 %v6283_v16, %v6326_v52  ;;  %6825 = vst [vmem:[#allocation25_spill] sm:$0xff] %v6377_v28  ;;  %6826 = vst [vmem:[#allocation20_spill] sm:$0xff] %v6393_v15 }
 0x987   : > { %v3328_v55 = vpop.f32.mrf.mxu0 }
 0x988   : > { %v6297_v47 = vadd.f32 %v3328_v55, %v6819_v38  ;;  %v6383_v55 = vadd.f32 %v6267_v46, %v6819_v38 }
 0x989   : > { %v6287_v54 = vpop.f32.mrf.mxu0 }
 0x98a   : > { %v3481_v1 = vmax.f32 %v6285_v30, %v6297_v47 }
 0x98b   : > { %v3334_v3 = vpop.f32.mrf.mxu0 }
 0x98c   : > { %v6312_v58 = vadd.f32 %v3334_v3, %v6819_v38 }
 0x98d   : > { %v6289_v13 = vpop.f32.mrf.mxu0 }
 0x98e   : > { %v3484_v62 = vmax.f32 %v6287_v54, %v6312_v58 }
 0x98f   : > { %v3340_v31 = vpop.f32.mrf.mxu0 }
 0x990   : > { %v6292_v0 = vadd.f32 %v3340_v31, %v6819_v38 }
 0x991   : > { %v6294_v19 = vpop.f32.mrf.mxu0 }
 0x992   : > { %v3487_v23 = vmax.f32 %v6289_v13, %v6292_v0 }
 0x993   : > { %v3346_v5 = vpop.f32.mrf.mxu0 }
 0x994   : > { %v6302_v37 = vadd.f32 %v3346_v5, %v6819_v38  ;;  %3488 = vmax.xlane.f32.xlu1 %v3487_v23  ;;  %v3445_v23 = vmax.f32 %v6253_v43, %v6377_v28  ;;  %v3454_v5 = vmax.f32 %v6265_v32, %v6383_v55 }
 0x995   : > { %v6304_v44 = vpop.f32.mrf.mxu0 }
 0x996   : > { %6820 = vst [vmem:[#allocation28_spill] sm:$0xff] %v6304_v44  ;;  %v3490_v60 = vmax.f32 %v6294_v19, %v6302_v37 }
 0x997   : > { %v6316_v4 = vpop.f32.mrf.mxu0 }
 0x998   : > { %3482 = vmax.xlane.f32.xlu1 %v3481_v1  ;;  %3491 = vmax.xlane.f32.xlu0 %v3490_v60  ;;  %v3448_v60 = vmax.f32 %v6257_v20, %v6393_v15 }
 0x999   : > { %v6318_v2 = vpop.f32.mrf.mxu0 }
 0x99a   : > { %6821 = vst [vmem:[#allocation26_spill] sm:$0xff] %v6318_v2 }
 0x99b   : > { %v6330_v56 = vpop.f32.mrf.mxu0 }
 0x99c   : > { %3476 = vmax.xlane.f32.xlu1 %v3475_v11  ;;  %3485 = vmax.xlane.f32.xlu0 %v3484_v62 }
 0x99d   : > { %v6332_v40 = vpop.f32.mrf.mxu0 }
 0x99e   : > { %6822 = vst [vmem:[#allocation5_spill] sm:$0xff] %v6332_v40 }
 0x99f   : > { %v6344_v35 = vpop.f32.mrf.mxu0 }
 0x9a0   : > { %3470 = vmax.xlane.f32.xlu1 %v3469_v18  ;;  %3479 = vmax.xlane.f32.xlu0 %v3478_v25 }
 0x9a1   : > { %v6346_v22 = vpop.f32.mrf.mxu0 }
 0x9a2   : > { %6823 = vst [vmem:[#allocation15_spill] sm:$0xff] %v6346_v22 }
 0x9a3   : > { %v6358_v27 = vpop.f32.mrf.mxu0 }
 0x9a4   : > { %3464 = vmax.xlane.f32.xlu1 %v3463_v33  ;;  %3473 = vmax.xlane.f32.xlu0 %v3472_v29 }
 0x9a5   : > { %v6360_v24 = vpop.f32.mrf.mxu0 }
 0x9a7   : > { %v3376_v57 = vpop.f32.mrf.mxu0 }
 0x9a8   : > { %3458 = vmax.xlane.f32.xlu1 %v3457_v21  ;;  %3467 = vmax.xlane.f32.xlu0 %v3466_v41 }
 0x9a9   : > { %v6373_v53 = vpop.f32.mrf.mxu0 }
 0x9ab   : > { %v3382_v3 = vpop.f32.mrf.mxu0 }
 0x9ac   : > { %3452 = vmax.xlane.f32.xlu1 %v3451_v17  ;;  %3461 = vmax.xlane.f32.xlu0 %v3460_v34 }
 0x9ad   : > { %v6387_v31 = vpop.f32.mrf.mxu0 }
 0x9af   : > { %v3388_v46 = vpop.f32.mrf.mxu0 }
 0x9b0   : > { %3446 = vmax.xlane.f32.xlu1 %v3445_v23  ;;  %3455 = vmax.xlane.f32.xlu0 %v3454_v5 }
 0x9b1   : > { %v6397_v1 = vpop.f32.mrf.mxu0 }
 0x9b3   : > { %v3394_v11 = vpop.f32.mrf.mxu0 }
 0x9b4   : > { %3449 = vmax.xlane.f32.xlu0 %v3448_v60 }
 0x9b5   : > { %v6401_v62 = vpop.f32.mrf.mxu0 }
 0x9b7   : > { %v3400_v18 = vpop.f32.mrf.mxu0 }
 0x9b9   : > { %v6403_v25 = vpop.f32.mrf.mxu0 }
 0x9bb   : > { %v3406_v61 = vpop.f32.mrf.mxu0 }
 0x9bd   : > { %v6405_v33 = vpop.f32.mrf.mxu0 }
 0x9bf   : > { %v3412_v29 = vpop.f32.mrf.mxu0 }
 0x9c0   : > { %v6429_v45 = vadd.f32 %v3412_v29, %v6819_v38 }
 0x9c1   : > { %v6407_v21 = vpop.f32.mrf.mxu0 }
 0x9c3   : > { %v3418_v41 = vpop.f32.mrf.mxu0 }
 0x9c5   : > { %v6409_v17 = vpop.f32.mrf.mxu0 }
 0x9c7   : > { %v3424_v34 = vpop.f32.mrf.mxu0 }
 0x9c8   : > { %v6421_v28 = vadd.f32 %v3424_v34, %v6819_v38 }
 0x9c9   : > { %v6411_v23 = vpop.f32.mrf.mxu0 }
 0x9cb   : > { %v3430_v5 = vpop.f32.mrf.mxu0 }
 0x9cc   : > { %v6434_v32 = vadd.f32 %v3430_v5, %v6819_v38  ;;  %v6449_v5 = vadd.f32 %v3388_v46, %v6819_v38  ;;  %v6464_v46 = vadd.f32 %v3394_v11, %v6819_v38  ;;  %v6481_v11 = vadd.f32 %v6316_v4, %v6819_v38 }
 0x9cd   : > { %v6413_v8 = vpop.f32.mrf.mxu0 }
 0x9ce   : > { %6827 = vst [vmem:[#allocation23_spill] sm:$0xff] %v6413_v8  ;;  %v3532_v29 = vmax.f32 %v6411_v23, %v6434_v32  ;;  %6829 = vst [vmem:[#allocation6_spill] sm:$0xff] %v6481_v11 }
 0x9cf   : > { %v3436_v60 = vpop.f32.mrf.mxu0 }
 0x9d0   : > { %v6416_v50 = vadd.f32 %v3436_v60, %v6819_v38  ;;  %v3529_v60 = vmax.f32 %v6409_v17, %v6421_v28 }
 0x9d1   : > { %v6418_v43 = vpop.f32.mrf.mxu0 }
 0x9d2   : > { %v3535_v20 = vmax.f32 %v6413_v8, %v6416_v50  ;;  %v6439_v8 = vadd.f32 %v3400_v18, %v6819_v38  ;;  %v6454_v18 = vadd.f32 %v3406_v61, %v6819_v38  ;;  %v6470_v61 = vadd.f32 %v6344_v35, %v6819_v38 }
 0x9d3   : > { %v3442_v15 = vpop.f32.mrf.mxu0  ;;  %v6487_v35 = vadd.f32 %v6358_v27, %v6819_v38 }
 0x9d4   : > { %v6426_v7 = vadd.f32 %v3442_v15, %v6819_v38  ;;  %3536 = vmax.xlane.f32.xlu1 %v3535_v20  ;;  %v3523_v20 = vmax.f32 %v6405_v33, %v6429_v45  ;;  %v6444_v15 = vadd.f32 %v3418_v41, %v6819_v38  ;;  %v6459_v41 = vadd.f32 %v3376_v57, %v6819_v38 }
 0x9d5   : > { %6828 = vst [vmem:[#allocation10_spill] sm:$0xff] %v6470_v61  ;;  %v6475_v57 = vadd.f32 %v3382_v3, %v6819_v38  ;;  %v3502_v4 = vmax.f32 %v6346_v22, %v6487_v35 }
 0x9d6   : > { %v3538_v34 = vmax.f32 %v6418_v43, %v6426_v7 }
 0x9d7   : > { %v3508_v3 = vmax.f32 %v6373_v53, %v6475_v57 }
 0x9d8   : > { %3530 = vmax.xlane.f32.xlu1 %v3529_v60  ;;  %3539 = vmax.xlane.f32.xlu0 %v3538_v34  ;;  %v3517_v60 = vmax.f32 %v6401_v62, %v6439_v8  ;;  %v3526_v34 = vmax.f32 %v6407_v21, %v6444_v15 }
 0x9dc   : > { %3524 = vmax.xlane.f32.xlu1 %v3523_v20  ;;  %3533 = vmax.xlane.f32.xlu0 %v3532_v29  ;;  %v3511_v20 = vmax.f32 %v6387_v31, %v6449_v5  ;;  %v3520_v29 = vmax.f32 %v6403_v25, %v6454_v18 }
 0x9e0   : > { %3518 = vmax.xlane.f32.xlu1 %v3517_v60  ;;  %3527 = vmax.xlane.f32.xlu0 %v3526_v34  ;;  %v3505_v60 = vmax.f32 %v6360_v24, %v6459_v41  ;;  %v3514_v34 = vmax.f32 %v6397_v1, %v6464_v46 }
 0x9e4   : > { %3512 = vmax.xlane.f32.xlu1 %v3511_v20  ;;  %3521 = vmax.xlane.f32.xlu0 %v3520_v29  ;;  %v3499_v20 = vmax.f32 %v6332_v40, %v6470_v61  ;;  %v3493_v29 = vmax.f32 %v6304_v44, %v6481_v11 }
 0x9e8   : > { %3506 = vmax.xlane.f32.xlu1 %v3505_v60  ;;  %3515 = vmax.xlane.f32.xlu0 %v3514_v34  ;;  %v6495_v60 = vadd.f32 %v6330_v56, %v6819_v38  ;;  %v202_v34 = vld [vmem:[%s6596_s2 + $0x58] sm:$0xff] }
 0x9ea   : > { %6830 = vst [vmem:[#allocation7_spill] sm:$0xff] %v6495_v60  ;;  %v3496_v27 = vmax.f32 %v6318_v2, %v6495_v60 }
 0x9ec   : > { %3500 = vmax.xlane.f32.xlu1 %v3499_v20  ;;  %3509 = vmax.xlane.f32.xlu0 %v3508_v3 }
 0x9f0   : > { %3494 = vmax.xlane.f32.xlu1 %v3493_v29  ;;  %3503 = vmax.xlane.f32.xlu0 %v3502_v4 }
 0x9f4   : > { %3497 = vmax.xlane.f32.xlu0 %v3496_v27 }
 0xa0a   : > { %260 = vperm.xlu0 %4109, %v202_v34  }
 0xa1d   : > { %v3489_v20 = vpop.xlane.xlu1 %3488 }
 0xa1e   : > { %v3570_v3 = vsub.f32 %v6292_v0, %v3489_v20  ;;  %v3569_v29 = vsub.f32 %v6289_v13, %v3489_v20 }
 0xa20   : > { %v3663_v40 = vmul.f32 1.442695, %v3570_v3  ;;  %v3661_v34 = vmul.f32 1.442695, %v3569_v29 }
 0xa21   : > { %v3492_v44 = vpop.xlane.xlu0 %3491  ;;  %v3483_v27 = vpop.xlane.xlu1 %3482 }
 0xa22   : > { %v3571_v38 = vsub.f32 %v6294_v19, %v3492_v44  ;;  %v3572_v56 = vsub.f32 %v6302_v37, %v3492_v44  ;;  %v3566_v0 = vsub.f32 %v6297_v47, %v3483_v27  ;;  %v3565_v13 = vsub.f32 %v6285_v30, %v3483_v27 }
 0xa24   : > { %v3665_v4 = vmul.f32 1.442695, %v3571_v38  ;;  %v3667_v11 = vmul.f32 1.442695, %v3572_v56  ;;  %v3655_v44 = vmul.f32 1.442695, %v3566_v0 }
 0xa25   : > { %v3486_v2 = vpop.xlane.xlu0 %3485  ;;  %v3477_v3 = vpop.xlane.xlu1 %3476  ;;  %v3653_v38 = vmul.f32 1.442695, %v3565_v13 }
 0xa26   : > { %4507 = vpow2.f32 %v3665_v4  ;;  %v3568_v60 = vsub.f32 %v6312_v58, %v3486_v2  ;;  %v3567_v61 = vsub.f32 %v6287_v54, %v3486_v2  ;;  %v3562_v54 = vsub.f32 %v6307_v6, %v3477_v3 }
 0xa27   : > { %4509 = vpow2.f32 %v3667_v11  ;;  %v3561_v30 = vsub.f32 %v6281_v14, %v3477_v3 }
 0xa28   : > { %4511 = vpow2.f32 %v3663_v40  ;;  %v3659_v19 = vmul.f32 1.442695, %v3568_v60  ;;  %v3657_v37 = vmul.f32 1.442695, %v3567_v61  ;;  %v3647_v60 = vmul.f32 1.442695, %v3562_v54 }
 0xa29   : > { %v3480_v22 = vpop.xlane.xlu0 %3479  ;;  %4513 = vpow2.f32 %v3661_v34  ;;  %v3471_v29 = vpop.xlane.xlu1 %3470 }
 0xa2a   : > { %4515 = vpow2.f32 %v3659_v19  ;;  %v3564_v20 = vsub.f32 %v6326_v52, %v3480_v22  ;;  %v3563_v58 = vsub.f32 %v6283_v16, %v3480_v22  ;;  %v3645_v16 = vmul.f32 1.442695, %v3561_v30 }
 0xa2b   : > { %4517 = vpow2.f32 %v3657_v37  ;;  %v3558_v14 = vsub.f32 %v6321_v48, %v3471_v29 }
 0xa2c   : > { %4519 = vpow2.f32 %v3655_v44  ;;  %v3651_v2 = vmul.f32 1.442695, %v3564_v20  ;;  %v3649_v61 = vmul.f32 1.442695, %v3563_v58 }
 0xa2d   : > { %v3474_v47 = vpop.xlane.xlu0 %3473  ;;  %4521 = vpow2.f32 %v3653_v38  ;;  %v3639_v13 = vmul.f32 1.442695, %v3558_v14  ;;  %v3465_v44 = vpop.xlane.xlu1 %3464 }
 0xa2e   : > { %4523 = vpow2.f32 %v3651_v2  ;;  %v3560_v52 = vsub.f32 %v6340_v63, %v3474_v47  ;;  %v3559_v6 = vsub.f32 %v6279_v9, %v3474_v47  ;;  %v3557_v63 = vsub.f32 %v6277_v59, %v3471_v29 }
 0xa2f   : > { %4525 = vpow2.f32 %v3649_v61  ;;  %v3554_v59 = vsub.f32 %v6335_v12, %v3465_v44 }
 0xa30   : > { %4527 = vpow2.f32 %v3647_v60  ;;  %v3643_v4 = vmul.f32 1.442695, %v3560_v52  ;;  %v3641_v0 = vmul.f32 1.442695, %v3559_v6  ;;  %v3637_v48 = vmul.f32 1.442695, %v3557_v63 }
 0xa31   : > { %v3468_v34 = vpop.xlane.xlu0 %3467  ;;  %4529 = vpow2.f32 %v3645_v16  ;;  %v3459_v30 = vpop.xlane.xlu1 %3458 }
 0xa32   : > { %4531 = vpow2.f32 %v3643_v4  ;;  %v3556_v9 = vsub.f32 %v6354_v26, %v3468_v34  ;;  %v3555_v20 = vsub.f32 %v6275_v36, %v3468_v34  ;;  %v3553_v26 = vsub.f32 %v6273_v39, %v3465_v44 }
 0xa33   : > { %v4508_v40 = vpop.eup %4507  ;;  %4533 = vpow2.f32 %v3641_v0  ;;  %v3550_v39 = vsub.f32 %v6349_v42, %v3459_v30  ;;  %v6832_v0 = vld [vmem:[#allocation4_spill] sm:$0xff] }
 0xa34   : > { %v4510_v11 = vpop.eup %4509  ;;  %4535 = vpow2.f32 %v3639_v13  ;;  %v3635_v38 = vmul.f32 1.442695, %v3556_v9  ;;  %v3633_v2 = vmul.f32 1.442695, %v3555_v20  ;;  %v3629_v12 = vmul.f32 1.442695, %v3553_v26 }
 0xa35   : > { %3733 = vmatprep.subr.mxu1 %v4510_v11  ;;  %3804 = vmatprep.subr.mxu0 %v4510_v11  ;;  %v4512_v56 = vpop.eup %4511  ;;  %v3462_v54 = vpop.xlane.xlu0 %3461  ;;  %4537 = vpow2.f32 %v3637_v48  ;;  %v6835_v26 = vld [vmem:[#allocation14_spill] sm:$0xff] }
 0xa36   : > { %3734 = vmatpush1.xpose.msra.mxu1 %v4508_v40  ;;  %3805 = vmatpush1.xpose.msra.mxu0 %v4508_v40  ;;  %v4514_v22 = vpop.eup %4513  ;;  %v3631_v40 = vmul.f32 1.442695, %v3554_v59  ;;  %4539 = vpow2.f32 %v3635_v38  ;;  %v3552_v36 = vsub.f32 %v6369_v10, %v3462_v54  ;;  %v3551_v61 = vsub.f32 %v6271_v51, %v3462_v54  ;;  %v3453_v4 = vpop.xlane.xlu1 %3452 }
 0xa37   : > { %3735 = vmatprep.subr.mxu1 %v4512_v56  ;;  %3806 = vmatprep.subr.mxu0 %v4512_v56  ;;  %v4516_v27 = vpop.eup %4515  ;;  %4541 = vpow2.f32 %v3633_v2  ;;  %v3549_v10 = vsub.f32 %v6269_v49, %v3459_v30  ;;  %v3546_v49 = vsub.f32 %v6832_v0, %v3453_v4 }
 0xa38   : > { %v4518_v19 = vpop.eup %4517  ;;  %4543 = vpow2.f32 %v3631_v40  ;;  %v3627_v52 = vmul.f32 1.442695, %v3552_v36  ;;  %v3625_v16 = vmul.f32 1.442695, %v3551_v61  ;;  %v6836_v40 = vld [vmem:[#allocation25_spill] sm:$0xff] }
 0xa39   : > { %v4520_v37 = vpop.eup %4519  ;;  %v3456_v29 = vpop.xlane.xlu0 %3455  ;;  %4545 = vpow2.f32 %v3629_v12  ;;  %v3621_v42 = vmul.f32 1.442695, %v3549_v10  ;;  %v3615_v20 = vmul.f32 1.442695, %v3546_v49  ;;  %v6837_v12 = vld [vmem:[#allocation27_spill] sm:$0xff] }
 0xa3a   : > { %3736 = vmatpush1.xpose.msra.mxu1 %v4514_v22  ;;  %3807 = vmatpush1.xpose.msra.mxu0 %v4514_v22  ;;  %v4522_v3 = vpop.eup %4521  ;;  %v3623_v22 = vmul.f32 1.442695, %v3550_v39  ;;  %4547 = vpow2.f32 %v3627_v52  ;;  %v3548_v51 = vsub.f32 %v6383_v55, %v3456_v29  ;;  %v6833_v55 = vld [vmem:[#allocation29_spill] sm:$0xff] }
 0xa3b   : > { %3737 = vmatprep.subr.mxu1 %v4516_v27  ;;  %3808 = vmatprep.subr.mxu0 %v4516_v27  ;;  %v4524_v58 = vpop.eup %4523  ;;  %4549 = vpow2.f32 %v3625_v16  ;;  %v6831_v27 = vld [vmem:[#allocation21_spill] sm:$0xff] }
 0xa3c   : > { %v4526_v47 = vpop.eup %4525  ;;  %v3547_v34 = vsub.f32 %v6831_v27, %v3456_v29  ;;  %4551 = vpow2.f32 %v3623_v22 }
 0xa3d   : > { %v4528_v11 = vpop.eup %4527  ;;  %v3450_v9 = vpop.xlane.xlu0 %3449  ;;  %4553 = vpow2.f32 %v3621_v42  ;;  %v6838_v42 = vld [vmem:[#allocation23_spill] sm:$0xff] }
 0xa3e   : > { %3738 = vmatpush1.xpose.msra.mxu1 %v4518_v19  ;;  %3809 = vmatpush1.xpose.msra.mxu0 %v4518_v19  ;;  %v4530_v60 = vpop.eup %4529  ;;  %v3619_v19 = vmul.f32 1.442695, %v3548_v51  ;;  %v3617_v44 = vmul.f32 1.442695, %v3547_v34  ;;  %v3543_v2 = vsub.f32 %v6835_v26, %v3450_v9 }
 0xa3f   : > { %3739 = vmatprep.subr.mxu1 %v4520_v37  ;;  %3810 = vmatprep.subr.mxu0 %v4520_v37  ;;  %v4532_v56 = vpop.eup %4531  ;;  %v3545_v37 = vsub.f32 %v6833_v55, %v3453_v4 }
 0xa40   : > { %v4534_v6 = vpop.eup %4533  ;;  %4555 = vpow2.f32 %v3619_v19 }
 0xa41   : > { %v4536_v14 = vpop.eup %4535  ;;  %v3613_v54 = vmul.f32 1.442695, %v3545_v37  ;;  %4557 = vpow2.f32 %v3617_v44 }
 0xa42   : > { %3740 = vmatpush1.xpose.msra.mxu1 %v4522_v3  ;;  %3811 = vmatpush1.xpose.msra.mxu0 %v4522_v3  ;;  %v4538_v63 = vpop.eup %4537  ;;  %v6834_v3 = vld [vmem:[#allocation20_spill] sm:$0xff]  ;;  %4559 = vpow2.f32 %v3615_v20 }
 0xa43   : > { %3741 = vmatprep.subr.mxu1 %v4524_v58  ;;  %3812 = vmatprep.subr.mxu0 %v4524_v58  ;;  %v4540_v13 = vpop.eup %4539  ;;  %v3544_v59 = vsub.f32 %v6834_v3, %v3450_v9  ;;  %v3447_v58 = vpop.xlane.xlu1 %3446  ;;  %4561 = vpow2.f32 %v3613_v54 }
 0xa44   : > { %v4542_v48 = vpop.eup %4541  ;;  %v3542_v36 = vsub.f32 %v6836_v40, %v3447_v58  ;;  %v3541_v61 = vsub.f32 %v6837_v12, %v3447_v58 }
 0xa45   : > { %v4544_v38 = vpop.eup %4543 }
 0xa46   : > { %3742 = vmatpush1.xpose.msra.mxu1 %v4526_v47  ;;  %3813 = vmatpush1.xpose.msra.mxu0 %v4526_v47  ;;  %v4546_v47 = vpop.eup %4545  ;;  %v3607_v52 = vmul.f32 1.442695, %v3542_v36  ;;  %v3605_v10 = vmul.f32 1.442695, %v3541_v61 }
 0xa47   : > { %3743 = vmatprep.subr.mxu1 %v4528_v11  ;;  %3814 = vmatprep.subr.mxu0 %v4528_v11  ;;  %v3611_v11 = vmul.f32 1.442695, %v3544_v59  ;;  %v4548_v30 = vpop.eup %4547 }
 0xa48   : > { %v4550_v39 = vpop.eup %4549 }
 0xa49   : > { %4563 = vpow2.f32 %v3611_v11 }
 0xa4a   : > { %3744 = vmatpush1.xpose.msra.mxu1 %v4530_v60  ;;  %3815 = vmatpush1.xpose.msra.mxu0 %v4530_v60  ;;  %v3609_v60 = vmul.f32 1.442695, %v3543_v2 }
 0xa4b   : > { %3745 = vmatprep.subr.mxu1 %v4532_v56  ;;  %3816 = vmatprep.subr.mxu0 %v4532_v56  ;;  %v4552_v56 = vpop.eup %4551 }
 0xa4c   : > { %4565 = vpow2.f32 %v3609_v60  ;;  %v4554_v16 = vpop.eup %4553 }
 0xa4d   : > { %4567 = vpow2.f32 %v3607_v52  ;;  %v4556_v51 = vpop.eup %4555 }
 0xa4e   : > { %3746 = vmatpush1.xpose.msra.mxu1 %v4534_v6  ;;  %3817 = vmatpush1.xpose.msra.mxu0 %v4534_v6  ;;  %4569 = vpow2.f32 %v3605_v10  ;;  %v4558_v0 = vpop.eup %4557 }
 0xa4f   : > { %3747 = vmatprep.subr.mxu1 %v4536_v14  ;;  %3818 = vmatprep.subr.mxu0 %v4536_v14 }
 0xa52   : > { %3748 = vmatpush1.xpose.msra.mxu1 %v4538_v63  ;;  %3819 = vmatpush1.xpose.msra.mxu0 %v4538_v63 }
 0xa53   : > { %3749 = vmatprep.subr.mxu1 %v4540_v13  ;;  %3820 = vmatprep.subr.mxu0 %v4540_v13  ;;  %v4560_v13 = vpop.eup %4559 }
 0xa54   : > { %v4562_v55 = vpop.eup %4561 }
 0xa56   : > { %3750 = vmatpush1.xpose.msra.mxu1 %v4542_v48  ;;  %3821 = vmatpush1.xpose.msra.mxu0 %v4542_v48  ;;  %v4564_v20 = vpop.eup %4563 }
 0xa57   : > { %3751 = vmatprep.subr.mxu1 %v4544_v38  ;;  %3822 = vmatprep.subr.mxu0 %v4544_v38 }
 0xa59   : > { %v4566_v59 = vpop.eup %4565 }
 0xa5a   : > { %3752 = vmatpush1.xpose.msra.mxu1 %v4546_v47  ;;  %3823 = vmatpush1.xpose.msra.mxu0 %v4546_v47  ;;  %v4568_v54 = vpop.eup %4567 }
 0xa5b   : > { %3753 = vmatprep.subr.mxu1 %v4548_v30  ;;  %3824 = vmatprep.subr.mxu0 %v4548_v30  ;;  %v4570_v47 = vpop.eup %4569 }
 0xa5d   : > { %v3537_v29 = vpop.xlane.xlu1 %3536 }
 0xa5e   : > { %3754 = vmatpush1.xpose.msra.mxu1 %v4550_v39  ;;  %3825 = vmatpush1.xpose.msra.mxu0 %v4550_v39  ;;  %v3602_v6 = vsub.f32 %v6416_v50, %v3537_v29  ;;  %v3601_v27 = vsub.f32 %v6838_v42, %v3537_v29 }
 0xa5f   : > { %3755 = vmatprep.subr.mxu1 %v4552_v56  ;;  %3826 = vmatprep.subr.mxu0 %v4552_v56 }
 0xa60   : > { %v3727_v49 = vmul.f32 1.442695, %v3602_v6 }
 0xa61   : > { %v3540_v22 = vpop.xlane.xlu0 %3539  ;;  %v3531_v50 = vpop.xlane.xlu1 %3530 }
 0xa62   : > { %v3603_v14 = vsub.f32 %v6418_v43, %v3540_v22  ;;  %v3604_v4 = vsub.f32 %v6426_v7, %v3540_v22  ;;  %3756 = vmatpush1.xpose.msra.mxu1 %v4554_v16  ;;  %3827 = vmatpush1.xpose.msra.mxu0 %v4554_v16  ;;  %v3725_v43 = vmul.f32 1.442695, %v3601_v27  ;;  %v3598_v37 = vsub.f32 %v6421_v28, %v3531_v50 }
 0xa63   : > { %3757 = vmatprep.subr.mxu1 %v4556_v51  ;;  %3828 = vmatprep.subr.mxu0 %v4556_v51 }
 0xa64   : > { %v3729_v34 = vmul.f32 1.442695, %v3603_v14  ;;  %v3731_v63 = vmul.f32 1.442695, %v3604_v4  ;;  %v3719_v38 = vmul.f32 1.442695, %v3598_v37 }
 0xa65   : > { %v3534_v19 = vpop.xlane.xlu0 %3533  ;;  %v3525_v26 = vpop.xlane.xlu1 %3524 }
 0xa66   : > { %4571 = vpow2.f32 %v3729_v34  ;;  %v3600_v9 = vsub.f32 %v6434_v32, %v3534_v19  ;;  %3758 = vmatpush1.xpose.msra.mxu1 %v4558_v0  ;;  %3829 = vmatpush1.xpose.msra.mxu0 %v4558_v0  ;;  %v3599_v7 = vsub.f32 %v6411_v23, %v3534_v19  ;;  %v3597_v32 = vsub.f32 %v6409_v17, %v3531_v50 }
 0xa67   : > { %4573 = vpow2.f32 %v3731_v63  ;;  %3759 = vmatprep.subr.mxu1 %v4560_v13  ;;  %3830 = vmatprep.subr.mxu0 %v4560_v13  ;;  %v3594_v17 = vsub.f32 %v6429_v45, %v3525_v26  ;;  %v3593_v30 = vsub.f32 %v6405_v33, %v3525_v26 }
 0xa68   : > { %4575 = vpow2.f32 %v3727_v49  ;;  %v3723_v44 = vmul.f32 1.442695, %v3600_v9  ;;  %v3721_v3 = vmul.f32 1.442695, %v3599_v7  ;;  %v3717_v28 = vmul.f32 1.442695, %v3597_v32 }
 0xa69   : > { %v3528_v48 = vpop.xlane.xlu0 %3527  ;;  %4577 = vpow2.f32 %v3725_v43  ;;  %v3711_v61 = vmul.f32 1.442695, %v3594_v17  ;;  %v3519_v45 = vpop.xlane.xlu1 %3518  ;;  %v3709_v52 = vmul.f32 1.442695, %v3593_v30  ;;  %v6839_v7 = vld [vmem:[#allocation16_spill] sm:$0xff]  ;;  %v6843_v30 = vld [vmem:[#allocation7_spill] sm:$0xff] }
 0xa6a   : > { %3760 = vmatpush1.xpose.msra.mxu1 %v4562_v55  ;;  %3831 = vmatpush1.xpose.msra.mxu0 %v4562_v55  ;;  %4579 = vpow2.f32 %v3723_v44  ;;  %v3596_v23 = vsub.f32 %v6444_v15, %v3528_v48  ;;  %v3595_v2 = vsub.f32 %v6407_v21, %v3528_v48  ;;  %v3590_v29 = vsub.f32 %v6439_v8, %v3519_v45 }
 0xa6b   : > { %3761 = vmatprep.subr.mxu1 %v4564_v20  ;;  %3832 = vmatprep.subr.mxu0 %v4564_v20  ;;  %4581 = vpow2.f32 %v3721_v3  ;;  %v3589_v6 = vsub.f32 %v6401_v62, %v3519_v45 }
 0xa6c   : > { %4583 = vpow2.f32 %v3719_v38  ;;  %v3715_v40 = vmul.f32 1.442695, %v3596_v23  ;;  %v3713_v12 = vmul.f32 1.442695, %v3595_v2  ;;  %v3703_v14 = vmul.f32 1.442695, %v3590_v29 }
 0xa6d   : > { %v3522_v58 = vpop.xlane.xlu0 %3521  ;;  %4585 = vpow2.f32 %v3717_v28  ;;  %v3513_v42 = vpop.xlane.xlu1 %3512  ;;  %v3701_v8 = vmul.f32 1.442695, %v3589_v6 }
 0xa6e   : > { %3762 = vmatpush1.xpose.msra.mxu1 %v4566_v59  ;;  %3833 = vmatpush1.xpose.msra.mxu0 %v4566_v59  ;;  %4587 = vpow2.f32 %v3715_v40  ;;  %v3592_v60 = vsub.f32 %v6454_v18, %v3522_v58  ;;  %v3591_v56 = vsub.f32 %v6403_v25, %v3522_v58  ;;  %v3586_v62 = vsub.f32 %v6449_v5, %v3513_v42 }
 0xa6f   : > { %3763 = vmatprep.subr.mxu1 %v4568_v54  ;;  %3834 = vmatprep.subr.mxu0 %v4568_v54  ;;  %4589 = vpow2.f32 %v3713_v12  ;;  %v6840_v54 = vld [vmem:[#allocation15_spill] sm:$0xff] }
 0xa70   : > { %4591 = vpow2.f32 %v3711_v61  ;;  %v3707_v10 = vmul.f32 1.442695, %v3592_v60  ;;  %v3705_v22 = vmul.f32 1.442695, %v3591_v56  ;;  %v3695_v50 = vmul.f32 1.442695, %v3586_v62 }
 0xa71   : > { %v3516_v36 = vpop.xlane.xlu0 %3515  ;;  %4593 = vpow2.f32 %v3709_v52  ;;  %v3507_v43 = vpop.xlane.xlu1 %3506  ;;  %v6845_v56 = vld [vmem:[#allocation6_spill] sm:$0xff] }
 0xa72   : > { %3764 = vmatpush1.xpose.msra.mxu1 %v4570_v47  ;;  %3835 = vmatpush1.xpose.msra.mxu0 %v4570_v47  ;;  %4595 = vpow2.f32 %v3707_v10  ;;  %v3588_v25 = vsub.f32 %v6464_v46, %v3516_v36  ;;  %v3587_v27 = vsub.f32 %v6397_v1, %v3516_v36  ;;  %v3585_v46 = vsub.f32 %v6387_v31, %v3513_v42 }
 0xa73   : > { %v4572_v15 = vpop.eup %4571  ;;  %4597 = vpow2.f32 %v3705_v22  ;;  %v3581_v32 = vsub.f32 %v6360_v24, %v3507_v43  ;;  %v6841_v24 = vld [vmem:[#allocation10_spill] sm:$0xff] }
 0xa74   : > { %v4574_v11 = vpop.eup %4573  ;;  %4599 = vpow2.f32 %v3703_v14  ;;  %v3699_v63 = vmul.f32 1.442695, %v3588_v25  ;;  %v3697_v19 = vmul.f32 1.442695, %v3587_v27  ;;  %v3693_v37 = vmul.f32 1.442695, %v3585_v46 }
 0xa75   : > { %3765 = vmatprep.subr.mxu1 %v4574_v11  ;;  %3836 = vmatprep.subr.mxu0 %v4574_v11  ;;  %v6549_v21 = vpop.xlane.xlu0 %3509  ;;  %v4576_v39 = vpop.eup %4575  ;;  %4601 = vpow2.f32 %v3701_v8  ;;  %v6847_v46 = vld [vmem:[#allocation17_spill] sm:$0xff] }
 0xa76   : > { %3766 = vmatpush2.xpose.msra.mxu1 %v4572_v15  ;;  %3837 = vmatpush2.xpose.msra.mxu0 %v4572_v15  ;;  %v4578_v33 = vpop.eup %4577  ;;  %4603 = vpow2.f32 %v3699_v63  ;;  %v3584_v1 = vsub.f32 %v6475_v57, %v6549_v21  ;;  %v3583_v31 = vsub.f32 %v6373_v53, %v6549_v21  ;;  %v3582_v57 = vsub.f32 %v6459_v41, %v3507_v43  ;;  %v3501_v58 = vpop.xlane.xlu1 %3500 }
 0xa77   : > { %3767 = vmatprep.subr.mxu1 %v4576_v39  ;;  %3838 = vmatprep.subr.mxu0 %v4576_v39  ;;  %v4580_v18 = vpop.eup %4579  ;;  %4605 = vpow2.f32 %v3697_v19  ;;  %v3685_v41 = vmul.f32 1.442695, %v3581_v32  ;;  %v3578_v2 = vsub.f32 %v6841_v24, %v3501_v58  ;;  %v6844_v39 = vld [vmem:[#allocation26_spill] sm:$0xff] }
 0xa78   : > { %v4582_v51 = vpop.eup %4581  ;;  %4607 = vpow2.f32 %v3695_v50  ;;  %v3691_v48 = vmul.f32 1.442695, %v3584_v1  ;;  %v3689_v3 = vmul.f32 1.442695, %v3583_v31  ;;  %v3687_v38 = vmul.f32 1.442695, %v3582_v57 }
 0xa79   : > { %v6553_v16 = vpop.xlane.xlu0 %3503  ;;  %v4584_v4 = vpop.eup %4583  ;;  %4609 = vpow2.f32 %v3693_v37  ;;  %v3679_v11 = vmul.f32 1.442695, %v3578_v2 }
 0xa7a   : > { %3768 = vmatpush2.xpose.msra.mxu1 %v4578_v33  ;;  %3839 = vmatpush2.xpose.msra.mxu0 %v4578_v33  ;;  %v4586_v34 = vpop.eup %4585  ;;  %4611 = vpow2.f32 %v3691_v48  ;;  %v3580_v53 = vsub.f32 %v6487_v35, %v6553_v16  ;;  %v3579_v26 = vsub.f32 %v6840_v54, %v6553_v16  ;;  %v6842_v35 = vld [vmem:[#allocation5_spill] sm:$0xff]  ;;  %v3495_v60 = vpop.xlane.xlu1 %3494 }
 0xa7b   : > { %3769 = vmatprep.subr.mxu1 %v4580_v18  ;;  %3840 = vmatprep.subr.mxu0 %v4580_v18  ;;  %v4588_v49 = vpop.eup %4587  ;;  %4613 = vpow2.f32 %v3689_v3  ;;  %v3577_v40 = vsub.f32 %v6842_v35, %v3501_v58  ;;  %v3574_v33 = vsub.f32 %v6845_v56, %v3495_v60  ;;  %v6846_v18 = vld [vmem:[#allocation28_spill] sm:$0xff] }
 0xa7c   : > { %v4590_v13 = vpop.eup %4589  ;;  %4615 = vpow2.f32 %v3687_v38  ;;  %v3683_v47 = vmul.f32 1.442695, %v3580_v53  ;;  %v3681_v36 = vmul.f32 1.442695, %v3579_v26  ;;  %v3573_v16 = vsub.f32 %v6846_v18, %v3495_v60 }
 0xa7d   : > { %v6559_v0 = vpop.xlane.xlu0 %3497  ;;  %v4592_v5 = vpop.eup %4591  ;;  %4617 = vpow2.f32 %v3685_v41  ;;  %v3677_v21 = vmul.f32 1.442695, %v3577_v40 }
 0xa7e   : > { %3770 = vmatpush2.xpose.msra.mxu1 %v4582_v51  ;;  %3841 = vmatpush2.xpose.msra.mxu0 %v4582_v51  ;;  %v4594_v44 = vpop.eup %4593  ;;  %4619 = vpow2.f32 %v3683_v47  ;;  %v3576_v12 = vsub.f32 %v6843_v30, %v6559_v0  ;;  %v3575_v45 = vsub.f32 %v6844_v39, %v6559_v0  ;;  %v3671_v51 = vmul.f32 1.442695, %v3574_v33 }
 0xa7f   : > { %3771 = vmatprep.subr.mxu1 %v4584_v4  ;;  %3842 = vmatprep.subr.mxu0 %v4584_v4  ;;  %v4596_v20 = vpop.eup %4595  ;;  %4621 = vpow2.f32 %v3681_v36  ;;  %v3669_v25 = vmul.f32 1.442695, %v3573_v16 }
 0xa80   : > { %v4598_v59 = vpop.eup %4597  ;;  %4623 = vpow2.f32 %v3679_v11  ;;  %v3675_v29 = vmul.f32 1.442695, %v3576_v12  ;;  %v3673_v6 = vmul.f32 1.442695, %v3575_v45 }
 0xa81   : > { %v4600_v23 = vpop.eup %4599  ;;  %4625 = vpow2.f32 %v3677_v21 }
 0xa82   : > { %3772 = vmatpush2.xpose.msra.mxu1 %v4586_v34  ;;  %3843 = vmatpush2.xpose.msra.mxu0 %v4586_v34  ;;  %v4602_v28 = vpop.eup %4601  ;;  %4627 = vpow2.f32 %v3675_v29 }
 0xa83   : > { %3773 = vmatprep.subr.mxu1 %v4588_v49  ;;  %3844 = vmatprep.subr.mxu0 %v4588_v49  ;;  %v4604_v17 = vpop.eup %4603  ;;  %4629 = vpow2.f32 %v3673_v6 }
 0xa84   : > { %v4606_v15 = vpop.eup %4605  ;;  %4631 = vpow2.f32 %v3671_v51 }
 0xa85   : > { %v6564_v9 = vpop.permute.xlu0 %260  ;;  %v4608_v61 = vpop.eup %4607  ;;  %4633 = vpow2.f32 %v3669_v25 }
 0xa86   : > { %v435_v55 = vadd.f32 %v6839_v7, %v6564_v9  ;;  %3774 = vmatpush2.xpose.msra.mxu1 %v4590_v13  ;;  %3845 = vmatpush2.xpose.msra.mxu0 %v4590_v13  ;;  %v4610_v52 = vpop.eup %4609  ;;  %v433_v19 = vadd.f32 %v6847_v46, %v6564_v9  ;;  %v6848_v13 = vmov 1.0   ;;  %v6849_v7 = vld [vmem:[#allocation22_spill] sm:$0xff] }
 0xa87   : > { %3775 = vmatprep.subr.mxu1 %v4592_v5  ;;  %3846 = vmatprep.subr.mxu0 %v4592_v5  ;;  %v4612_v10 = vpop.eup %4611 }
 0xa88   : > { %3797 = vmatprep.mubr.f32.mxu1 %v435_v55  ;;  %v4614_v22 = vpop.eup %4613 }
 0xa89   : > { %v4616_v14 = vpop.eup %4615 }
 0xa8a   : > { %3776 = vmatpush2.xpose.msra.mxu1 %v4594_v44  ;;  %3847 = vmatpush2.xpose.msra.mxu0 %v4594_v44  ;;  %v4618_v4 = vpop.eup %4617 }
 0xa8b   : > { %3777 = vmatprep.subr.mxu1 %v4596_v20  ;;  %3848 = vmatprep.subr.mxu0 %v4596_v20  ;;  %v4620_v42 = vpop.eup %4619 }
 0xa8c   : > { %v4622_v8 = vpop.eup %4621 }
 0xa8d   : > { %v4624_v27 = vpop.eup %4623 }
 0xa8e   : > { %3778 = vmatpush2.xpose.msra.mxu1 %v4598_v59  ;;  %3849 = vmatpush2.xpose.msra.mxu0 %v4598_v59  ;;  %v4626_v34 = vpop.eup %4625 }
 0xa8f   : > { %3779 = vmatprep.subr.mxu1 %v4600_v23  ;;  %3850 = vmatprep.subr.mxu0 %v4600_v23  ;;  %v4628_v62 = vpop.eup %4627 }
 0xa90   : > { %v4630_v63 = vpop.eup %4629 }
 0xa91   : > { %v4632_v0 = vpop.eup %4631 }
 0xa92   : > { %3780 = vmatpush2.xpose.msra.mxu1 %v4602_v28  ;;  %3851 = vmatpush2.xpose.msra.mxu0 %v4602_v28  ;;  %v4634_v49 = vpop.eup %4633 }
 0xa93   : > { %3781 = vmatprep.subr.mxu1 %v4604_v17  ;;  %3852 = vmatprep.subr.mxu0 %v4604_v17 }
 0xa96   : > { %3782 = vmatpush2.xpose.msra.mxu1 %v4606_v15  ;;  %3853 = vmatpush2.xpose.msra.mxu0 %v4606_v15 }
 0xa97   : > { %3783 = vmatprep.subr.mxu1 %v4608_v61  ;;  %3854 = vmatprep.subr.mxu0 %v4608_v61 }
 0xa9a   : > { %3784 = vmatpush2.xpose.msra.mxu1 %v4610_v52  ;;  %3855 = vmatpush2.xpose.msra.mxu0 %v4610_v52 }
 0xa9b   : > { %3785 = vmatprep.subr.mxu1 %v4612_v10  ;;  %3856 = vmatprep.subr.mxu0 %v4612_v10 }
 0xa9e   : > { %3786 = vmatpush2.xpose.msra.mxu1 %v4614_v22  ;;  %3857 = vmatpush2.xpose.msra.mxu0 %v4614_v22 }
 0xa9f   : > { %3787 = vmatprep.subr.mxu1 %v4616_v14  ;;  %3858 = vmatprep.subr.mxu0 %v4616_v14 }
 0xaa2   : > { %3788 = vmatpush2.xpose.msra.mxu1 %v4618_v4  ;;  %3859 = vmatpush2.xpose.msra.mxu0 %v4618_v4 }
 0xaa3   : > { %3789 = vmatprep.subr.mxu1 %v4620_v42  ;;  %3860 = vmatprep.subr.mxu0 %v4620_v42 }
 0xaa6   : > { %3790 = vmatpush2.xpose.msra.mxu1 %v4622_v8  ;;  %3861 = vmatpush2.xpose.msra.mxu0 %v4622_v8 }
 0xaa7   : > { %3791 = vmatprep.subr.mxu1 %v4624_v27  ;;  %3862 = vmatprep.subr.mxu0 %v4624_v27 }
 0xaaa   : > { %3792 = vmatpush2.xpose.msra.mxu1 %v4626_v34  ;;  %3863 = vmatpush2.xpose.msra.mxu0 %v4626_v34 }
 0xaab   : > { %3793 = vmatprep.subr.mxu1 %v4628_v62  ;;  %3864 = vmatprep.subr.mxu0 %v4628_v62 }
 0xaae   : > { %3794 = vmatpush2.xpose.msra.mxu1 %v4630_v63  ;;  %3865 = vmatpush2.xpose.msra.mxu0 %v4630_v63 }
 0xaaf   : > { %3795 = vmatprep.subr.mxu1 %v4632_v0  ;;  %3866 = vmatprep.subr.mxu0 %v4632_v0 }
 0xab2   : > { %3796 = vmatpush2.xpose.msra.mxu1 %v4634_v49  ;;  %3867 = vmatpush2.xpose.msra.mxu0 %v4634_v49 }
 0xab5   : > { %3798 = vmatmul.mubr.f32.vlgmr.msra.gmra.mxu1 %v433_v19  ;;  %3869 = vmatmul.mubr.f32.vlgmr.msra.gmra.mxu0 %v6848_v13 }
 0xb75   : > { %v3870_v50 = vpop.f32.mrf.mxu0  ;;  %v3799_v43 = vpop.f32.mrf.mxu1 }
 0xb76   : > { %4635 = vrcp.f32 %v3870_v50 }
 0xb77   : > { %v3872_v1 = vpop.f32.mrf.mxu0  ;;  %v3801_v57 = vpop.f32.mrf.mxu1 }
 0xb78   : > { %4637 = vrcp.f32 %v3872_v1 }
 0xb83   : > { %v4636_v5 = vpop.eup %4635 }
 0xb84   : > { %v3880_v55 = vrot.slane %v4636_v5, %v6849_v7 }
 0xb85   : > { %v4638_v37 = vpop.eup %4637 }
 0xb86   : > { %v3885_v31 = vmul.f32 %v3880_v55, %v3799_v43  ;;  %v3884_v44 = vrot.slane %v4638_v37, %v6849_v7 }
 0xb88   : > { %3887 = vst [vmem:[%s5366_s30 + $0x30] sm:$0xff] %v3885_v31  ;;  %v3886_v48 = vmul.f32 %v3884_v44, %v3801_v57 }
 0xb8a   : > { %3888 = vst [vmem:[%s5366_s30 + $0x38] sm:$0xff] %v3886_v48 }
 0xb8b PF: > { %s13_s12 = sadd.s32 1, %s4645_s12  }
 0xb8c   : > { %p10_p4 = scmp.ge.s32.totalorder %s13_s12, 4  }
 0xb8e   :  { %12 = sbr.rel (!%p10_p4) target bundleno = 1 (0x1), region = 62 }

</bundles_post_ra>
